<compile_context>
chip_gen: v6e
topology: v6e:2x2x1
jax: 0.10.0
libtpu: 0.0.40
codegen_flags: <defaults>
</compile_context>

<pallas_src>
import functools

import jax
import jax.numpy as jnp
from jax.experimental import pallas as pl
from jax.experimental.pallas import tpu as pltpu


_LOGITS_PAD = 128        # lane-dense router-logits slab; real logits = cols 0..2
_VMEM_HEADROOM = 12 << 20


# --------------------------------------------------------------------------- #
# hardware / budget helpers
# --------------------------------------------------------------------------- #
def _vmem_capacity_bytes():
    try:
        info = pltpu.get_tpu_info()
        cap = int(getattr(info, "vmem_capacity_bytes", 0))
        if cap > 0:
            return cap
    except Exception:
        pass
    return 64 << 20      # conservative fallback: v7x per-TensorCore VMEM


def _pipeline_stream_bytes(tt, H, out_bytes):
    # double-buffered token-tile streams: x (f32 in), combined out, padded logits
    return 2 * (tt * H * 4) + 2 * (tt * H * out_bytes) + 2 * (tt * _LOGITS_PAD * 4)


def _resident_need(tt, H, I, out_bytes):
    ncols = 6 * I + _LOGITS_PAD
    weights = H * ncols * 2 + 3 * I * H * 2 + _LOGITS_PAD * 4     # resident bf16
    temps = (tt * ncols * 4          # fused f32 matmul result
             + 5 * tt * I * 4        # live gate/up/silu slices (f32)
             + 3 * tt * I * 2        # bf16 down-proj operands
             + 8 * tt * H * 4)       # x f32/bf16, acc, o1/o2, direction, ...
    return weights + _pipeline_stream_bytes(tt, H, out_bytes) + temps


def _stream_need(tt, tk, H, out_bytes):
    weights = 2 * (6 * H * tk + 3 * tk * H) * 2                    # 2x buffered chunks
    weights += H * _LOGITS_PAD * 2 + _LOGITS_PAD * 4               # resident router
    scratch = 3 * tt * H * 4                                       # expert accumulators
    temps = (tt * 6 * tk * 4 + 5 * tt * tk * 4 + 3 * tt * tk * 2
             + 8 * tt * H * 4 + tt * _LOGITS_PAD * 4)
    return weights + _pipeline_stream_bytes(tt, H, out_bytes) + scratch + temps


def _select_tile_tokens(T, need_fn, budget):
    cands = [tt for tt in (1024, 512, 256, 128, 64, 32, 16, 8)
             if T % tt == 0 and int(need_fn(tt) * 1.15) <= budget]
    if not cands:
        for tt in (8, 16, 32, 64, 128):
            if T % tt == 0:
                cands = [tt]
                break
    if not cands:
        cands = [T]

    def score(tt):
        g = T // tt
        # prefer a pipelined grid (>=2 steps), an even step count (v7x: 2 TCs),
        # >=4 steps while the MXU M-dim stays full, then the biggest tile.
        return (g >= 2, g % 2 == 0, g >= 4 and tt >= 128, tt)

    return max(cands, key=score)


def _default_chunk_i(H, I, cap):
    budget = max(cap // 4, 8 << 20)
    for tk in (4096, 2048, 1024, 512, 256, 128):
        if I % tk == 0 and (36 * H * tk + 256 * 6 * tk * 4) <= budget:
            return tk
    for tk in (64, 32, 16, 8):
        if I % tk == 0:
            return tk
    return I


def _silu(v):
    # TODO(synk): on v6e/v7x, if the EUP ever binds at small H, compute the
    # sigmoid in bf16 (2x EUP rate) and multiply back in f32.
    return v * jax.nn.sigmoid(v)


# --------------------------------------------------------------------------- #
# kernels
# --------------------------------------------------------------------------- #
def _astro_resident_kernel(scalars_ref, x_ref, wgu_ref, br_ref,
                           wd0_ref, wd1_ref, wd2_ref, out_ref, logits_ref):
    f32 = jnp.float32
    inv_temp = 1.0 / scalars_ref[0]
    scale = scalars_ref[1]
    kappa = scalars_ref[2]

    x = x_ref[...].astype(f32)              # (tt, H) f32: exact norm / direction path
    x_bf = x.astype(jnp.bfloat16)           # MXU operand

    I = (wgu_ref.shape[1] - _LOGITS_PAD) // 6

    # one fat MXU pass: gate/up for all three experts + the padded router columns
    fused = jnp.dot(x_bf, wgu_ref[...], preferred_element_type=f32)   # (tt, 6I+128)

    # ---- router: lane-dense logits store + 3-column softmax (no XLU reduce) --
    logits = fused[:, 6 * I:] + br_ref[...]
    logits_ref[...] = logits
    l0, l1, l2 = logits[:, 0:1], logits[:, 1:2], logits[:, 2:3]
    lmax = jnp.maximum(jnp.maximum(l0, l1), l2)
    e0 = jnp.exp((l0 - lmax) * inv_temp)
    e1 = jnp.exp((l1 - lmax) * inv_temp)
    e2 = jnp.exp((l2 - lmax) * inv_temp)
    inv_den = 1.0 / (e0 + e1 + e2)          # exact reciprocal of a (tt,1) slab: free
    p0, p1, p2 = e0 * inv_den, e1 * inv_den, e2 * inv_den

    # ---- per-row geometry factors (f32, exact) -------------------------------
    norm_x = jnp.sqrt(jnp.sum(x * x, axis=-1, keepdims=True))         # (tt, 1)
    inv_norm_sph = 1.0 / jnp.maximum(norm_x, 1e-12)                   # F.normalize eps
    inv_norm_hyp = 1.0 / (norm_x + 1e-8)

    g0, u0 = fused[:, 0 * I:1 * I], fused[:, 1 * I:2 * I]
    g1, u1 = fused[:, 2 * I:3 * I], fused[:, 3 * I:4 * I]
    # spherical expert acts on x/||x||: the row scale commutes through the matmul
    g2 = fused[:, 4 * I:5 * I] * inv_norm_sph
    u2 = fused[:, 5 * I:6 * I] * inv_norm_sph

    # expert 0 (Euclidean): fold p0 into the down-proj operand
    inter0 = (p0 * (_silu(g0) * u0)).astype(jnp.bfloat16)
    acc = jnp.dot(inter0, wd0_ref[...], preferred_element_type=f32)

    # expert 1 (Hyperbolic): fold p1; direction*scale applied after the matmul
    inter1 = (p1 * (_silu(g1) * u1)).astype(jnp.bfloat16)
    o1 = jnp.dot(inter1, wd1_ref[...], preferred_element_type=f32)
    acc = acc + o1 * (x * (inv_norm_hyp * scale))

    # expert 2 (Spherical): normalize the down-proj output, then p2*kappa
    inter2 = (_silu(g2) * u2).astype(jnp.bfloat16)
    o2 = jnp.dot(inter2, wd2_ref[...], preferred_element_type=f32)
    inv_norm_o2 = 1.0 / jnp.maximum(
        jnp.sqrt(jnp.sum(o2 * o2, axis=-1, keepdims=True)), 1e-12)
    acc = acc + o2 * (p2 * kappa * inv_norm_o2)

    out_ref[...] = acc.astype(out_ref.dtype)


def _astro_stream_kernel(scalars_ref, x_ref, wr_ref, br_ref, gu_ref,
                         wd0_ref, wd1_ref, wd2_ref, out_ref, logits_ref,
                         acc0_ref, acc1_ref, acc2_ref):
    """I-streaming variant: grid = (token tiles, I-chunks); weights streamed."""
    f32 = jnp.float32
    k = pl.program_id(1)
    nk = pl.num_programs(1)
    inv_temp = 1.0 / scalars_ref[0]
    scale = scalars_ref[1]
    kappa = scalars_ref[2]

    x = x_ref[...].astype(f32)
    x_bf = x.astype(jnp.bfloat16)
    tk = wd0_ref.shape[1]

    # router recomputed per chunk (tiny vs. the main matmuls); stored once
    logits = jnp.dot(x_bf, wr_ref[...], preferred_element_type=f32) + br_ref[...]
    l0, l1, l2 = logits[:, 0:1], logits[:, 1:2], logits[:, 2:3]
    lmax = jnp.maximum(jnp.maximum(l0, l1), l2)
    e0 = jnp.exp((l0 - lmax) * inv_temp)
    e1 = jnp.exp((l1 - lmax) * inv_temp)
    e2 = jnp.exp((l2 - lmax) * inv_temp)
    inv_den = 1.0 / (e0 + e1 + e2)
    p0, p1, p2 = e0 * inv_den, e1 * inv_den, e2 * inv_den

    norm_x = jnp.sqrt(jnp.sum(x * x, axis=-1, keepdims=True))
    inv_norm_sph = 1.0 / jnp.maximum(norm_x, 1e-12)

    @pl.when(k == 0)
    def _():
        logits_ref[...] = logits
        acc0_ref[...] = jnp.zeros_like(acc0_ref)
        acc1_ref[...] = jnp.zeros_like(acc1_ref)
        acc2_ref[...] = jnp.zeros_like(acc2_ref)

    gu = jnp.dot(x_bf, gu_ref[0], preferred_element_type=f32)        # (tt, 6*tk)
    g0, u0 = gu[:, 0 * tk:1 * tk], gu[:, 1 * tk:2 * tk]
    g1, u1 = gu[:, 2 * tk:3 * tk], gu[:, 3 * tk:4 * tk]
    g2 = gu[:, 4 * tk:5 * tk] * inv_norm_sph
    u2 = gu[:, 5 * tk:6 * tk] * inv_norm_sph

    inter0 = (p0 * (_silu(g0) * u0)).astype(jnp.bfloat16)
    acc0_ref[...] += jnp.dot(inter0, wd0_ref[0], preferred_element_type=f32)
    inter1 = (p1 * (_silu(g1) * u1)).astype(jnp.bfloat16)
    acc1_ref[...] += jnp.dot(inter1, wd1_ref[0], preferred_element_type=f32)
    inter2 = (_silu(g2) * u2).astype(jnp.bfloat16)
    acc2_ref[...] += jnp.dot(inter2, wd2_ref[0], preferred_element_type=f32)

    @pl.when(k == nk - 1)
    def _():
        direction_s = x * ((1.0 / (norm_x + 1e-8)) * scale)
        o2 = acc2_ref[...]
        inv_norm_o2 = 1.0 / jnp.maximum(
            jnp.sqrt(jnp.sum(o2 * o2, axis=-1, keepdims=True)), 1e-12)
        out = (acc0_ref[...]
               + acc1_ref[...] * direction_s
               + o2 * (p2 * kappa * inv_norm_o2))
        out_ref[...] = out.astype(out_ref.dtype)


# --------------------------------------------------------------------------- #
# parameter preparation (one-time, hoisted out of the forward path)
# --------------------------------------------------------------------------- #
def prepare_astro_params(params, *, mode="auto", chunk_i=None):
    """Fuse / pad / bf16-cast the adapter weights once.

    Weight layout: (in_features, out_features), i.e. transposed vs. nn.Linear.
    """
    H, I = params["wg0"].shape
    bf16 = jnp.bfloat16
    f32 = jnp.float32
    cap = _vmem_capacity_bytes()

    scalars = jnp.stack([params["temperature"], params["scale"],
                         params["kappa"]]).astype(f32)
    br_pad = jnp.pad(params["br"].astype(f32), ((0, 0), (0, _LOGITS_PAD - 3)))
    wr_pad_f32 = jnp.pad(params["wr"].astype(f32), ((0, 0), (0, _LOGITS_PAD - 3)))

    resident_weight_bytes = H * (6 * I + _LOGITS_PAD) * 2 + 3 * I * H * 2
    if mode == "auto":
        # keep weights resident only if they leave room for streams / temps
        mode = "resident" if resident_weight_bytes <= 0.55 * cap else "stream"

    prep = {"mode": mode, "H": H, "I": I, "scalars": scalars, "br_pad": br_pad}

    if mode == "resident":
        # [g0 | u0 | g1 | u1 | g2 | u2 | router(128-pad)] -> one fat MXU pass
        prep["wgu"] = jnp.concatenate(
            [params["wg0"], params["wu0"], params["wg1"], params["wu1"],
             params["wg2"], params["wu2"], wr_pad_f32], axis=1).astype(bf16)
        prep["wd"] = tuple(params[f"wd{e}"].astype(bf16) for e in range(3))
    elif mode == "stream":
        tk = chunk_i if chunk_i is not None else _default_chunk_i(H, I, cap)
        assert I % tk == 0, f"intermediate_size {I} not divisible by chunk {tk}"
        nk = I // tk

        def chunk_cols(w):          # (H, I) -> (nk, H, tk)
            return w.reshape(H, nk, tk).transpose(1, 0, 2)

        prep["tk"] = tk
        prep["wr_pad"] = wr_pad_f32.astype(bf16)
        prep["wgu_s"] = jnp.concatenate(
            [chunk_cols(params["wg0"]), chunk_cols(params["wu0"]),
             chunk_cols(params["wg1"]), chunk_cols(params["wu1"]),
             chunk_cols(params["wg2"]), chunk_cols(params["wu2"])],
            axis=-1).astype(bf16)                                    # (nk, H, 6*tk)
        prep["wd_s"] = tuple(
            params[f"wd{e}"].reshape(nk, tk, H).astype(bf16) for e in range(3))
    else:
        raise ValueError(f"unknown mode {mode!r}")
    return prep


# --------------------------------------------------------------------------- #
# pallas_call wrappers
# --------------------------------------------------------------------------- #
def _run_resident(x_tok, prep, out_dtype, tile_tokens):
    T, H = x_tok.shape
    I = prep["I"]
    out_bytes = jnp.dtype(out_dtype).itemsize
    budget = max(_vmem_capacity_bytes() - _VMEM_HEADROOM, 24 << 20)
    need_fn = functools.partial(_resident_need, H=H, I=I, out_bytes=out_bytes)
    tt = tile_tokens if tile_tokens is not None else _select_tile_tokens(T, need_fn, budget)
    assert T % tt == 0, (T, tt)
    vmem_limit = int(min(budget, max(32 << 20, int(need_fn(tt) * 1.25))))

    w_vmem = pl.BlockSpec(memory_space=pltpu.MemorySpace.VMEM)
    return pl.pallas_call(
        _astro_resident_kernel,
        grid=(T // tt,),
        in_specs=[
            pl.BlockSpec(memory_space=pltpu.MemorySpace.SMEM),     # scalars
            pl.BlockSpec((tt, H), lambda i: (i, 0)),               # x tile (f32 stream)
            w_vmem,                                                # fused gate/up+router
            w_vmem,                                                # router bias (1,128)
            w_vmem, w_vmem, w_vmem,                                # down projections
        ],
        out_specs=(
            pl.BlockSpec((tt, H), lambda i: (i, 0)),
            pl.BlockSpec((tt, _LOGITS_PAD), lambda i: (i, 0)),
        ),
        out_shape=(
            jax.ShapeDtypeStruct((T, H), out_dtype),
            jax.ShapeDtypeStruct((T, _LOGITS_PAD), jnp.float32),
        ),
        compiler_params=pltpu.CompilerParams(
            dimension_semantics=("parallel",),
            vmem_limit_bytes=vmem_limit,
        ),
    )(prep["scalars"], x_tok, prep["wgu"], prep["br_pad"],
      prep["wd"][0], prep["wd"][1], prep["wd"][2])


def _run_stream(x_tok, prep, out_dtype, tile_tokens):
    T, H = x_tok.shape
    tk = prep["tk"]
    nk = prep["wgu_s"].shape[0]
    out_bytes = jnp.dtype(out_dtype).itemsize
    budget = max(_vmem_capacity_bytes() - _VMEM_HEADROOM, 24 << 20)
    need_fn = functools.partial(_stream_need, tk=tk, H=H, out_bytes=out_bytes)
    tt = tile_tokens if tile_tokens is not None else _select_tile_tokens(T, need_fn, budget)
    assert T % tt == 0, (T, tt)
    vmem_limit = int(min(budget, max(32 << 20, int(need_fn(tt) * 1.25))))

    w_vmem = pl.BlockSpec(memory_space=pltpu.MemorySpace.VMEM)
    wd_spec = pl.BlockSpec((1, tk, H), lambda i, k: (k, 0, 0))
    return pl.pallas_call(
        _astro_stream_kernel,
        grid=(T // tt, nk),
        in_specs=[
            pl.BlockSpec(memory_space=pltpu.MemorySpace.SMEM),         # scalars
            pl.BlockSpec((tt, H), lambda i, k: (i, 0)),                # x tile
            w_vmem, w_vmem,                                            # router w, b
            pl.BlockSpec((1, H, 6 * tk), lambda i, k: (k, 0, 0)),      # gate/up chunk
            wd_spec, wd_spec, wd_spec,                                 # down chunks
        ],
        out_specs=(
            pl.BlockSpec((tt, H), lambda i, k: (i, 0)),
            pl.BlockSpec((tt, _LOGITS_PAD), lambda i, k: (i, 0)),
        ),
        out_shape=(
            jax.ShapeDtypeStruct((T, H), out_dtype),
            jax.ShapeDtypeStruct((T, _LOGITS_PAD), jnp.float32),
        ),
        scratch_shapes=[pltpu.VMEM((tt, H), jnp.float32) for _ in range(3)],
        compiler_params=pltpu.CompilerParams(
            dimension_semantics=("parallel", "arbitrary"),
            vmem_limit_bytes=vmem_limit,
        ),
    )(prep["scalars"], x_tok, prep["wr_pad"], prep["br_pad"],
      prep["wgu_s"], prep["wd_s"][0], prep["wd_s"][1], prep["wd_s"][2])


def astro_adapter(x, prepared, *, tile_tokens=None, out_dtype=None):
    """x: (B, S, H). Returns (combined (B,S,H) in out_dtype (default x.dtype),
    router_logits (B,S,3) f32)."""
    B, S, H = x.shape
    assert H == prepared["H"], (H, prepared["H"])
    T = B * S
    out_dtype = x.dtype if out_dtype is None else out_dtype
    # f32 stream so in-kernel norms / directions see un-rounded inputs.
    x_tok = x.reshape(T, H).astype(jnp.float32)

    if prepared["mode"] == "resident":
        combined, logits_pad = _run_resident(x_tok, prepared, out_dtype, tile_tokens)
    else:
        combined, logits_pad = _run_stream(x_tok, prepared, out_dtype, tile_tokens)
    return combined.reshape(B, S, H), logits_pad[:, :3].reshape(B, S, 3)


# --------------------------------------------------------------------------- #
# reference + test
# --------------------------------------------------------------------------- #
def _reference(x, p):
    """Plain-JAX mirror of the PyTorch forward. MXU operands are rounded to
    bf16 (matching the kernel); everything else stays f32."""
    f32 = jnp.float32
    x = x.astype(f32)
    bf = lambda a: a.astype(jnp.bfloat16).astype(f32)
    mm = lambda a, w: bf(a) @ bf(w)

    logits = mm(x, p["wr"]) + p["br"][0]
    probs = jax.nn.softmax(logits / p["temperature"], axis=-1)

    def ffn(h, wg, wu, wd):
        g = mm(h, wg)
        return mm(jax.nn.silu(g) * mm(h, wu), wd)

    e0 = ffn(x, p["wg0"], p["wu0"], p["wd0"])
    nrm = jnp.linalg.norm(x, axis=-1, keepdims=True)
    e1 = ffn(x, p["wg1"], p["wu1"], p["wd1"]) * (x / (nrm + 1e-8)) * p["scale"]
    hn = x / jnp.maximum(nrm, 1e-12)
    o2 = ffn(hn, p["wg2"], p["wu2"], p["wd2"])
    e2 = (o2 / jnp.maximum(jnp.linalg.norm(o2, axis=-1, keepdims=True), 1e-12)
          * p["kappa"])
    out = probs[..., 0:1] * e0 + probs[..., 1:2] * e1 + probs[..., 2:3] * e2
    return out, logits


def make_params(key, hidden_size, intermediate_size):
    ks = jax.random.split(key, 10)
    std = 0.02
    p = {
        "wr": jax.random.normal(ks[0], (hidden_size, 3), jnp.float32) * std,
        "br": jnp.zeros((1, 3), jnp.float32),
        "temperature": jnp.float32(0.1),
        "scale": jnp.float32(1.0),
        "kappa": jnp.float32(1.0),
    }
    names = ["wg0", "wu0", "wd0", "wg1", "wu1", "wd1", "wg2", "wu2", "wd2"]
    for i, name in enumerate(names):
        if name.startswith("wd"):
            shape = (intermediate_size, hidden_size)
        else:
            shape = (hidden_size, intermediate_size)
        p[name] = jax.random.normal(ks[1 + i], shape, jnp.float32) * std
    return p


if __name__ == "__main__":
    B, S, H, I = 2, 128, 128, 256
    key = jax.random.PRNGKey(0)
    k_x, k_p = jax.random.split(key)
    x = jax.random.normal(k_x, (B, S, H), jnp.float32)
    params = make_params(k_p, H, I)

    ref_out, ref_logits = _reference(x, params)

    # Validate both the resident-weight path and the I-streaming fallback
    # (the latter is what big-I configs on v7x would use; forced here via
    # chunk_i so both code paths are exercised at small shapes).
    for mode, kw in (("resident", {}), ("stream", {"chunk_i": 128})):
        prep = prepare_astro_params(params, mode=mode, **kw)
        combined, router_logits = jax.block_until_ready(astro_adapter(x, prep))
        assert combined.shape == (B, S, H) and router_logits.shape == (B, S, 3)
        assert jnp.allclose(router_logits, ref_logits, atol=1e-2, rtol=5e-2), (
            mode, float(jnp.max(jnp.abs(router_logits - ref_logits))))
        assert jnp.allclose(combined, ref_out, atol=1e-2, rtol=5e-2), (
            mode, float(jnp.max(jnp.abs(combined - ref_out))))

    print("KERNEL_OK")
</pallas_src>

<mosaic_0001>
module attributes {stable_mosaic.version = 11 : i64} {
  func.func @_astro_resident_kernel(%arg0: i32, %arg1: memref<3xf32, #tpu.memory_space<smem>>, %arg2: memref<128x128xf32, #tpu.memory_space<vmem>>, %arg3: memref<128x1664xbf16, #tpu.memory_space<vmem>>, %arg4: memref<1x128xf32, #tpu.memory_space<vmem>>, %arg5: memref<256x128xbf16, #tpu.memory_space<vmem>>, %arg6: memref<256x128xbf16, #tpu.memory_space<vmem>>, %arg7: memref<256x128xbf16, #tpu.memory_space<vmem>>, %arg8: memref<128x128xf32, #tpu.memory_space<vmem>>, %arg9: memref<128x128xf32, #tpu.memory_space<vmem>>) attributes {dimension_semantics = [#tpu.dimension_semantics<parallel>], iteration_bounds = array<i64: 2>, scalar_prefetch = 0 : i64, scratch_operands = 0 : i64, tpu.core_type = #tpu.core_type<tc>, window_params = [{transform_indices = @transform_0, window_bounds = array<i64: 3>}, {transform_indices = @transform_1, window_bounds = array<i64: 128, 128>}, {pipeline_mode = #tpu.pipeline_mode<synchronous>, transform_indices = @transform_2, window_bounds = array<i64: 128, 1664>}, {pipeline_mode = #tpu.pipeline_mode<synchronous>, transform_indices = @transform_3, window_bounds = array<i64: 1, 128>}, {pipeline_mode = #tpu.pipeline_mode<synchronous>, transform_indices = @transform_4, window_bounds = array<i64: 256, 128>}, {pipeline_mode = #tpu.pipeline_mode<synchronous>, transform_indices = @transform_5, window_bounds = array<i64: 256, 128>}, {pipeline_mode = #tpu.pipeline_mode<synchronous>, transform_indices = @transform_6, window_bounds = array<i64: 256, 128>}, {transform_indices = @transform_7, window_bounds = array<i64: 128, 128>}, {transform_indices = @transform_8, window_bounds = array<i64: 128, 128>}]} {
    %c0 = arith.constant 0 : index
    %0 = memref.load %arg1[%c0] : memref<3xf32, #tpu.memory_space<smem>>
    %cst = arith.constant 1.000000e+00 : f32
    %1 = arith.divf %cst, %0 : f32
    %c1 = arith.constant 1 : index
    %2 = memref.load %arg1[%c1] : memref<3xf32, #tpu.memory_space<smem>>
    %c2 = arith.constant 2 : index
    %3 = memref.load %arg1[%c2] : memref<3xf32, #tpu.memory_space<smem>>
    %c0_0 = arith.constant 0 : index
    %c0_1 = arith.constant 0 : index
    %4 = vector.load %arg2[%c0_0, %c0_1] : memref<128x128xf32, #tpu.memory_space<vmem>>, vector<128x128xf32>
    %5 = arith.truncf %4 : vector<128x128xf32> to vector<128x128xbf16>
    %c0_2 = arith.constant 0 : index
    %c0_3 = arith.constant 0 : index
    %6 = vector.load %arg3[%c0_2, %c0_3] : memref<128x1664xbf16, #tpu.memory_space<vmem>>, vector<128x1664xbf16>
    %cst_4 = arith.constant dense<0.000000e+00> : vector<128x1664xf32>
    %7 = tpu.matmul %5, %6, %cst_4 {dimension_numbers = #tpu.dot_dimension_numbers<[1], [0], [0], [1], [0, 0, 1, 1], [], []>} : vector<128x128xbf16>, vector<128x1664xbf16>, vector<128x1664xf32> -> vector<128x1664xf32>
    %8 = vector.extract_strided_slice %7 {offsets = [0, 1536], sizes = [128, 128], strides = [1, 1]} : vector<128x1664xf32> to vector<128x128xf32>
    %c0_5 = arith.constant 0 : index
    %c0_6 = arith.constant 0 : index
    %9 = vector.load %arg4[%c0_5, %c0_6] : memref<1x128xf32, #tpu.memory_space<vmem>>, vector<1x128xf32>
    %10 = vector.broadcast %9 : vector<1x128xf32> to vector<128x128xf32>
    %11 = arith.addf %8, %10 : vector<128x128xf32>
    %c0_7 = arith.constant 0 : index
    %c0_8 = arith.constant 0 : index
    %12 = vector.load %arg9[%c0_7, %c0_8] : memref<128x128xf32, #tpu.memory_space<vmem>>, vector<128x128xf32>
    tpu.vector_store %arg9[%c0_7, %c0_8], %11 {strides = array<i32>} : memref<128x128xf32, #tpu.memory_space<vmem>>, vector<128x128xf32>,
    %13 = vector.extract_strided_slice %11 {offsets = [0, 0], sizes = [128, 1], strides = [1, 1]} : vector<128x128xf32> to vector<128x1xf32>
    %14 = vector.extract_strided_slice %11 {offsets = [0, 1], sizes = [128, 1], strides = [1, 1]} : vector<128x128xf32> to vector<128x1xf32>
    %15 = vector.extract_strided_slice %11 {offsets = [0, 2], sizes = [128, 1], strides = [1, 1]} : vector<128x128xf32> to vector<128x1xf32>
    %16 = arith.maximumf %13, %14 : vector<128x1xf32>
    %17 = arith.maximumf %16, %15 : vector<128x1xf32>
    %18 = arith.subf %13, %17 : vector<128x1xf32>
    %19 = vector.broadcast %1 : f32 to vector<128x1xf32>
    %20 = arith.mulf %18, %19 : vector<128x1xf32>
    %21 = math.exp %20 : vector<128x1xf32>
    %22 = arith.subf %14, %17 : vector<128x1xf32>
    %23 = vector.broadcast %1 : f32 to vector<128x1xf32>
    %24 = arith.mulf %22, %23 : vector<128x1xf32>
    %25 = math.exp %24 : vector<128x1xf32>
    %26 = arith.subf %15, %17 : vector<128x1xf32>
    %27 = vector.broadcast %1 : f32 to vector<128x1xf32>
    %28 = arith.mulf %26, %27 : vector<128x1xf32>
    %29 = math.exp %28 : vector<128x1xf32>
    %30 = arith.addf %21, %25 : vector<128x1xf32>
    %31 = arith.addf %30, %29 : vector<128x1xf32>
    %cst_9 = arith.constant 1.000000e+00 : f32
    %32 = vector.broadcast %cst_9 : f32 to vector<128x1xf32>
    %33 = arith.divf %32, %31 : vector<128x1xf32>
    %34 = arith.mulf %21, %33 : vector<128x1xf32>
    %35 = arith.mulf %25, %33 : vector<128x1xf32>
    %36 = arith.mulf %29, %33 : vector<128x1xf32>
    %37 = arith.mulf %4, %4 : vector<128x128xf32>
    %cst_10 = arith.constant dense<0.000000e+00> : vector<128xf32>
    %38 = vector.multi_reduction <add>, %37, %cst_10 [1] : vector<128x128xf32> to vector<128xf32>
    %39 = vector.shape_cast %38 : vector<128xf32> to vector<128x1xf32>
    %40 = math.sqrt %39 : vector<128x1xf32>
    %cst_11 = arith.constant 9.99999996E-13 : f32
    %41 = vector.broadcast %cst_11 : f32 to vector<128x1xf32>
    %42 = arith.maximumf %40, %41 : vector<128x1xf32>
    %cst_12 = arith.constant 1.000000e+00 : f32
    %43 = vector.broadcast %cst_12 : f32 to vector<128x1xf32>
    %44 = arith.divf %43, %42 : vector<128x1xf32>
    %cst_13 = arith.constant 9.99999993E-9 : f32
    %45 = vector.broadcast %cst_13 : f32 to vector<128x1xf32>
    %46 = arith.addf %40, %45 : vector<128x1xf32>
    %cst_14 = arith.constant 1.000000e+00 : f32
    %47 = vector.broadcast %cst_14 : f32 to vector<128x1xf32>
    %48 = arith.divf %47, %46 : vector<128x1xf32>
    %49 = vector.extract_strided_slice %7 {offsets = [0, 0], sizes = [128, 256], strides = [1, 1]} : vector<128x1664xf32> to vector<128x256xf32>
    %50 = vector.extract_strided_slice %7 {offsets = [0, 256], sizes = [128, 256], strides = [1, 1]} : vector<128x1664xf32> to vector<128x256xf32>
    %51 = vector.extract_strided_slice %7 {offsets = [0, 512], sizes = [128, 256], strides = [1, 1]} : vector<128x1664xf32> to vector<128x256xf32>
    %52 = vector.extract_strided_slice %7 {offsets = [0, 768], sizes = [128, 256], strides = [1, 1]} : vector<128x1664xf32> to vector<128x256xf32>
    %53 = vector.extract_strided_slice %7 {offsets = [0, 1024], sizes = [128, 256], strides = [1, 1]} : vector<128x1664xf32> to vector<128x256xf32>
    %54 = vector.broadcast %44 : vector<128x1xf32> to vector<128x256xf32>
    %55 = arith.mulf %53, %54 : vector<128x256xf32>
    %56 = vector.extract_strided_slice %7 {offsets = [0, 1280], sizes = [128, 256], strides = [1, 1]} : vector<128x1664xf32> to vector<128x256xf32>
    %57 = vector.broadcast %44 : vector<128x1xf32> to vector<128x256xf32>
    %58 = arith.mulf %56, %57 : vector<128x256xf32>
    %59 = arith.negf %49 : vector<128x256xf32>
    %60 = math.exp %59 : vector<128x256xf32>
    %cst_15 = arith.constant 1.000000e+00 : f32
    %61 = vector.broadcast %cst_15 : f32 to vector<128x256xf32>
    %62 = arith.addf %61, %60 : vector<128x256xf32>
    %63 = arith.divf %61, %62 : vector<128x256xf32>
    %64 = arith.mulf %49, %63 : vector<128x256xf32>
    %65 = arith.mulf %64, %50 : vector<128x256xf32>
    %66 = vector.broadcast %34 : vector<128x1xf32> to vector<128x256xf32>
    %67 = arith.mulf %66, %65 : vector<128x256xf32>
    %68 = arith.truncf %67 : vector<128x256xf32> to vector<128x256xbf16>
    %c0_16 = arith.constant 0 : index
    %c0_17 = arith.constant 0 : index
    %69 = vector.load %arg5[%c0_16, %c0_17] : memref<256x128xbf16, #tpu.memory_space<vmem>>, vector<256x128xbf16>
    %cst_18 = arith.constant dense<0.000000e+00> : vector<128x128xf32>
    %70 = tpu.matmul %68, %69, %cst_18 {dimension_numbers = #tpu.dot_dimension_numbers<[1], [0], [0], [1], [0, 0, 1, 1], [], []>} : vector<128x256xbf16>, vector<256x128xbf16>, vector<128x128xf32> -> vector<128x128xf32>
    %71 = arith.negf %51 : vector<128x256xf32>
    %72 = math.exp %71 : vector<128x256xf32>
    %cst_19 = arith.constant 1.000000e+00 : f32
    %73 = vector.broadcast %cst_19 : f32 to vector<128x256xf32>
    %74 = arith.addf %73, %72 : vector<128x256xf32>
    %75 = arith.divf %73, %74 : vector<128x256xf32>
    %76 = arith.mulf %51, %75 : vector<128x256xf32>
    %77 = arith.mulf %76, %52 : vector<128x256xf32>
    %78 = vector.broadcast %35 : vector<128x1xf32> to vector<128x256xf32>
    %79 = arith.mulf %78, %77 : vector<128x256xf32>
    %80 = arith.truncf %79 : vector<128x256xf32> to vector<128x256xbf16>
    %c0_20 = arith.constant 0 : index
    %c0_21 = arith.constant 0 : index
    %81 = vector.load %arg6[%c0_20, %c0_21] : memref<256x128xbf16, #tpu.memory_space<vmem>>, vector<256x128xbf16>
    %cst_22 = arith.constant dense<0.000000e+00> : vector<128x128xf32>
    %82 = tpu.matmul %80, %81, %cst_22 {dimension_numbers = #tpu.dot_dimension_numbers<[1], [0], [0], [1], [0, 0, 1, 1], [], []>} : vector<128x256xbf16>, vector<256x128xbf16>, vector<128x128xf32> -> vector<128x128xf32>
    %83 = vector.broadcast %2 : f32 to vector<128x1xf32>
    %84 = arith.mulf %48, %83 : vector<128x1xf32>
    %85 = vector.broadcast %84 : vector<128x1xf32> to vector<128x128xf32>
    %86 = arith.mulf %4, %85 : vector<128x128xf32>
    %87 = arith.mulf %82, %86 : vector<128x128xf32>
    %88 = arith.addf %70, %87 : vector<128x128xf32>
    %89 = arith.negf %55 : vector<128x256xf32>
    %90 = math.exp %89 : vector<128x256xf32>
    %cst_23 = arith.constant 1.000000e+00 : f32
    %91 = vector.broadcast %cst_23 : f32 to vector<128x256xf32>
    %92 = arith.addf %91, %90 : vector<128x256xf32>
    %93 = arith.divf %91, %92 : vector<128x256xf32>
    %94 = arith.mulf %55, %93 : vector<128x256xf32>
    %95 = arith.mulf %94, %58 : vector<128x256xf32>
    %96 = arith.truncf %95 : vector<128x256xf32> to vector<128x256xbf16>
    %c0_24 = arith.constant 0 : index
    %c0_25 = arith.constant 0 : index
    %97 = vector.load %arg7[%c0_24, %c0_25] : memref<256x128xbf16, #tpu.memory_space<vmem>>, vector<256x128xbf16>
    %cst_26 = arith.constant dense<0.000000e+00> : vector<128x128xf32>
    %98 = tpu.matmul %96, %97, %cst_26 {dimension_numbers = #tpu.dot_dimension_numbers<[1], [0], [0], [1], [0, 0, 1, 1], [], []>} : vector<128x256xbf16>, vector<256x128xbf16>, vector<128x128xf32> -> vector<128x128xf32>
    %99 = arith.mulf %98, %98 : vector<128x128xf32>
    %cst_27 = arith.constant dense<0.000000e+00> : vector<128xf32>
    %100 = vector.multi_reduction <add>, %99, %cst_27 [1] : vector<128x128xf32> to vector<128xf32>
    %101 = vector.shape_cast %100 : vector<128xf32> to vector<128x1xf32>
    %102 = math.sqrt %101 : vector<128x1xf32>
    %cst_28 = arith.constant 9.99999996E-13 : f32
    %103 = vector.broadcast %cst_28 : f32 to vector<128x1xf32>
    %104 = arith.maximumf %102, %103 : vector<128x1xf32>
    %cst_29 = arith.constant 1.000000e+00 : f32
    %105 = vector.broadcast %cst_29 : f32 to vector<128x1xf32>
    %106 = arith.divf %105, %104 : vector<128x1xf32>
    %107 = vector.broadcast %3 : f32 to vector<128x1xf32>
    %108 = arith.mulf %36, %107 : vector<128x1xf32>
    %109 = arith.mulf %108, %106 : vector<128x1xf32>
    %110 = vector.broadcast %109 : vector<128x1xf32> to vector<128x128xf32>
    %111 = arith.mulf %98, %110 : vector<128x128xf32>
    %112 = arith.addf %88, %111 : vector<128x128xf32>
    %c0_30 = arith.constant 0 : index
    %c0_31 = arith.constant 0 : index
    %113 = vector.load %arg8[%c0_30, %c0_31] : memref<128x128xf32, #tpu.memory_space<vmem>>, vector<128x128xf32>
    tpu.vector_store %arg8[%c0_30, %c0_31], %112 {strides = array<i32>} : memref<128x128xf32, #tpu.memory_space<vmem>>, vector<128x128xf32>,
    return
  }
  func.func @transform_0(%arg0: i32) -> i32 {
    %c0_i32 = arith.constant 0 : i32
    %c0_i32_0 = arith.constant 0 : i32
    return %c0_i32 : i32
  }
  func.func @transform_1(%arg0: i32) -> (i32, i32) {
    %c0_i32 = arith.constant 0 : i32
    %c0_i32_0 = arith.constant 0 : i32
    return %arg0, %c0_i32 : i32, i32
  }
  func.func @transform_2(%arg0: i32) -> (i32, i32) {
    %c0_i32 = arith.constant 0 : i32
    %c0_i32_0 = arith.constant 0 : i32
    %c0_i32_1 = arith.constant 0 : i32
    return %c0_i32, %c0_i32_0 : i32, i32
  }
  func.func @transform_3(%arg0: i32) -> (i32, i32) {
    %c0_i32 = arith.constant 0 : i32
    %c0_i32_0 = arith.constant 0 : i32
    %c0_i32_1 = arith.constant 0 : i32
    return %c0_i32, %c0_i32_0 : i32, i32
  }
  func.func @transform_4(%arg0: i32) -> (i32, i32) {
    %c0_i32 = arith.constant 0 : i32
    %c0_i32_0 = arith.constant 0 : i32
    %c0_i32_1 = arith.constant 0 : i32
    return %c0_i32, %c0_i32_0 : i32, i32
  }
  func.func @transform_5(%arg0: i32) -> (i32, i32) {
    %c0_i32 = arith.constant 0 : i32
    %c0_i32_0 = arith.constant 0 : i32
    %c0_i32_1 = arith.constant 0 : i32
    return %c0_i32, %c0_i32_0 : i32, i32
  }
  func.func @transform_6(%arg0: i32) -> (i32, i32) {
    %c0_i32 = arith.constant 0 : i32
    %c0_i32_0 = arith.constant 0 : i32
    %c0_i32_1 = arith.constant 0 : i32
    return %c0_i32, %c0_i32_0 : i32, i32
  }
  func.func @transform_7(%arg0: i32) -> (i32, i32) {
    %c0_i32 = arith.constant 0 : i32
    %c0_i32_0 = arith.constant 0 : i32
    return %arg0, %c0_i32 : i32, i32
  }
  func.func @transform_8(%arg0: i32) -> (i32, i32) {
    %c0_i32 = arith.constant 0 : i32
    %c0_i32_0 = arith.constant 0 : i32
    return %arg0, %c0_i32 : i32, i32
  }
}

</mosaic_0001>

<bundles_post_ra>
// kernel: tpu_custom_call.1
= control target key start
LH: loop header
LB: loop body
LE: loop exit
PB: predicated region body
PF: predicated region fallthrough
CT: control target
= control target key end

     0   :  { %s10021_s0 = inlined_call_operand.hbm [shape: f32[3], index: 0, kind: input, shape index: {}]   ;;  %s10022_s1 = inlined_call_operand.hbm [shape: f32[256,128], index: 1, kind: input, shape index: {}]   ;;  %s10023_s2 = inlined_call_operand.hbm [shape: bf16[128,1664], index: 2, kind: input, shape index: {}]   ;;  %s10024_s3 = inlined_call_operand.vmem [shape: f32[1,128], index: 3, kind: input, shape index: {}]   ;;  %s10025_s4 = inlined_call_operand.hbm [shape: bf16[256,128], index: 4, kind: input, shape index: {}]   ;;  %s10026_s5 = inlined_call_operand.hbm [shape: bf16[256,128], index: 5, kind: input, shape index: {}]   ;;  %s10027_s6 = inlined_call_operand.hbm [shape: bf16[256,128], index: 6, kind: input, shape index: {}]   ;;  %s10028_s7 = inlined_call_operand.hbm [shape: f32[256,128], index: 7, kind: output, shape index: {0}]   ;;  %s10029_s8 = inlined_call_operand.hbm [shape: f32[256,128], index: 8, kind: output, shape index: {1}]  }
   0x1   :  { %10142 = sst [smem:[#allocation195_spill]] %s10021_s0 }
   0x2   :  { %10143 = sst [smem:[#allocation196_spill]] %s10023_s2 }
   0x3   :  { %14 = vsyncpa [#allocation5], 0 }
   0x4   :  { %15 = vsyncpa [#allocation3], 0 }
   0x5   :  { %17 = vsyncpa [#allocation3 + $0x1], 0 }
   0x6   :  { %18 = vsyncpa [#allocation8], 0 }
   0x7   :  { %19 = vsyncpa [#allocation11], 0 }
   0x8   :  { %20 = vsyncpa [#allocation4], 0 }
   0x9   :  { %22 = vsyncpa [#allocation4 + $0x1], 0 }
   0xa   :  { %23 = vsyncpa [#allocation15], 0 }
   0xb   :  { %25 = vsyncpa [#allocation15 + $0x1], 0  ;;  %s7223_s27 = smov 0   ;;  %s7225_s28 = smov 0  }
   0xc   :  { %s7227_s29 = smov 0   ;;  %s7229_s30 = smov 0  }
   0xd LB: > { %s7155_s9 = smov [#allocation7]   ;;  %s7244_s11 = sadd.s32 4294967295, %s7153_s30   ;;  %s7153_s30 = sphi %s7229_s30, %s10562_s30   ;;  %s7149_s29 = sphi %s7227_s29, %s10561_s29   ;;  %s7145_s28 = sphi %s7225_s28, %s10560_s28   ;;  %s7141_s27 = sphi %s7223_s27, %s10559_s27  }
   0xe   : > { %s261_s10 = sshll.u32 %s7155_s9, 4  ;;  %p5338_p0 = scmp.ge.s32.totalorder %s7153_s30, 1  ;;  %s262_s10 = int_to_ptr.vmem [resolvable:$true] %s261_s10 }
   0xf   : > { %p10030_p1 = scmp.eq.s32.totalorder %s7244_s11, 0  ;;  %p240_p2 = scmp.lt.s32.totalorder %s7153_s30, 3 }
  0x10   : > { %s7156_s14 = smov [#allocation10]   ;;  %s6915_s16 = scalar_lea.vmem %s262_s10, 13312 }
  0x11   : > { %p7249_p3 = pnand %p5338_p0, %p240_p2  ;;  %s290_s15 = sshll.u32 %s7156_s14, 4  ;;  %s291_s15 = int_to_ptr.vmem [resolvable:$true] %s290_s15 }
  0x12   : > { %p6916_p8 = scmp.ne.s32.totalorder %s262_s10, %s6915_s16  ;;  %p6923_p11 = scmp.lt.s32.totalorder %s262_s10, %s262_s10 }
  0x13   : > { %s10144_s12 = scalar_select %p7249_p3, 1, 0 }
  0x14   : > { %p5903_p5 = pneg %p7249_p3  ;;  %p6924_p12 = scmp.lt.s32.totalorder %s6915_s16, %s6915_s16 }
  0x16   : > { %p7258_p6 = pnand %p5903_p5, %p10030_p1  ;;  %p6925_p13 = por %p6924_p12, %p6923_p11 }
  0x18   : > { %p6906_p7 = pneg %p7258_p6 }
  0x1a   : > { %p6918_p9 = pnand %p6916_p8, %p6906_p7 }
  0x1c   : > { %p6919_p10 = pneg %p6918_p9 }
  0x1e   : > { %p6926_p0 = pnand %p6925_p13, %p6919_p10 }
  0x20   : > { %6929 = shalt.err (!%p6926_p0)
}
  0x21   : > { %s7157_s17 = smov 832   ;;  %s7158_s18 = smov 52  }
  0x22   : > { %s10146_s2 = sld [smem:[#allocation196_spill]]  ;;  %s6941_s21 = scalar_lea.vmem %s291_s15, 2048 }
  0x23   : > { %p6942_p2 = scmp.ne.s32.totalorder %s291_s15, %s6941_s21  ;;  %p6949_p9 = scmp.lt.s32.totalorder %s291_s15, %s291_s15 }
  0x24   : > { %p6950_p4 = scmp.lt.s32.totalorder %s6941_s21, %s6941_s21 }
  0x25   : > { %p6944_p5 = pnand %p6942_p2, %p6906_p7 }
  0x26   : > { %p6951_p11 = por %p6950_p4, %p6949_p9 }
  0x27   : > { %p6945_p8 = pneg %p6944_p5 }
  0x28   : > { %5909 = dma.hbm_to_vmem [thread:$0]  (!%p7258_p6), %s10146_s2, 13312, %s262_s10, [#allocation8], %s7157_s17, %s7157_s17, %s7158_s18  }
  0x29   : > { %p6952_p10 = pnand %p6951_p11, %p6945_p8 }
  0x2b   : > { %6955 = shalt.err (!%p6952_p10)
}
  0x2c   : > { %s7159_s22 = smov 64   ;;  %s7160_s23 = smov 4  }
  0x2d   : > { %5915 = dma.hbm_to_vmem [thread:$0]  (!%p7258_p6), %s10026_s5, 2048, %s291_s15, [#allocation11], %s7159_s22, %s7159_s22, %s7160_s23  }
  0x2e   : > { %s7161_s26 = smov [#allocation2]   ;;  %s10147_s0 = sld [smem:[#allocation195_spill]] }
  0x2f   : > { %s7162_s14 = smov [#allocation9]   ;;  %s7163_s17 = smov [#allocation12]  }
  0x30   : > { %s277_s16 = sshll.u32 %s7162_s14, 4  ;;  %s303_s18 = sshll.u32 %s7163_s17, 4  ;;  %s278_s16 = int_to_ptr.vmem [resolvable:$true] %s277_s16  ;;  %s304_s18 = int_to_ptr.vmem [resolvable:$true] %s303_s18 }
  0x31   : > { %s6978_s19 = scalar_lea.vmem %s278_s16, 2048  ;;  %p6986_p0 = scmp.lt.s32.totalorder %s278_s16, %s278_s16 }
  0x32   : > { %p6979_p4 = scmp.ne.s32.totalorder %s278_s16, %s6978_s19  ;;  %p6987_p2 = scmp.lt.s32.totalorder %s6978_s19, %s6978_s19 }
  0x34   : > { %5906 = dma.hbm_to_smem (!%p7258_p6), %s10147_s0, 16, %s7161_s26, [#allocation5]  }
  0x35   : > { %p6981_p12 = pnand %p6979_p4, %p6906_p7  ;;  %p6988_p5 = por %p6987_p2, %p6986_p0 }
  0x37   : > { %p6982_p13 = pneg %p6981_p12 }
  0x39   : > { %p6989_p8 = pnand %p6988_p5, %p6982_p13 }
  0x3b   : > { %6992 = shalt.err (!%p6989_p8)
}
  0x3c   : > { %5912 = dma.hbm_to_vmem [thread:$0]  (!%p7258_p6), %s10025_s4, 2048, %s278_s16, [#allocation8], %s7159_s22, %s7159_s22, %s7160_s23  }
  0x3d   : > { %s7004_s21 = scalar_lea.vmem %s304_s18, 2048  ;;  %p7012_p4 = scmp.lt.s32.totalorder %s304_s18, %s304_s18 }
  0x3e   : > { %p7005_p9 = scmp.ne.s32.totalorder %s304_s18, %s7004_s21  ;;  %p7013_p12 = scmp.lt.s32.totalorder %s7004_s21, %s7004_s21 }
  0x40   : > { %p7007_p11 = pnand %p7005_p9, %p6906_p7  ;;  %p7014_p13 = por %p7013_p12, %p7012_p4 }
  0x42   : > { %p7008_p10 = pneg %p7007_p11 }
  0x44   : > { %p7015_p0 = pnand %p7014_p13, %p7008_p10 }
  0x46   : > { %7018 = shalt.err (!%p7015_p0)
}
  0x47   : > { %5918 = dma.hbm_to_vmem [thread:$0]  (!%p7258_p6), %s10027_s6, 2048, %s304_s18, [#allocation11], %s7159_s22, %s7159_s22, %s7160_s23  }
  0x48   : > { %s5337_s13 = sadd.s32 4294967294, %s7153_s30   ;;  %s7312_s26 = sadd.s32 1, %s7153_s30  }
  0x49   : > { %s59_s9 = sadd.s32 1, %s7149_s29  ;;  %s56_s10 = ssub.s32 %s7153_s30, %s7312_s26 }
  0x4a   : > { %p66_p7 = scmp.ne.s32.totalorder %s7149_s29, %s7145_s28  ;;  %p57_p2 = scmp.eq.s32.totalorder %s56_s10, 0 }
  0x4b   : > { %p67_p5 = scmp.eq.s32.totalorder %s7153_s30, 0  ;;  %p72_p8 = scmp.ne.s32.totalorder %s7145_s28, %s7141_s27 }
  0x4c   : > { %p201_p9 = scmp.eq.s32.totalorder %s7244_s11, 1  ;;  %p207_p4 = scmp.eq.s32.totalorder %s5337_s13, 1 }
  0x4d   : > { %s7324_s14 = scalar_select %p57_p2, %s7149_s29, %s59_s9  }
  0x4e   : > { %p68_p11 = por %p67_p5, %p66_p7  ;;  %p7328_p10 = por %p10030_p1, %p72_p8 }
  0x4f   : > { %p7332_p6 = por %p201_p9, %p66_p7  ;;  %p5935_p12 = scmp.lt.s32.totalorder %s7153_s30, 2 }
  0x50   : > { %s10148_s16 = scalar_select %p7328_p10, 1, 0 }
  0x51   : > { %s10149_s22 = scalar_select %p7332_p6, 1, 0 }
  0x52   : > { %s317_s23 = sand.u32 1, %s7149_s29   ;;  %p7338_p13 = por %p207_p4, %p72_p8 }
  0x53   : > { %s5345_s18 = sshll.u32 %s317_s23, 7  ;;  %s5616_s19 = sshll.u32 %s7153_s30, 11 }
  0x54   : > { %s10150_s17 = scalar_select %p7338_p13, 1, 0 }
  0x55   : > { %s7346_s21 = scalar_lea.hbm %s10022_s1, %s5616_s19  ;;  %s321_s24 = scalar_lea.vmem [#allocation6], %s5345_s18 }
  0x56   : > { %s328_s25 = sshll.u32 %s321_s24, 4  ;;  %p7348_p0 = pnand %p5935_p12, %p68_p11  ;;  %s7352_s25 = int_to_ptr.vmem [resolvable:$true] %s328_s25 }
  0x57   : > { %s7354_s9 = scalar_lea.sflag [#allocation3], %s317_s23  ;;  %s7019_s10 = scalar_lea.hbm %s7346_s21, 2048 }
  0x58   : > { %p7020_p7 = scmp.ne.s32.totalorder %s7346_s21, %s7019_s10  ;;  %p7021_p2 = pneg %p7348_p0 }
  0x59   : > { %s7024_s18 = scalar_lea.hbm %s10022_s1, 4096  ;;  %p7025_p9 = scmp.lt.s32.totalorder %s7346_s21, %s10022_s1 }
  0x5a   : > { %p7022_p5 = pnand %p7021_p2, %p7020_p7  ;;  %p7026_p11 = scmp.lt.s32.totalorder %s7024_s18, %s7019_s10 }
  0x5c   : > { %p7023_p8 = pneg %p7022_p5  ;;  %p7027_p4 = por %p7026_p11, %p7025_p9 }
  0x5e   : > { %p7028_p12 = pnand %p7027_p4, %p7023_p8 }
  0x60   : > { %7031 = shalt.err (!%p7028_p12)
}
  0x61   : > { %s7032_s23 = scalar_lea.vmem %s7352_s25, 2048  ;;  %s7164_s0 = smov [#allocation6]  }
  0x62   : > { %p7033_p1 = scmp.ne.s32.totalorder %s7352_s25, %s7032_s23  ;;  %s7037_s2 = sshll.u32 %s7164_s0, 4  ;;  %s7038_s2 = int_to_ptr.vmem [resolvable:$false] %s7037_s2 }
  0x63   : > { %s7039_s19 = scalar_lea.vmem %s7038_s2, 4096  ;;  %p7040_p5 = scmp.lt.s32.totalorder %s7352_s25, %s7038_s2 }
  0x64   : > { %p7035_p13 = pnand %p7033_p1, %p7021_p2  ;;  %p7041_p6 = scmp.lt.s32.totalorder %s7039_s19, %s7032_s23 }
  0x66   : > { %p7036_p7 = pneg %p7035_p13  ;;  %p7042_p10 = por %p7041_p6, %p7040_p5 }
  0x68   : > { %p7043_p3 = pnand %p7042_p10, %p7036_p7 }
  0x6a   : > { %7046 = shalt.err (!%p7043_p3)
}
  0x6b   : > { %s7165_s10 = smov 128   ;;  %s7166_s15 = smov 8  }
  0x6c   : > { %5922 = dma.hbm_to_vmem [thread:$0]  (!%p7348_p0), %s7346_s21, 2048, %s7352_s25, %s7354_s9, %s7165_s10, %s7165_s10, %s7166_s15  }
  0x6d   : > { %p10152_p1 = scmp.ne.s32.totalorder %s10144_s12, 0 }
  0x6f   : > { %340 = sbr.rel (%p10152_p1) target bundleno = 1907 (0x773), region = 48 }
  0x74   : > { %p10153_p13 = scmp.eq.s32.totalorder %s7244_s11, 0 }
  0x76   : > { %7116 = dma.done.wait (%p10153_p13), [#allocation5], 16   ;;  %p10154_p2 = pmov %p10153_p13 }
  0x77   : > { %s7382_s0 = sand.u32 1, %s7145_s28   ;;  %p10155_p3 = scmp.ne.s32.totalorder %s10148_s16, 0 }
  0x78   : > { %7118 = vsyncadd (%p10154_p2), [#allocation5], 4294967280  ;;  %s7385_s2 = sshll.u32 %s7382_s0, 7  ;;  %s347_s13 = scalar_lea.sflag [#allocation3], %s7382_s0 }
  0x79   : > { %s7389_s21 = scalar_lea.vmem [#allocation6], %s7385_s2 }
  0x7a   : > { %7120 = dma.done.wait (%p10155_p3), %s347_s13, 2048  }
  0x7b   : > { %7122 = vsyncadd (%p10155_p3), %s347_s13, 4294965248  ;;  %p10156_p10 = pmov %p10154_p2 }
  0x7c   : > { %p10157_p6 = pmov %p10154_p2 }
  0x7d   : > { %7124 = dma.done.wait (%p10156_p10), [#allocation8], 15360  }
  0x7e   : > { %7126 = vsyncadd (%p10157_p6), [#allocation8], 4294951936  ;;  %p10158_p0 = pmov %p10154_p2 }
  0x80   : > { %7128 = dma.done.wait (%p10158_p0), [#allocation11], 4096   ;;  %p10159_p8 = pmov %p10158_p0 }
  0x82   : > { %7130 = vsyncadd (%p10159_p8), [#allocation11], 4294963200 }
  0x83   : > { %371 = sfence }
  0x84   : > { %v6010_v0 = vld [vmem:[#allocation7 + $0x2dc] ss:$52 sps:$4 sm:$0xff]   ;;  %v6012_v1 = vld [vmem:[#allocation7 + $0x2d8] ss:$52 sps:$4 sm:$0xff]   ;;  %v10034_v2 = vmov 0   ;;  %v7406_v26 = vld [vmem:[%s7389_s21] sm:$0xff] }
  0x85   : > { %1111 = vmatprep.mubr.bf16.mxu0 %v10034_v2  ;;  %1224 = vmatprep.mubr.bf16.mxu1 %v10034_v2  ;;  %v6013_v3 = vld [vmem:[#allocation7 + $0x274] ss:$52 sps:$4 sm:$0xff]   ;;  %v6015_v4 = vld [vmem:[#allocation7 + $0x270] ss:$52 sps:$4 sm:$0xff]   ;;  %v6016_v5 = vld [vmem:[#allocation7 + $0x20c] ss:$52 sps:$4 sm:$0xff]  }
  0x86   : > { %1079 = vmatprep.subr.bf16.mxu0 %v6010_v0  ;;  %v6018_v6 = vld [vmem:[#allocation7 + $0x208] ss:$52 sps:$4 sm:$0xff]   ;;  %v6019_v7 = vld [vmem:[#allocation7 + $0x1a4] ss:$52 sps:$4 sm:$0xff]   ;;  %v6021_v8 = vld [vmem:[#allocation7 + $0x1a0] ss:$52 sps:$4 sm:$0xff]  }
  0x87   : > { %1080 = vmatpush1.bf16.msra.mxu0 %v6012_v1  ;;  %v6022_v9 = vld [vmem:[#allocation7 + $0x13c] ss:$52 sps:$4 sm:$0xff]   ;;  %v6037_v10 = vld [vmem:[#allocation7 + $0x2e4] ss:$52 sps:$4 sm:$0xff]   ;;  %v6039_v11 = vld [vmem:[#allocation7 + $0x2e0] ss:$52 sps:$4 sm:$0xff]  }
  0x88   : > { %1081 = vmatprep.subr.bf16.mxu0 %v6013_v3  ;;  %v6040_v12 = vld [vmem:[#allocation7 + $0x27c] ss:$52 sps:$4 sm:$0xff]   ;;  %v6024_v13 = vld [vmem:[#allocation7 + $0x138] ss:$52 sps:$4 sm:$0xff]   ;;  %v6025_v14 = vld [vmem:[#allocation7 + $0xd4] ss:$52 sps:$4 sm:$0xff]   ;;  %1192 = vmatprep.subr.bf16.mxu1 %v6037_v10 }
  0x89   : > { %1193 = vmatpush1.bf16.msra.mxu1 %v6039_v11  ;;  %v6042_v15 = vld [vmem:[#allocation7 + $0x278] ss:$52 sps:$4 sm:$0xff]   ;;  %v6046_v16 = vld [vmem:[#allocation7 + $0x214] ss:$52 sps:$4 sm:$0xff]   ;;  %v6027_v17 = vld [vmem:[#allocation7 + $0xd0] ss:$52 sps:$4 sm:$0xff]  }
  0x8a   : > { %1194 = vmatprep.subr.bf16.mxu1 %v6040_v12  ;;  %v6028_v18 = vld [vmem:[#allocation7 + $0x6c] ss:$52 sps:$4 sm:$0xff]   ;;  %v6048_v19 = vld [vmem:[#allocation7 + $0x210] ss:$52 sps:$4 sm:$0xff]   ;;  %v6030_v21 = vld [vmem:[#allocation7 + $0x68] ss:$52 sps:$4 sm:$0xff]  }
  0x8b   : > { %1082 = vmatpush1.bf16.msra.mxu0 %v6015_v4  ;;  %v6049_v20 = vld [vmem:[#allocation7 + $0x1ac] ss:$52 sps:$4 sm:$0xff]   ;;  %v6031_v22 = vld [vmem:[#allocation7 + $0x4] ss:$52 sps:$4 sm:$0xff]   ;;  %v6051_v23 = vld [vmem:[#allocation7 + $0x1a8] ss:$52 sps:$4 sm:$0xff]  }
  0x8c   : > { %1083 = vmatprep.subr.bf16.mxu0 %v6016_v5  ;;  %v6055_v24 = vld [vmem:[#allocation7 + $0x144] ss:$52 sps:$4 sm:$0xff]   ;;  %v6033_v25 = vld [vmem:[#allocation7] ss:$52 sps:$4 sm:$0xff]   ;;  %v7409_v27 = vld [vmem:[%s7389_s21 + $0x8] sm:$0xff]  ;;  %s8056_s12 = sld [smem:[#allocation2]] }
  0x8d   : > { %1195 = vmatpush1.bf16.msra.mxu1 %v6042_v15  ;;  %v6036_v28 = vld [vmem:[#allocation7 + $0x2ec] ss:$52 sps:$4 sm:$0xff]   ;;  %v6058_v30 = vld [vmem:[#allocation7 + $0xdc] ss:$52 sps:$4 sm:$0xff]   ;;  %v7413_v31 = vpack.c.bf16 %v7409_v27, %v7406_v26  ;;  %v6045_v33 = vld [vmem:[#allocation7 + $0x284] ss:$52 sps:$4 sm:$0xff]   ;;  %v2694_v15 = vmul.f32 %v7406_v26, %v7406_v26 }
  0x8e   : > { %1196 = vmatprep.subr.bf16.mxu1 %v6046_v16  ;;  %v6057_v29 = vld [vmem:[#allocation7 + $0x140] ss:$52 sps:$4 sm:$0xff]   ;;  %v6034_v32 = vld [vmem:[#allocation7 + $0x2e8] ss:$52 sps:$4 sm:$0xff]   ;;  %v6060_v34 = vld [vmem:[#allocation7 + $0xd8] ss:$52 sps:$4 sm:$0xff]  }
  0x8f   : > { %1084 = vmatpush1.bf16.msra.mxu0 %v6018_v6  ;;  %v417_v35 = vld [vmem:[%s7389_s21 + $0x10] sm:$0xff]  ;;  %v420_v37 = vld [vmem:[%s7389_s21 + $0x28] sm:$0xff]  ;;  %v418_v38 = vld [vmem:[%s7389_s21 + $0x18] sm:$0xff]  ;;  %s8302_s9 = scalar_lea.vmem [#allocation14], %s7385_s2  ;;  %s7168_s18 = smov 127  }
  0x90   : > { %1085 = vmatprep.subr.bf16.mxu0 %v6019_v7  ;;  %v6064_v36 = vld [vmem:[#allocation7 + $0x74] ss:$52 sps:$4 sm:$0xff]   ;;  %v6054_v40 = vld [vmem:[#allocation7 + $0x21c] ss:$52 sps:$4 sm:$0xff]   ;;  %v2699_v41 = vmul.f32 %v420_v37, %v420_v37  ;;  %v6067_v43 = vld [vmem:[#allocation7 + $0xc] ss:$52 sps:$4 sm:$0xff]   ;;  %v7420_v44 = vpack.c.bf16 %v418_v38, %v417_v35 }
  0x91   : > { %1197 = vmatpush1.bf16.msra.mxu1 %v6048_v19  ;;  %v6043_v39 = vld [vmem:[#allocation7 + $0x280] ss:$52 sps:$4 sm:$0xff]   ;;  %v6066_v42 = vld [vmem:[#allocation7 + $0x70] ss:$52 sps:$4 sm:$0xff]   ;;  %v6052_v45 = vld [vmem:[#allocation7 + $0x218] ss:$52 sps:$4 sm:$0xff]  }
  0x92   : > { %1198 = vmatprep.subr.bf16.mxu1 %v6049_v20  ;;  %2720 = vadd.xlane.f32.xlu1 %v2699_v41  ;;  %v419_v46 = vld [vmem:[%s7389_s21 + $0x20] sm:$0xff]  ;;  %v422_v47 = vld [vmem:[%s7389_s21 + $0x38] sm:$0xff]  ;;  %v6063_v48 = vld [vmem:[#allocation7 + $0x1b4] ss:$52 sps:$4 sm:$0xff]   ;;  %s7169_s20 = smov 126   ;;  %s7170_s24 = smov 1  }
  0x93   : > { %1086 = vmatpush1.bf16.msra.mxu0 %v6021_v8  ;;  %v6069_v49 = vld [vmem:[#allocation7 + $0x8] ss:$52 sps:$4 sm:$0xff]   ;;  %v2701_v51 = vmul.f32 %v422_v47, %v422_v47  ;;  %v2698_v52 = vmul.f32 %v419_v46, %v419_v46  ;;  %v6061_v53 = vld [vmem:[#allocation7 + $0x1b0] ss:$52 sps:$4 sm:$0xff]   ;;  %v6072_v55 = vld [vmem:[#allocation7 + $0x14c] ss:$52 sps:$4 sm:$0xff]   ;;  %v7431_v58 = vpack.c.bf16 %v420_v37, %v419_v46 }
  0x94   : > { %1087 = vmatprep.subr.bf16.mxu0 %v6022_v9  ;;  %v6087_v50 = vld [vmem:[#allocation7 + $0x2f4] ss:$52 sps:$4 sm:$0xff]   ;;  %v7427_v54 = vld [vmem:[%s7389_s21 + $0x40] sm:$0xff]  ;;  %v6078_v7 = vld [vmem:[#allocation7 + $0x7c] ss:$52 sps:$4 sm:$0xff]   ;;  %s7171_s23 = smov 2  }
  0x95   : > { %1199 = vmatpush1.bf16.msra.mxu1 %v6051_v23  ;;  %v6085_v56 = vld [vmem:[#allocation7 + $0x2f0] ss:$52 sps:$4 sm:$0xff]   ;;  %v2702_v57 = vmul.f32 %v7427_v54, %v7427_v54  ;;  %v6090_v60 = vld [vmem:[#allocation7 + $0x28c] ss:$52 sps:$4 sm:$0xff]   ;;  %2718 = vadd.xlane.f32.xlu0 %v2698_v52  ;;  %v6070_v61 = vld [vmem:[#allocation7 + $0x148] ss:$52 sps:$4 sm:$0xff]  }
  0x96   : > { %1200 = vmatprep.subr.bf16.mxu1 %v6055_v24  ;;  %2724 = vadd.xlane.f32.xlu1 %v2701_v51  ;;  %v421_v59 = vld [vmem:[%s7389_s21 + $0x30] sm:$0xff]  ;;  %v6075_v63 = vld [vmem:[#allocation7 + $0xe4] ss:$52 sps:$4 sm:$0xff]   ;;  %v6088_v1 = vld [vmem:[#allocation7 + $0x288] ss:$52 sps:$4 sm:$0xff]   ;;  %s5357_s10 = sld [smem:[#allocation2 + $0x1]] }
  0x97   : > { %1088 = vmatpush1.bf16.msra.mxu0 %v6024_v13  ;;  %v7436_v62 = vld [vmem:[%s7389_s21 + $0x50] sm:$0xff]  ;;  %v2700_v0 = vmul.f32 %v421_v59, %v421_v59  ;;  %v6096_v4 = vld [vmem:[#allocation7 + $0x224] ss:$52 sps:$4 sm:$0xff]   ;;  %v424_v5 = vld [vmem:[%s7389_s21 + $0x48] sm:$0xff]  ;;  %v7444_v10 = vpack.c.bf16 %v422_v47, %v421_v59  ;;  %s5358_s15 = sld [smem:[#allocation2 + $0x2]]  ;;  %s5617_s13 = sshll.u32 %s7244_s11, 11 }
  0x98   : > { %1089 = vmatprep.subr.bf16.mxu0 %v6025_v14  ;;  %v2704_v3 = vmul.f32 %v7436_v62, %v7436_v62  ;;  %v6073_v6 = vld [vmem:[#allocation7 + $0xe0] ss:$52 sps:$4 sm:$0xff]   ;;  %v2703_v9 = vmul.f32 %v424_v5, %v424_v5  ;;  %v6099_v11 = vld [vmem:[#allocation7 + $0x1bc] ss:$52 sps:$4 sm:$0xff]   ;;  %v6076_v13 = vld [vmem:[#allocation7 + $0x78] ss:$52 sps:$4 sm:$0xff]   ;;  %v7456_v23 = vpack.c.bf16 %v424_v5, %v7427_v54  ;;  %s9887_s16 = scalar_lea.hbm %s10029_s8, %s5617_s13 }
  0x99   : > { %1201 = vmatpush1.bf16.msra.mxu1 %v6057_v29  ;;  %2722 = vadd.xlane.f32.xlu0 %v2700_v0  ;;  %v6094_v8 = vld [vmem:[#allocation7 + $0x220] ss:$52 sps:$4 sm:$0xff]   ;;  %v426_v12 = vld [vmem:[%s7389_s21 + $0x58] sm:$0xff]  ;;  %v6079_v19 = vld [vmem:[#allocation7 + $0x10] ss:$52 sps:$4 sm:$0xff]   ;;  %s5182_s25 = sshll.u32 %s8302_s9, 4  ;;  %s9890_s25 = int_to_ptr.vmem [resolvable:$true] %s5182_s25 }
  0x9a   : > { %1202 = vmatprep.subr.bf16.mxu1 %v6058_v30  ;;  %2726 = vadd.xlane.f32.xlu1 %v2702_v57  ;;  %v6081_v14 = vld [vmem:[#allocation7 + $0x14] ss:$52 sps:$4 sm:$0xff]   ;;  %v6097_v16 = vld [vmem:[#allocation7 + $0x1b8] ss:$52 sps:$4 sm:$0xff]   ;;  %v6084_v20 = vld [vmem:[#allocation7 + $0x2fc] ss:$52 sps:$4 sm:$0xff]  }
  0x9b   : > { %1090 = vmatpush1.bf16.msra.mxu0 %v6027_v17  ;;  %v2705_v17 = vmul.f32 %v426_v12, %v426_v12  ;;  %v6108_v24 = vld [vmem:[#allocation7 + $0xec] ss:$52 sps:$4 sm:$0xff]   ;;  %v6114_v26 = vld [vmem:[#allocation7 + $0x84] ss:$52 sps:$4 sm:$0xff]   ;;  %v6117_v29 = vld [vmem:[#allocation7 + $0x1c] ss:$52 sps:$4 sm:$0xff]  }
  0x9c   : > { %1091 = vmatprep.subr.bf16.mxu0 %v6028_v18  ;;  %v6105_v18 = vld [vmem:[#allocation7 + $0x154] ss:$52 sps:$4 sm:$0xff]   ;;  %v427_v30 = vld [vmem:[%s7389_s21 + $0x60] sm:$0xff]  ;;  %v430_v37 = vld [vmem:[%s7389_s21 + $0x78] sm:$0xff]  ;;  %p10553_p11 = scmp.ne.s32.totalorder %s10149_s22, 0 }
  0x9d   : > { %1203 = vmatpush1.bf16.msra.mxu1 %v6060_v34  ;;  %2728 = vadd.xlane.f32.xlu0 %v2703_v9  ;;  %v428_v34 = vld [vmem:[%s7389_s21 + $0x68] sm:$0xff]  ;;  %v6091_v41 = vld [vmem:[#allocation7 + $0x290] ss:$52 sps:$4 sm:$0xff]   ;;  %v6109_v47 = vld [vmem:[#allocation7 + $0x1c0] ss:$52 sps:$4 sm:$0xff]  }
  0x9e   : > { %1204 = vmatprep.subr.bf16.mxu1 %v6064_v36  ;;  %2730 = vadd.xlane.f32.xlu1 %v2704_v3  ;;  %v7471_v35 = vpack.c.bf16 %v428_v34, %v427_v30  ;;  %v429_v36 = vld [vmem:[%s7389_s21 + $0x70] sm:$0xff]  ;;  %v6111_v46 = vld [vmem:[#allocation7 + $0x1c4] ss:$52 sps:$4 sm:$0xff]   ;;  %v6126_v57 = vld [vmem:[#allocation7 + $0x8c] ss:$52 sps:$4 sm:$0xff]  }
  0x9f   : > { %1092 = vmatpush1.bf16.msra.mxu0 %v6030_v21  ;;  %v6103_v21 = vld [vmem:[#allocation7 + $0x150] ss:$52 sps:$4 sm:$0xff]   ;;  %v7479_v38 = vpack.c.bf16 %v430_v37, %v429_v36  ;;  %v6118_v52 = vld [vmem:[#allocation7 + $0x158] ss:$52 sps:$4 sm:$0xff]   ;;  %v6130_v3 = vld [vmem:[#allocation7 + $0x308] ss:$52 sps:$4 sm:$0xff]  }
  0xa0   : > { %1093 = vmatprep.subr.bf16.mxu0 %v6031_v22  ;;  %v2695_v22 = vmul.f32 %v7409_v27, %v7409_v27  ;;  %v6112_v27 = vld [vmem:[#allocation7 + $0x80] ss:$52 sps:$4 sm:$0xff]   ;;  %v6136_v51 = vld [vmem:[#allocation7 + $0x29c] ss:$52 sps:$4 sm:$0xff]   ;;  %v6134_v54 = vld [vmem:[#allocation7 + $0x298] ss:$52 sps:$4 sm:$0xff]  }
  0xa1   : > { %1205 = vmatpush1.bf16.msra.mxu1 %v6066_v42  ;;  %2732 = vadd.xlane.f32.xlu0 %v2705_v17  ;;  %v6102_v42 = vld [vmem:[#allocation7 + $0x22c] ss:$52 sps:$4 sm:$0xff]   ;;  %v6138_v59 = vld [vmem:[#allocation7 + $0x230] ss:$52 sps:$4 sm:$0xff]  }
  0xa2   : > { %1206 = vmatprep.subr.bf16.mxu1 %v6067_v43  ;;  %2710 = vadd.xlane.f32.xlu1 %v2694_v15  ;;  %v6100_v43 = vld [vmem:[#allocation7 + $0x228] ss:$52 sps:$4 sm:$0xff]   ;;  %v6147_v0 = vld [vmem:[#allocation7 + $0x164] ss:$52 sps:$4 sm:$0xff]   ;;  %v6157_v9 = vld [vmem:[#allocation7 + $0x2c] ss:$52 sps:$4 sm:$0xff]  }
  0xa3   : > { %1094 = vmatpush1.bf16.msra.mxu0 %v6033_v25  ;;  %v6106_v25 = vld [vmem:[#allocation7 + $0xe8] ss:$52 sps:$4 sm:$0xff]   ;;  %v6160_v17 = vld [vmem:[#allocation7 + $0x98] ss:$52 sps:$4 sm:$0xff]  }
  0xa4   : > { %1305 = vmatprep.subr.bf16.mxu0 %v6036_v28  ;;  %v7463_v28 = vpack.c.bf16 %v426_v12, %v7436_v62  ;;  %v6129_v62 = vld [vmem:[#allocation7 + $0x24] ss:$52 sps:$4 sm:$0xff]   ;;  %v6150_v5 = vld [vmem:[#allocation7 + $0xfc] ss:$52 sps:$4 sm:$0xff]   ;;  %v6137_v12 = vld [vmem:[#allocation7 + $0x2a0] ss:$52 sps:$4 sm:$0xff]  }
  0xa5   : > { %1207 = vmatpush1.bf16.msra.mxu1 %v6069_v49  ;;  %2712 = vadd.xlane.f32.xlu0 %v2695_v22  ;;  %v6120_v49 = vld [vmem:[#allocation7 + $0x15c] ss:$52 sps:$4 sm:$0xff]  }
  0xa6   : > { %1112 = vmatmul.mubr.bf16.vlgmr.msra.gmra.mxu0 %v7413_v31  ;;  %1418 = vmatprep.subr.bf16.mxu1 %v6087_v50  ;;  %v6131_v50 = vld [vmem:[#allocation7 + $0x300] ss:$52 sps:$4 sm:$0xff]   ;;  %v6158_v15 = vld [vmem:[#allocation7 + $0x168] ss:$52 sps:$4 sm:$0xff]  }
  0xa7   : > { %1306 = vmatpush1.bf16.msra.mxu0 %v6034_v32  ;;  %1121 = vmatprep.mubr.bf16.mxu0 %v10034_v2  ;;  %v6115_v32 = vld [vmem:[#allocation7 + $0x18] ss:$52 sps:$4 sm:$0xff]  }
  0xa8   : > { %1307 = vmatprep.subr.bf16.mxu0 %v6045_v33  ;;  %1225 = vmatmul.mubr.bf16.vlgmr.msra.gmra.mxu1 %v7413_v31  ;;  %v6133_v33 = vld [vmem:[#allocation7 + $0x304] ss:$52 sps:$4 sm:$0xff]  }
  0xa9   : > { %1234 = vmatprep.mubr.bf16.mxu1 %v10034_v2  ;;  %1419 = vmatpush1.bf16.msra.mxu1 %v6085_v56  ;;  %v6121_v56 = vld [vmem:[#allocation7 + $0xf0] ss:$52 sps:$4 sm:$0xff]  }
  0xaa   : > { %1420 = vmatprep.subr.bf16.mxu1 %v6090_v60  ;;  %v6143_v60 = vld [vmem:[#allocation7 + $0x1cc] ss:$52 sps:$4 sm:$0xff]  }
  0xab   : > { %1308 = vmatpush1.bf16.msra.mxu0 %v6043_v39  ;;  %v6082_v39 = vld [vmem:[#allocation7 + $0x2f8] ss:$52 sps:$4 sm:$0xff]  }
  0xac   : > { %1309 = vmatprep.subr.bf16.mxu0 %v6054_v40  ;;  %v6093_v40 = vld [vmem:[#allocation7 + $0x294] ss:$52 sps:$4 sm:$0xff]  }
  0xad   : > { %1421 = vmatpush1.bf16.msra.mxu1 %v6088_v1  ;;  %v6127_v1 = vld [vmem:[#allocation7 + $0x20] ss:$52 sps:$4 sm:$0xff]  }
  0xae   : > { %1122 = vmatmul.mubr.bf16.gmra.mxu0 %v7420_v44  ;;  %1422 = vmatprep.subr.bf16.mxu1 %v6096_v4  ;;  %v6145_v4 = vld [vmem:[#allocation7 + $0x160] ss:$52 sps:$4 sm:$0xff]  }
  0xaf   : > { %1131 = vmatprep.mubr.bf16.mxu0 %v10034_v2  ;;  %1310 = vmatpush1.bf16.msra.mxu0 %v6052_v45  ;;  %v2706_v45 = vmul.f32 %v427_v30, %v427_v30 }
  0xb0   : > { %1311 = vmatprep.subr.bf16.mxu0 %v6063_v48  ;;  %1235 = vmatmul.mubr.bf16.gmra.mxu1 %v7420_v44  ;;  %v2707_v48 = vmul.f32 %v428_v34, %v428_v34 }
  0xb1   : > { %1244 = vmatprep.mubr.bf16.mxu1 %v10034_v2  ;;  %1423 = vmatpush1.bf16.msra.mxu1 %v6094_v8  ;;  %v6152_v8 = vld [vmem:[#allocation7 + $0x90] ss:$52 sps:$4 sm:$0xff]  }
  0xb2   : > { %1424 = vmatprep.subr.bf16.mxu1 %v6099_v11  ;;  %2734 = vadd.xlane.f32.xlu0 %v2706_v45  ;;  %v6155_v11 = vld [vmem:[#allocation7 + $0x28] ss:$52 sps:$4 sm:$0xff]  }
  0xb3   : > { %1312 = vmatpush1.bf16.msra.mxu0 %v6061_v53  ;;  %2736 = vadd.xlane.f32.xlu1 %v2707_v48  ;;  %v6123_v53 = vld [vmem:[#allocation7 + $0xf4] ss:$52 sps:$4 sm:$0xff]  }
  0xb4   : > { %1313 = vmatprep.subr.bf16.mxu0 %v6072_v55  ;;  %v6140_v55 = vld [vmem:[#allocation7 + $0x234] ss:$52 sps:$4 sm:$0xff]  }
  0xb5   : > { %1425 = vmatpush1.bf16.msra.mxu1 %v6097_v16  ;;  %v6159_v16 = vld [vmem:[#allocation7 + $0x100] ss:$52 sps:$4 sm:$0xff]  }
  0xb6   : > { %1132 = vmatmul.mubr.bf16.gmra.mxu0 %v7431_v58  ;;  %1426 = vmatprep.subr.bf16.mxu1 %v6105_v18  ;;  %v6161_v18 = vld [vmem:[#allocation7 + $0x30] ss:$52 sps:$4 sm:$0xff]  }
  0xb7   : > { %1141 = vmatprep.mubr.bf16.mxu0 %v10034_v2  ;;  %1314 = vmatpush1.bf16.msra.mxu0 %v6070_v61  ;;  %v6124_v61 = vld [vmem:[#allocation7 + $0x88] ss:$52 sps:$4 sm:$0xff]  }
  0xb8   : > { %1315 = vmatprep.subr.bf16.mxu0 %v6075_v63  ;;  %1245 = vmatmul.mubr.bf16.gmra.mxu1 %v7431_v58  ;;  %v6141_v63 = vld [vmem:[#allocation7 + $0x1c8] ss:$52 sps:$4 sm:$0xff]  }
  0xb9   : > { %1254 = vmatprep.mubr.bf16.mxu1 %v10034_v2  ;;  %1427 = vmatpush1.bf16.msra.mxu1 %v6103_v21 }
  0xba   : > { %1428 = vmatprep.subr.bf16.mxu1 %v6108_v24 }
  0xbb   : > { %1316 = vmatpush1.bf16.msra.mxu0 %v6073_v6  ;;  %v6148_v6 = vld [vmem:[#allocation7 + $0xf8] ss:$52 sps:$4 sm:$0xff]  }
  0xbc   : > { %1317 = vmatprep.subr.bf16.mxu0 %v6078_v7  ;;  %v6154_v7 = vld [vmem:[#allocation7 + $0x94] ss:$52 sps:$4 sm:$0xff]  }
  0xbd   : > { %1429 = vmatpush1.bf16.msra.mxu1 %v6106_v25 }
  0xbe   : > { %1142 = vmatmul.mubr.bf16.gmra.mxu0 %v7444_v10  ;;  %1430 = vmatprep.subr.bf16.mxu1 %v6114_v26 }
  0xbf   : > { %1151 = vmatprep.mubr.bf16.mxu0 %v10034_v2  ;;  %1318 = vmatpush1.bf16.msra.mxu0 %v6076_v13  ;;  %v6144_v13 = vld [vmem:[#allocation7 + $0x238] ss:$52 sps:$4 sm:$0xff]  }
  0xc0   : > { %1319 = vmatprep.subr.bf16.mxu0 %v6081_v14  ;;  %1255 = vmatmul.mubr.bf16.gmra.mxu1 %v7444_v10  ;;  %v6151_v14 = vld [vmem:[#allocation7 + $0x1d0] ss:$52 sps:$4 sm:$0xff]  }
  0xc1   : > { %1264 = vmatprep.mubr.bf16.mxu1 %v10034_v2  ;;  %1431 = vmatpush1.bf16.msra.mxu1 %v6112_v27 }
  0xc2   : > { %1432 = vmatprep.subr.bf16.mxu1 %v6117_v29 }
  0xc3   : > { %1320 = vmatpush1.bf16.msra.mxu0 %v6079_v19 }
  0xc4   : > { %1531 = vmatprep.subr.bf16.mxu0 %v6084_v20 }
  0xc5   : > { %1433 = vmatpush1.bf16.msra.mxu1 %v6115_v32 }
  0xc6   : > { %1152 = vmatmul.mubr.bf16.gmra.mxu0 %v7456_v23  ;;  %1644 = vmatprep.subr.bf16.mxu1 %v6133_v33 }
  0xc7   : > { %1161 = vmatprep.mubr.bf16.mxu0 %v10034_v2 }
  0xc8   : > { %1265 = vmatmul.mubr.bf16.gmra.mxu1 %v7456_v23 }
  0xc9   : > { %1274 = vmatprep.mubr.bf16.mxu1 %v10034_v2 }
  0xce   : > { %1162 = vmatmul.mubr.bf16.gmra.mxu0 %v7463_v28 }
  0xcf   : > { %1171 = vmatprep.mubr.bf16.mxu0 %v10034_v2 }
  0xd0   : > { %1275 = vmatmul.mubr.bf16.gmra.mxu1 %v7463_v28 }
  0xd1   : > { %1284 = vmatprep.mubr.bf16.mxu1 %v10034_v2 }
  0xd6   : > { %1172 = vmatmul.mubr.bf16.gmra.mxu0 %v7471_v35 }
  0xd7   : > { %1181 = vmatprep.mubr.bf16.mxu0 %v10034_v2 }
  0xd8   : > { %1285 = vmatmul.mubr.bf16.gmra.mxu1 %v7471_v35 }
  0xd9   : > { %1294 = vmatprep.mubr.bf16.mxu1 %v10034_v2 }
  0xde   : > { %1182 = vmatmul.mubr.bf16.gmra.mxu0 %v7479_v38 }
  0xdf   : > { %1337 = vmatprep.mubr.bf16.mxu0 %v10034_v2 }
  0xe0   : > { %1295 = vmatmul.mubr.bf16.gmra.mxu1 %v7479_v38 }
  0xe1   : > { %1450 = vmatprep.mubr.bf16.mxu1 %v10034_v2 }
  0xe6   : > { %1338 = vmatmul.mubr.bf16.vlgmr.msra.gmra.mxu0 %v7413_v31 }
  0xe7   : > { %1532 = vmatpush1.bf16.msra.mxu0 %v6082_v39  ;;  %1347 = vmatprep.mubr.bf16.mxu0 %v10034_v2 }
  0xe8   : > { %1533 = vmatprep.subr.bf16.mxu0 %v6093_v40  ;;  %1451 = vmatmul.mubr.bf16.vlgmr.msra.gmra.mxu1 %v7413_v31 }
  0xe9   : > { %1460 = vmatprep.mubr.bf16.mxu1 %v10034_v2  ;;  %1645 = vmatpush1.bf16.msra.mxu1 %v6131_v50 }
  0xea   : > { %1646 = vmatprep.subr.bf16.mxu1 %v6136_v51 }
  0xeb   : > { %1534 = vmatpush1.bf16.msra.mxu0 %v6091_v41 }
  0xec   : > { %1535 = vmatprep.subr.bf16.mxu0 %v6102_v42 }
  0xed   : > { %1647 = vmatpush1.bf16.msra.mxu1 %v6134_v54 }
  0xee   : > { %1348 = vmatmul.mubr.bf16.gmra.mxu0 %v7420_v44  ;;  %1648 = vmatprep.subr.bf16.mxu1 %v6140_v55 }
  0xef   : > { %1357 = vmatprep.mubr.bf16.mxu0 %v10034_v2  ;;  %1536 = vmatpush1.bf16.msra.mxu0 %v6100_v43 }
  0xf0   : > { %1537 = vmatprep.subr.bf16.mxu0 %v6111_v46  ;;  %1461 = vmatmul.mubr.bf16.gmra.mxu1 %v7420_v44 }
  0xf1   : > { %1470 = vmatprep.mubr.bf16.mxu1 %v10034_v2  ;;  %1649 = vmatpush1.bf16.msra.mxu1 %v6138_v59 }
  0xf2   : > { %1650 = vmatprep.subr.bf16.mxu1 %v6143_v60 }
  0xf3   : > { %1538 = vmatpush1.bf16.msra.mxu0 %v6109_v47 }
  0xf4   : > { %1539 = vmatprep.subr.bf16.mxu0 %v6120_v49 }
  0xf5   : > { %1651 = vmatpush1.bf16.msra.mxu1 %v6141_v63 }
  0xf6   : > { %1358 = vmatmul.mubr.bf16.gmra.mxu0 %v7431_v58  ;;  %1652 = vmatprep.subr.bf16.mxu1 %v6147_v0 }
  0xf7   : > { %1367 = vmatprep.mubr.bf16.mxu0 %v10034_v2  ;;  %1540 = vmatpush1.bf16.msra.mxu0 %v6118_v52 }
  0xf8   : > { %1541 = vmatprep.subr.bf16.mxu0 %v6123_v53  ;;  %1471 = vmatmul.mubr.bf16.gmra.mxu1 %v7431_v58 }
  0xf9   : > { %1480 = vmatprep.mubr.bf16.mxu1 %v10034_v2  ;;  %1653 = vmatpush1.bf16.msra.mxu1 %v6145_v4 }
  0xfa   : > { %1654 = vmatprep.subr.bf16.mxu1 %v6150_v5 }
  0xfb   : > { %1542 = vmatpush1.bf16.msra.mxu0 %v6121_v56 }
  0xfc   : > { %1543 = vmatprep.subr.bf16.mxu0 %v6126_v57 }
  0xfd   : > { %1655 = vmatpush1.bf16.msra.mxu1 %v6148_v6 }
  0xfe   : > { %1368 = vmatmul.mubr.bf16.gmra.mxu0 %v7444_v10  ;;  %1656 = vmatprep.subr.bf16.mxu1 %v6154_v7 }
  0xff   : > { %1377 = vmatprep.mubr.bf16.mxu0 %v10034_v2  ;;  %1544 = vmatpush1.bf16.msra.mxu0 %v6124_v61 }
 0x100   : > { %1545 = vmatprep.subr.bf16.mxu0 %v6129_v62  ;;  %1481 = vmatmul.mubr.bf16.gmra.mxu1 %v7444_v10 }
 0x101   : > { %1490 = vmatprep.mubr.bf16.mxu1 %v10034_v2  ;;  %1657 = vmatpush1.bf16.msra.mxu1 %v6152_v8 }
 0x102   : > { %1658 = vmatprep.subr.bf16.mxu1 %v6157_v9 }
 0x103   : > { %1546 = vmatpush1.bf16.msra.mxu0 %v6127_v1 }
 0x104   : > { %5827 = vmatprep.subr.bf16.mxu0 %v6130_v3 }
 0x105   : > { %1659 = vmatpush1.bf16.msra.mxu1 %v6155_v11 }
 0x106   : > { %1378 = vmatmul.mubr.bf16.gmra.mxu0 %v7456_v23 }
 0x107   : > { %1387 = vmatprep.mubr.bf16.mxu0 %v10034_v2 }
 0x108   : > { %1491 = vmatmul.mubr.bf16.gmra.mxu1 %v7456_v23 }
 0x109   : > { %1500 = vmatprep.mubr.bf16.mxu1 %v10034_v2 }
 0x10e   : > { %1388 = vmatmul.mubr.bf16.gmra.mxu0 %v7463_v28 }
 0x10f   : > { %1397 = vmatprep.mubr.bf16.mxu0 %v10034_v2 }
 0x110   : > { %1501 = vmatmul.mubr.bf16.gmra.mxu1 %v7463_v28 }
 0x111   : > { %1510 = vmatprep.mubr.bf16.mxu1 %v10034_v2 }
 0x116   : > { %1398 = vmatmul.mubr.bf16.gmra.mxu0 %v7471_v35 }
 0x117   : > { %1407 = vmatprep.mubr.bf16.mxu0 %v10034_v2 }
 0x118   : > { %1511 = vmatmul.mubr.bf16.gmra.mxu1 %v7471_v35 }
 0x119   : > { %1520 = vmatprep.mubr.bf16.mxu1 %v10034_v2 }
 0x11e   : > { %1408 = vmatmul.mubr.bf16.gmra.mxu0 %v7479_v38 }
 0x11f   : > { %1563 = vmatprep.mubr.bf16.mxu0 %v10034_v2 }
 0x120   : > { %1521 = vmatmul.mubr.bf16.gmra.mxu1 %v7479_v38 }
 0x121   : > { %1676 = vmatprep.mubr.bf16.mxu1 %v10034_v2 }
 0x126   : > { %1564 = vmatmul.mubr.bf16.vlgmr.msra.gmra.mxu0 %v7413_v31 }
 0x127   : > { %5828 = vmatpush3.bf16.msra.mxu0 %v6130_v3  ;;  %1573 = vmatprep.mubr.bf16.mxu0 %v10034_v2 }
 0x128   : > { %5829 = vmatprep.subr.bf16.mxu0 %v6137_v12  ;;  %1677 = vmatmul.mubr.bf16.vlgmr.msra.gmra.mxu1 %v7413_v31 }
 0x129   : > { %1686 = vmatprep.mubr.bf16.mxu1 %v10034_v2 }
 0x12b   : > { %5830 = vmatpush3.bf16.msra.mxu0 %v6137_v12 }
 0x12c   : > { %5831 = vmatprep.subr.bf16.mxu0 %v6144_v13 }
 0x12e   : > { %1574 = vmatmul.mubr.bf16.gmra.mxu0 %v7420_v44 }
 0x12f   : > { %1583 = vmatprep.mubr.bf16.mxu0 %v10034_v2  ;;  %5832 = vmatpush3.bf16.msra.mxu0 %v6144_v13 }
 0x130   : > { %5833 = vmatprep.subr.bf16.mxu0 %v6151_v14  ;;  %1687 = vmatmul.mubr.bf16.gmra.mxu1 %v7420_v44 }
 0x131   : > { %1696 = vmatprep.mubr.bf16.mxu1 %v10034_v2 }
 0x133   : > { %5834 = vmatpush3.bf16.msra.mxu0 %v6151_v14 }
 0x134   : > { %5835 = vmatprep.subr.bf16.mxu0 %v6158_v15 }
 0x136   : > { %1584 = vmatmul.mubr.bf16.gmra.mxu0 %v7431_v58 }
 0x137   : > { %1593 = vmatprep.mubr.bf16.mxu0 %v10034_v2  ;;  %5836 = vmatpush3.bf16.msra.mxu0 %v6158_v15 }
 0x138   : > { %5837 = vmatprep.subr.bf16.mxu0 %v6159_v16  ;;  %1697 = vmatmul.mubr.bf16.gmra.mxu1 %v7431_v58 }
 0x139   : > { %1706 = vmatprep.mubr.bf16.mxu1 %v10034_v2 }
 0x13b   : > { %5838 = vmatpush3.bf16.msra.mxu0 %v6159_v16 }
 0x13c   : > { %5839 = vmatprep.subr.bf16.mxu0 %v6160_v17 }
 0x13e   : > { %1594 = vmatmul.mubr.bf16.gmra.mxu0 %v7444_v10 }
 0x13f   : > { %1603 = vmatprep.mubr.bf16.mxu0 %v10034_v2  ;;  %5840 = vmatpush3.bf16.msra.mxu0 %v6160_v17 }
 0x140   : > { %5841 = vmatprep.subr.bf16.mxu0 %v6161_v18  ;;  %1707 = vmatmul.mubr.bf16.gmra.mxu1 %v7444_v10 }
 0x141   : > { %1716 = vmatprep.mubr.bf16.mxu1 %v10034_v2 }
 0x143   : > { %5842 = vmatpush3.bf16.msra.mxu0 %v6161_v18 }
 0x146   : > { %1604 = vmatmul.mubr.bf16.gmra.mxu0 %v7456_v23 }
 0x147   : > { %1613 = vmatprep.mubr.bf16.mxu0 %v10034_v2 }
 0x148   : > { %1717 = vmatmul.mubr.bf16.gmra.mxu1 %v7456_v23 }
 0x149   : > { %1726 = vmatprep.mubr.bf16.mxu1 %v10034_v2 }
 0x14e   : > { %1614 = vmatmul.mubr.bf16.gmra.mxu0 %v7463_v28 }
 0x14f   : > { %1623 = vmatprep.mubr.bf16.mxu0 %v10034_v2 }
 0x150   : > { %1727 = vmatmul.mubr.bf16.gmra.mxu1 %v7463_v28 }
 0x151   : > { %1736 = vmatprep.mubr.bf16.mxu1 %v10034_v2 }
 0x156   : > { %1624 = vmatmul.mubr.bf16.gmra.mxu0 %v7471_v35 }
 0x157   : > { %1633 = vmatprep.mubr.bf16.mxu0 %v10034_v2 }
 0x158   : > { %1737 = vmatmul.mubr.bf16.gmra.mxu1 %v7471_v35 }
 0x159   : > { %1746 = vmatprep.mubr.bf16.mxu1 %v10034_v2 }
 0x15e   : > { %1634 = vmatmul.mubr.bf16.gmra.mxu0 %v7479_v38 }
 0x15f   : > { %5843 = vmatprep.mubr.bf16.mxu0 %v7413_v31 }
 0x160   : > { %1747 = vmatmul.mubr.bf16.gmra.mxu1 %v7479_v38 }
 0x166   : > { %v7551_v19 = vpop.f32.mrf.mxu0  ;;  %5844 = vmatmul.mubr.bf16.vlgmr.msra.gmra.mxu0 %v7420_v44 }
 0x167   : > { %v5464_v20 = vmul.f32 -1.442695, %v7551_v19  ;;  %5847 = vmatprep.mubr.bf16.mxu0 %v7431_v58 }
 0x168   : > { %v7556_v21 = vpop.f32.mrf.mxu0  ;;  %v7576_v32 = vpop.f32.mrf.mxu1 }
 0x169   : > { %6210 = vpow2.f32 %v5464_v20  ;;  %v5465_v22 = vmul.f32 -1.442695, %v7556_v21 }
 0x16a   : > { %v7559_v24 = vpop.f32.mrf.mxu0 }
 0x16b   : > { %6212 = vpow2.f32 %v5465_v22  ;;  %v5466_v31 = vmul.f32 -1.442695, %v7559_v24 }
 0x16c   : > { %v7563_v25 = vpop.f32.mrf.mxu0 }
 0x16d   : > { %10160 = vst [vmem:[#allocation22_spill] sm:$0xff] %v7563_v25  ;;  %6214 = vpow2.f32 %v5466_v31 }
 0x16e   : > { %v7565_v44 = vpop.f32.mrf.mxu0  ;;  %5848 = vmatmul.mubr.bf16.gmra.mxu0 %v7444_v10  ;;  %v7580_v10 = vpop.f32.mrf.mxu1 }
 0x16f   : > { %v5468_v58 = vmul.f32 -1.442695, %v7565_v44  ;;  %5851 = vmatprep.mubr.bf16.mxu0 %v7456_v23 }
 0x170   : > { %v7570_v26 = vpop.f32.mrf.mxu0  ;;  %v7586_v39 = vpop.f32.mrf.mxu1 }
 0x171   : > { %6216 = vpow2.f32 %v5468_v58  ;;  %v5469_v27 = vmul.f32 -1.442695, %v7570_v26 }
 0x172   : > { %v7573_v29 = vpop.f32.mrf.mxu0  ;;  %v7592_v45 = vpop.f32.mrf.mxu1 }
 0x173   : > { %6218 = vpow2.f32 %v5469_v27  ;;  %v5470_v30 = vmul.f32 -1.442695, %v7573_v29  ;;  %10162 = vst [vmem:[#allocation24_spill] sm:$0xff] %v7592_v45 }
 0x174   : > { %v7578_v33 = vpop.f32.mrf.mxu0  ;;  %v7597_v49 = vpop.f32.mrf.mxu1 }
 0x175   : > { %10161 = vst [vmem:[#allocation23_spill] sm:$0xff] %v7578_v33  ;;  %6220 = vpow2.f32 %v5470_v30 }
 0x176   : > { %v6211_v34 = vpop.eup %6210  ;;  %v7582_v36 = vpop.f32.mrf.mxu0  ;;  %5852 = vmatmul.mubr.bf16.gmra.mxu0 %v7463_v28 }
 0x177   : > { %v3110_v23 = vadd.f32 1.0, %v6211_v34  ;;  %v5472_v37 = vmul.f32 -1.442695, %v7582_v36  ;;  %5855 = vmatprep.mubr.bf16.mxu0 %v7471_v35  ;;  %v7601_v50 = vpop.f32.mrf.mxu1 }
 0x178   : > { %v6213_v40 = vpop.eup %6212  ;;  %v7589_v41 = vpop.f32.mrf.mxu0 }
 0x179   : > { %6222 = vrcp.f32 %v3110_v23  ;;  %v3111_v42 = vadd.f32 1.0, %v6213_v40  ;;  %v5473_v43 = vmul.f32 -1.442695, %v7589_v41  ;;  %v7607_v55 = vpop.f32.mrf.mxu1 }
 0x17a   : > { %v6215_v46 = vpop.eup %6214  ;;  %6224 = vpow2.f32 %v5472_v37  ;;  %v7594_v47 = vpop.f32.mrf.mxu0 }
 0x17b   : > { %6226 = vrcp.f32 %v3111_v42  ;;  %v3112_v28 = vadd.f32 1.0, %v6215_v46  ;;  %v5474_v48 = vmul.f32 -1.442695, %v7594_v47  ;;  %v7612_v61 = vpop.f32.mrf.mxu1 }
 0x17c   : > { %6228 = vpow2.f32 %v5473_v43  ;;  %v7599_v35 = vpop.f32.mrf.mxu0  ;;  %10164 = vst [vmem:[#allocation26_spill] sm:$0xff] %v7612_v61 }
 0x17d   : > { %10163 = vst [vmem:[#allocation25_spill] sm:$0xff] %v7599_v35  ;;  %6230 = vrcp.f32 %v3112_v28  ;;  %v7617_v1 = vpop.f32.mrf.mxu1 }
 0x17e   : > { %v6217_v51 = vpop.eup %6216  ;;  %6232 = vpow2.f32 %v5474_v48  ;;  %v7603_v52 = vpop.f32.mrf.mxu0  ;;  %5856 = vmatmul.mubr.bf16.gmra.mxu0 %v7479_v38 }
 0x17f   : > { %v3114_v53 = vadd.f32 1.0, %v6217_v51  ;;  %v5476_v54 = vmul.f32 -1.442695, %v7603_v52  ;;  %v7621_v4 = vpop.f32.mrf.mxu1 }
 0x180   : > { %v6219_v56 = vpop.eup %6218  ;;  %v7609_v57 = vpop.f32.mrf.mxu0 }
 0x181   : > { %6234 = vrcp.f32 %v3114_v53  ;;  %v3115_v59 = vadd.f32 1.0, %v6219_v56  ;;  %v5477_v60 = vmul.f32 -1.442695, %v7609_v57  ;;  %v7627_v11 = vpop.f32.mrf.mxu1 }
 0x182   : > { %v6221_v62 = vpop.eup %6220  ;;  %6236 = vpow2.f32 %v5476_v54  ;;  %v7614_v63 = vpop.f32.mrf.mxu0 }
 0x183   : > { %6238 = vrcp.f32 %v3115_v59  ;;  %v3116_v38 = vadd.f32 1.0, %v6221_v62  ;;  %v5478_v0 = vmul.f32 -1.442695, %v7614_v63  ;;  %v7636_v20 = vpop.f32.mrf.mxu1 }
 0x184   : > { %6240 = vpow2.f32 %v5477_v60  ;;  %v7619_v3 = vpop.f32.mrf.mxu0  ;;  %10167 = vst [vmem:[#allocation29_spill] sm:$0xff] %v7636_v20 }
 0x185   : > { %10165 = vst [vmem:[#allocation27_spill] sm:$0xff] %v7619_v3  ;;  %6242 = vrcp.f32 %v3116_v38  ;;  %v7645_v34 = vpop.f32.mrf.mxu1 }
 0x186   : > { %v6223_v5 = vpop.eup %6222  ;;  %6244 = vpow2.f32 %v5478_v0  ;;  %v7623_v6 = vpop.f32.mrf.mxu0 }
 0x187   : > { %v6225_v7 = vpop.eup %6224  ;;  %v3206_v8 = vmul.f32 %v6223_v5, %v7551_v19  ;;  %v5480_v9 = vmul.f32 -1.442695, %v7623_v6  ;;  %v7652_v40 = vpop.f32.mrf.mxu1 }
 0x188   : > { %v6227_v12 = vpop.eup %6226  ;;  %v3118_v13 = vadd.f32 1.0, %v6225_v7  ;;  %v7629_v14 = vpop.f32.mrf.mxu0 }
 0x189   : > { %v6229_v15 = vpop.eup %6228  ;;  %v3207_v16 = vmul.f32 %v6227_v12, %v7556_v21  ;;  %6246 = vpow2.f32 %v5480_v9  ;;  %v5481_v17 = vmul.f32 -1.442695, %v7629_v14  ;;  %v7634_v18 = vmul.f32 %v3206_v8, %v7576_v32  ;;  %v7658_v28 = vpop.f32.mrf.mxu1 }
 0x18a   : > { %v6231_v19 = vpop.eup %6230  ;;  %6248 = vrcp.f32 %v3118_v13  ;;  %v3119_v22 = vadd.f32 1.0, %v6229_v15  ;;  %v7638_v31 = vpop.f32.mrf.mxu0 }
 0x18b   : > { %10166 = vst [vmem:[#allocation28_spill] sm:$0xff] %v7634_v18  ;;  %v6233_v58 = vpop.eup %6232  ;;  %v3208_v27 = vmul.f32 %v6231_v19, %v7559_v24  ;;  %6250 = vpow2.f32 %v5481_v17  ;;  %v5482_v30 = vmul.f32 -1.442695, %v7638_v31  ;;  %v7643_v21 = vmul.f32 %v3207_v16, %v7580_v10  ;;  %v7667_v60 = vpop.f32.mrf.mxu1 }
 0x18c   : > { %6252 = vrcp.f32 %v3119_v22  ;;  %v3120_v32 = vadd.f32 1.0, %v6233_v58  ;;  %v7647_v23 = vpop.f32.mrf.mxu0  ;;  %10172 = vst [vmem:[#allocation34_spill] sm:$0xff] %v7667_v60 }
 0x18d   : > { %10168 = vst [vmem:[#allocation30_spill] sm:$0xff] %v7643_v21  ;;  %10169 = vst [vmem:[#allocation31_spill] sm:$0xff] %v7647_v23  ;;  %6254 = vpow2.f32 %v5482_v30  ;;  %v7650_v37 = vmul.f32 %v3208_v27, %v7586_v39  ;;  %v7676_v8 = vpop.f32.mrf.mxu1 }
 0x18e   : > { %v6235_v42 = vpop.eup %6234  ;;  %6256 = vrcp.f32 %v3120_v32  ;;  %v7654_v24 = vpop.f32.mrf.mxu0 }
 0x18f   : > { %10170 = vst [vmem:[#allocation32_spill] sm:$0xff] %v7650_v37  ;;  %v6237_v43 = vpop.eup %6236  ;;  %v3210_v10 = vmul.f32 %v6235_v42, %v7565_v44  ;;  %v5484_v46 = vmul.f32 -1.442695, %v7654_v24  ;;  %v7683_v13 = vpop.f32.mrf.mxu1 }
 0x190   : > { %v6239_v48 = vpop.eup %6238  ;;  %v3122_v51 = vadd.f32 1.0, %v6237_v43  ;;  %v7660_v53 = vpop.f32.mrf.mxu0 }
 0x191   : > { %v6241_v54 = vpop.eup %6240  ;;  %v3211_v39 = vmul.f32 %v6239_v48, %v7570_v26  ;;  %6258 = vpow2.f32 %v5484_v46  ;;  %v5485_v56 = vmul.f32 -1.442695, %v7660_v53  ;;  %v7665_v59 = vmul.f32 %v3210_v10, %v7597_v49  ;;  %v7688_v19 = vpop.f32.mrf.mxu1 }
 0x192   : > { %v6243_v44 = vpop.eup %6242  ;;  %6260 = vrcp.f32 %v3122_v51  ;;  %v3123_v62 = vadd.f32 1.0, %v6241_v54  ;;  %v7669_v38 = vpop.f32.mrf.mxu0 }
 0x193   : > { %10171 = vst [vmem:[#allocation33_spill] sm:$0xff] %v7665_v59  ;;  %v6245_v0 = vpop.eup %6244  ;;  %v3212_v5 = vmul.f32 %v6243_v44, %v7573_v29  ;;  %6262 = vpow2.f32 %v5485_v56  ;;  %v5486_v7 = vmul.f32 -1.442695, %v7669_v38  ;;  %v7674_v26 = vmul.f32 %v3211_v39, %v7601_v50  ;;  %v7694_v42 = vpop.f32.mrf.mxu1 }
 0x194   : > { %6264 = vrcp.f32 %v3123_v62  ;;  %v3124_v49 = vadd.f32 1.0, %v6245_v0  ;;  %v7678_v9 = vpop.f32.mrf.mxu0  ;;  %10176 = vst [vmem:[#allocation38_spill] sm:$0xff] %v7694_v42 }
 0x195   : > { %10173 = vst [vmem:[#allocation35_spill] sm:$0xff] %v7674_v26  ;;  %10174 = vst [vmem:[#allocation36_spill] sm:$0xff] %v7678_v9  ;;  %6266 = vpow2.f32 %v5486_v7  ;;  %v7681_v12 = vmul.f32 %v3212_v5, %v7607_v55  ;;  %v7703_v39 = vpop.f32.mrf.mxu1 }
 0x196   : > { %v6247_v15 = vpop.eup %6246  ;;  %6268 = vrcp.f32 %v3124_v49  ;;  %v7685_v29 = vpop.f32.mrf.mxu0 }
 0x197   : > { %10175 = vst [vmem:[#allocation37_spill] sm:$0xff] %v7681_v12  ;;  %v6249_v16 = vpop.eup %6248  ;;  %v3126_v17 = vadd.f32 1.0, %v6247_v15  ;;  %v5488_v50 = vmul.f32 -1.442695, %v7685_v29 }
 0x198   : > { %v6251_v22 = vpop.eup %6250  ;;  %v3214_v58 = vmul.f32 %v6249_v16, %v7582_v36  ;;  %v7691_v27 = vpop.f32.mrf.mxu0 }
 0x199   : > { %v6253_v30 = vpop.eup %6252  ;;  %6270 = vrcp.f32 %v3126_v17  ;;  %v3127_v55 = vadd.f32 1.0, %v6251_v22  ;;  %v5489_v32 = vmul.f32 -1.442695, %v7691_v27 }
 0x19a   : > { %v6255_v43 = vpop.eup %6254  ;;  %v3215_v10 = vmul.f32 %v6253_v30, %v7589_v41  ;;  %6272 = vpow2.f32 %v5488_v50  ;;  %v7698_v46 = vmul.f32 %v3214_v58, %v7617_v1  ;;  %v7700_v48 = vpop.f32.mrf.mxu0 }
 0x19b   : > { %v6257_v51 = vpop.eup %6256  ;;  %6274 = vrcp.f32 %v3127_v55  ;;  %v3128_v36 = vadd.f32 1.0, %v6255_v43  ;;  %v5490_v54 = vmul.f32 -1.442695, %v7700_v48  ;;  %v7711_v1 = vpop.f32.mrf.mxu1 }
 0x19c   : > { %10177 = vst [vmem:[#allocation39_spill] sm:$0xff] %v7698_v46  ;;  %v3216_v56 = vmul.f32 %v6257_v51, %v7594_v47  ;;  %6276 = vpow2.f32 %v5489_v32  ;;  %v7707_v44 = vmul.f32 %v3215_v10, %v7621_v4  ;;  %v7709_v41 = vpop.f32.mrf.mxu0 }
 0x19d   : > { %10179 = vst [vmem:[#allocation41_spill] sm:$0xff] %v7709_v41  ;;  %6278 = vrcp.f32 %v3128_v36  ;;  %v7719_v15 = vpop.f32.mrf.mxu1 }
 0x19e   : > { %10178 = vst [vmem:[#allocation40_spill] sm:$0xff] %v7707_v44  ;;  %v6259_v62 = vpop.eup %6258  ;;  %6280 = vpow2.f32 %v5490_v54  ;;  %v7714_v0 = vmul.f32 %v3216_v56, %v7627_v11  ;;  %v7716_v5 = vpop.f32.mrf.mxu0 }
 0x19f   : > { %v6261_v7 = vpop.eup %6260  ;;  %v3130_v49 = vadd.f32 1.0, %v6259_v62  ;;  %v5492_v47 = vmul.f32 -1.442695, %v7716_v5  ;;  %v7725_v11 = vpop.f32.mrf.mxu1 }
 0x1a0   : > { %10180 = vst [vmem:[#allocation42_spill] sm:$0xff] %v7714_v0  ;;  %v6263_v4 = vpop.eup %6262  ;;  %v3218_v16 = vmul.f32 %v6261_v7, %v7603_v52  ;;  %v7722_v17 = vpop.f32.mrf.mxu0  ;;  %10181 = vst [vmem:[#allocation43_spill] sm:$0xff] %v7725_v11 }
 0x1a1   : > { %v6265_v50 = vpop.eup %6264  ;;  %6282 = vrcp.f32 %v3130_v49  ;;  %v3131_v22 = vadd.f32 1.0, %v6263_v4  ;;  %v5493_v58 = vmul.f32 -1.442695, %v7722_v17  ;;  %v7734_v36 = vpop.f32.mrf.mxu1 }
 0x1a2   : > { %v6267_v30 = vpop.eup %6266  ;;  %v3219_v55 = vmul.f32 %v6265_v50, %v7609_v57  ;;  %6284 = vpow2.f32 %v5492_v47  ;;  %v7729_v32 = vmul.f32 %v3218_v16, %v7645_v34  ;;  %v7731_v43 = vpop.f32.mrf.mxu0 }
 0x1a3   : > { %v6269_v10 = vpop.eup %6268  ;;  %6286 = vrcp.f32 %v3131_v22  ;;  %v3132_v52 = vadd.f32 1.0, %v6267_v30  ;;  %v5494_v51 = vmul.f32 -1.442695, %v7731_v43  ;;  %v7742_v34 = vpop.xlane.xlu1 %2720 }
 0x1a4   : > { %10182 = vst [vmem:[#allocation44_spill] sm:$0xff] %v7729_v32  ;;  %v3220_v54 = vmul.f32 %v6269_v10, %v7614_v63  ;;  %6288 = vpow2.f32 %v5493_v58  ;;  %v7738_v56 = vmul.f32 %v3219_v55, %v7652_v40  ;;  %v7740_v57 = vpop.f32.mrf.mxu0  ;;  %v7744_v62 = vpop.f32.mrf.mxu1  ;;  %vm2779_vm6 = vcmp.eq.f32.partialorder %v7742_v34, inf }
 0x1a5   : > { %10184 = vst [vmem:[#allocation46_spill] sm:$0xff] %v7740_v57  ;;  %6290 = vrcp.f32 %v3132_v52  ;;  %v7752_v16 = vpop.xlane.xlu0 %2718  ;;  %vm2781_vm7 = vcmp.eq.f32.partialorder %v7742_v34, 0.0 }
 0x1a6   : > { %10183 = vst [vmem:[#allocation45_spill] sm:$0xff] %v7738_v56  ;;  %v6271_v7 = vpop.eup %6270  ;;  %6292 = vpow2.f32 %v5494_v51  ;;  %v7747_v49 = vmul.f32 %v3220_v54, %v7658_v28  ;;  %v7749_v47 = vpop.f32.mrf.mxu0  ;;  %vm2772_vm4 = vcmp.eq.f32.partialorder %v7752_v16, inf  ;;  %vm2774_vm5 = vcmp.eq.f32.partialorder %v7752_v16, 0.0 }
 0x1a7   : > { %v6273_v4 = vpop.eup %6272  ;;  %v3222_v63 = vmul.f32 %v6271_v7, %v7623_v6  ;;  %v7754_v40 = vpop.f32.mrf.mxu1 }
 0x1a8   : > { %10185 = vst [vmem:[#allocation47_spill] sm:$0xff] %v7747_v49  ;;  %v6275_v50 = vpop.eup %6274  ;;  %v3134_v22 = vadd.f32 1.0, %v6273_v4  ;;  %v7756_v58 = vpop.f32.mrf.mxu0 }
 0x1a9   : > { %v6277_v30 = vpop.eup %6276  ;;  %v3223_v55 = vmul.f32 %v6275_v50, %v7629_v14  ;;  %v7760_v10 = vmul.f32 %v3222_v63, %v7676_v8  ;;  %v7762_v28 = vpop.f32.mrf.mxu1 }
 0x1aa   : > { %10187 = vst [vmem:[#allocation49_spill] sm:$0xff] %v7762_v28  ;;  %v6279_v52 = vpop.eup %6278  ;;  %6294 = vrcp.f32 %v3134_v22  ;;  %v3135_v51 = vadd.f32 1.0, %v6277_v30  ;;  %v7764_v6 = vpop.f32.mrf.mxu0 }
 0x1ab   : > { %10186 = vst [vmem:[#allocation48_spill] sm:$0xff] %v7760_v10  ;;  %10188 = vst [vmem:[#allocation50_spill] sm:$0xff] %v7764_v6  ;;  %v6281_v54 = vpop.eup %6280  ;;  %v3224_v7 = vmul.f32 %v6279_v52, %v7638_v31  ;;  %v7768_v4 = vmul.f32 %v3223_v55, %v7683_v13  ;;  %v7770_v2 = vpop.xlane.xlu1 %2724 }
 0x1ac   : > { %v7772_v11 = vpop.f32.mrf.mxu1  ;;  %6296 = vrcp.f32 %v3135_v51  ;;  %v3136_v14 = vadd.f32 1.0, %v6281_v54  ;;  %v7774_v8 = vpop.f32.mrf.mxu0  ;;  %vm2793_vm9 = vcmp.eq.f32.partialorder %v7770_v2, inf  ;;  %vm2795_vm11 = vcmp.eq.f32.partialorder %v7770_v2, 0.0 }
 0x1ad   : > { %10189 = vst [vmem:[#allocation51_spill] sm:$0xff] %v7768_v4  ;;  %10190 = vst [vmem:[#allocation52_spill] sm:$0xff] %v7774_v8  ;;  %v7777_v63 = vmul.f32 %v3224_v7, %v7688_v19  ;;  %v7779_v50 = vpop.xlane.xlu0 %2722 }
 0x1ae   : > { %v7781_v22 = vpop.f32.mrf.mxu1  ;;  %v6283_v30 = vpop.eup %6282  ;;  %6298 = vrcp.f32 %v3136_v14  ;;  %vm2786_vm8 = vcmp.eq.f32.partialorder %v7779_v50, inf  ;;  %vm2788_vm10 = vcmp.eq.f32.partialorder %v7779_v50, 0.0 }
 0x1af   : > { %10191 = vst [vmem:[#allocation53_spill] sm:$0xff] %v7777_v63  ;;  %v7783_v31 = vpop.f32.mrf.mxu0  ;;  %v6285_v13 = vpop.eup %6284  ;;  %v3226_v55 = vmul.f32 %v6283_v30, %v7654_v24 }
 0x1b0   : > { %v7786_v52 = vpop.f32.mrf.mxu1  ;;  %v6287_v51 = vpop.eup %6286  ;;  %v3138_v54 = vadd.f32 1.0, %v6285_v13 }
 0x1b1   : > { %v7788_v28 = vpop.f32.mrf.mxu0  ;;  %v6289_v4 = vpop.eup %6288  ;;  %v3227_v19 = vmul.f32 %v6287_v51, %v7660_v53  ;;  %v7792_v7 = vmul.f32 %v3226_v55, %v7703_v39 }
 0x1b2   : > { %10192 = vst [vmem:[#allocation54_spill] sm:$0xff] %v7788_v28  ;;  %v7794_v63 = vpop.xlane.xlu1 %2726  ;;  %v7796_v14 = vpop.f32.mrf.mxu1  ;;  %6300 = vrcp.f32 %v3138_v54  ;;  %v3139_v42 = vadd.f32 1.0, %v6289_v4 }
 0x1b3   : > { %10193 = vst [vmem:[#allocation55_spill] sm:$0xff] %v7792_v7  ;;  %10194 = vst [vmem:[#allocation56_spill] sm:$0xff] %v7796_v14  ;;  %v6291_v10 = vpop.eup %6290  ;;  %v7798_v24 = vpop.f32.mrf.mxu0  ;;  %v7802_v49 = vmul.f32 %v3227_v19, %v7711_v1  ;;  %vm2800_vm12 = vcmp.eq.f32.partialorder %v7794_v63, inf  ;;  %vm2802_vm14 = vcmp.eq.f32.partialorder %v7794_v63, 0.0 }
 0x1b4   : > { %v6293_v30 = vpop.eup %6292  ;;  %v3228_v13 = vmul.f32 %v6291_v10, %v7669_v38  ;;  %v7804_v56 = vpop.xlane.xlu0 %2728  ;;  %6302 = vrcp.f32 %v3139_v42 }
 0x1b5   : > { %10195 = vst [vmem:[#allocation57_spill] sm:$0xff] %v7802_v49  ;;  %v7806_v53 = vpop.f32.mrf.mxu1  ;;  %v3140_v39 = vadd.f32 1.0, %v6293_v30  ;;  %v7808_v55 = vpop.f32.mrf.mxu0  ;;  %vm2807_vm13 = vcmp.eq.f32.partialorder %v7804_v56, inf  ;;  %vm2809_vm15 = vcmp.eq.f32.partialorder %v7804_v56, 0.0 }
 0x1b6   : > { %10196 = vst [vmem:[#allocation58_spill] sm:$0xff] %v7806_v53  ;;  %10197 = vst [vmem:[#allocation59_spill] sm:$0xff] %v7808_v55  ;;  %v7811_v51 = vmul.f32 %v3228_v13, %v7719_v15  ;;  %v7817_v10 = vpop.xlane.xlu1 %2730 }
 0x1b7   : > { %v7813_v4 = vpop.f32.mrf.mxu1  ;;  %6304 = vrcp.f32 %v3140_v39  ;;  %v7815_v54 = vpop.f32.mrf.mxu0 }
 0x1b8   : > { %10198 = vst [vmem:[#allocation60_spill] sm:$0xff] %v7811_v51  ;;  %10199 = vst [vmem:[#allocation61_spill] sm:$0xff] %v7813_v4  ;;  %v6295_v38 = vpop.eup %6294  ;;  %v7824_v30 = vpop.xlane.xlu0 %2732 }
 0x1b9   : > { %10200 = vst [vmem:[#allocation62_spill] sm:$0xff] %v7815_v54  ;;  %v7819_v1 = vpop.f32.mrf.mxu1  ;;  %v3230_v19 = vmul.f32 %v6295_v38, %v7685_v29  ;;  %v7822_v14 = vpop.f32.mrf.mxu0 }
 0x1ba   : > { %10201 = vst [vmem:[#allocation63_spill] sm:$0xff] %v7819_v1  ;;  %10202 = vst [vmem:[#allocation64_spill] sm:$0xff] %v7822_v14  ;;  %v6297_v42 = vpop.eup %6296  ;;  %v2711_v60 = vpop.xlane.xlu1 %2710 }
 0x1bb   : > { %v7826_v49 = vpop.f32.mrf.mxu1  ;;  %v3231_v15 = vmul.f32 %v6297_v42, %v7691_v27  ;;  %v7830_v13 = vmul.f32 %v3230_v19, %v7734_v36  ;;  %v7832_v39 = vpop.f32.mrf.mxu0  ;;  %6306 = vrsqrt.f32 %v2711_v60  ;;  %vm2744_vm0 = vcmp.eq.f32.partialorder %v2711_v60, inf }
 0x1bc   : > { %10203 = vst [vmem:[#allocation65_spill] sm:$0xff] %v7826_v49  ;;  %10205 = vst [vmem:[#allocation67_spill] sm:$0xff] %v7832_v39  ;;  %v6299_v7 = vpop.eup %6298  ;;  %v2713_v42 = vpop.xlane.xlu0 %2712  ;;  %v2747_v18 = vand.u32 2147483648, %v2711_v60  ;;  %vm2746_vm2 = vcmp.eq.f32.partialorder %v2711_v60, 0.0 }
 0x1bd   : > { %10204 = vst [vmem:[#allocation66_spill] sm:$0xff] %v7830_v13  ;;  %v7834_v51 = vpop.f32.mrf.mxu1  ;;  %v3232_v32 = vmul.f32 %v6299_v7, %v7700_v48  ;;  %v7838_v29 = vmul.f32 %v3231_v15, %v7744_v62  ;;  %v7840_v38 = vpop.f32.mrf.mxu0  ;;  %6308 = vrsqrt.f32 %v2713_v42  ;;  %vm2751_vm1 = vcmp.eq.f32.partialorder %v2713_v42, inf }
 0x1be   : > { %10206 = vst [vmem:[#allocation68_spill] sm:$0xff] %v7834_v51  ;;  %10208 = vst [vmem:[#allocation70_spill] sm:$0xff] %v7840_v38  ;;  %6310 = vrsqrt.f32 %v7752_v16  ;;  %vm2753_vm3 = vcmp.eq.f32.partialorder %v2713_v42, 0.0 }
 0x1bf   : > { %10207 = vst [vmem:[#allocation69_spill] sm:$0xff] %v7838_v29  ;;  %v7842_v44 = vpop.f32.mrf.mxu1  ;;  %v7845_v27 = vmul.f32 %v3232_v32, %v7754_v40  ;;  %v7847_v36 = vpop.f32.mrf.mxu0  ;;  %6312 = vrsqrt.f32 %v7742_v34 }
 0x1c0   : > { %10209 = vst [vmem:[#allocation71_spill] sm:$0xff] %v7842_v44  ;;  %10211 = vst [vmem:[#allocation73_spill] sm:$0xff] %v7847_v36  ;;  %v6301_v19 = vpop.eup %6300  ;;  %6314 = vrsqrt.f32 %v7779_v50  ;;  %v8049_v41 = vpop.xlane.xlu0 %2734 }
 0x1c1   : > { %10210 = vst [vmem:[#allocation72_spill] sm:$0xff] %v7845_v27  ;;  %v7849_v13 = vpop.f32.mrf.mxu1  ;;  %v3234_v46 = vmul.f32 %v6301_v19, %v7716_v5  ;;  %v7852_v48 = vpop.f32.mrf.mxu0  ;;  %6316 = vrsqrt.f32 %v7770_v2 }
 0x1c2   : > { %10212 = vst [vmem:[#allocation74_spill] sm:$0xff] %v7849_v13  ;;  %10213 = vst [vmem:[#allocation75_spill] sm:$0xff] %v7852_v48  ;;  %v6303_v62 = vpop.eup %6302  ;;  %6318 = vrsqrt.f32 %v7794_v63 }
 0x1c3   : > { %v7854_v7 = vpop.f32.mrf.mxu1  ;;  %v3235_v15 = vmul.f32 %v6303_v62, %v7722_v17  ;;  %v7858_v29 = vmul.f32 %v3234_v46, %v7772_v11  ;;  %v7860_v32 = vpop.f32.mrf.mxu0 }
 0x1c4   : > { %10214 = vst [vmem:[#allocation76_spill] sm:$0xff] %v7854_v7  ;;  %10216 = vst [vmem:[#allocation78_spill] sm:$0xff] %v7860_v32  ;;  %v6305_v40 = vpop.eup %6304  ;;  %v2831_v32 = vand.u32 2147483648, %v8049_v41 }
 0x1c5   : > { %10215 = vst [vmem:[#allocation77_spill] sm:$0xff] %v7858_v29  ;;  %v7862_v27 = vpop.f32.mrf.mxu1  ;;  %v3236_v0 = vmul.f32 %v6305_v40, %v7731_v43  ;;  %v7866_v5 = vmul.f32 %v3235_v15, %v7781_v22  ;;  %v7868_v19 = vpop.f32.mrf.mxu0 }
 0x1c6   : > { %10217 = vst [vmem:[#allocation79_spill] sm:$0xff] %v7862_v27  ;;  %10219 = vst [vmem:[#allocation81_spill] sm:$0xff] %v7868_v19 }
 0x1c7   : > { %10218 = vst [vmem:[#allocation80_spill] sm:$0xff] %v7866_v5  ;;  %v7870_v20 = vpop.f32.mrf.mxu1  ;;  %v7873_v17 = vmul.f32 %v3236_v0, %v7786_v52  ;;  %v7875_v46 = vpop.f32.mrf.mxu0 }
 0x1c8   : > { %10220 = vst [vmem:[#allocation82_spill] sm:$0xff] %v7870_v20  ;;  %10222 = vst [vmem:[#allocation84_spill] sm:$0xff] %v7875_v46  ;;  %v6307_v40 = vpop.eup %6306 }
 0x1c9   : > { %10221 = vst [vmem:[#allocation83_spill] sm:$0xff] %v7873_v17  ;;  %v7877_v11 = vpop.f32.mrf.mxu1  ;;  %v7880_v62 = vpop.f32.mrf.mxu0  ;;  %v2743_v12 = vmul.f32 %v6307_v40, %v2711_v60  ;;  %v2754_v40 = vand.u32 2147483648, %v2713_v42 }
 0x1ca   : > { %10223 = vst [vmem:[#allocation85_spill] sm:$0xff] %v7877_v11  ;;  %10224 = vst [vmem:[#allocation86_spill] sm:$0xff] %v7880_v62  ;;  %v6309_v5 = vpop.eup %6308 }
 0x1cb   : > { %v7882_v29 = vpop.f32.mrf.mxu1  ;;  %v7884_v43 = vpop.f32.mrf.mxu0  ;;  %v2750_v61 = vmul.f32 %v6309_v5, %v2713_v42 }
 0x1cc   : > { %10225 = vst [vmem:[#allocation87_spill] sm:$0xff] %v7882_v29  ;;  %10226 = vst [vmem:[#allocation88_spill] sm:$0xff] %v7884_v43  ;;  %v2745_v29 = vsel %vm2744_vm0, %v2711_v60, %v2743_v12  ;;  %vm2814_vm0 = vcmp.eq.f32.partialorder %v7817_v10, inf }
 0x1cd   : > { %v7886_v22 = vpop.f32.mrf.mxu1  ;;  %v7888_v15 = vpop.f32.mrf.mxu0  ;;  %v2752_v11 = vsel %vm2751_vm1, %v2713_v42, %v2750_v61  ;;  %v7913_v5 = vsel %vm2746_vm2, %v2747_v18, %v2745_v29  ;;  %v2775_v18 = vand.u32 2147483648, %v7752_v16  ;;  %vm2816_vm1 = vcmp.eq.f32.partialorder %v7817_v10, 0.0 }
 0x1ce   : > { %10227 = vst [vmem:[#allocation89_spill] sm:$0xff] %v7886_v22  ;;  %10228 = vst [vmem:[#allocation90_spill] sm:$0xff] %v7888_v15  ;;  %v7921_v60 = vsel %vm2753_vm3, %v2754_v40, %v2752_v11  ;;  %v2854_v42 = vmax.f32 %v7913_v5, 1e-12  ;;  %vm2821_vm2 = vcmp.eq.f32.partialorder %v7824_v30, inf  ;;  %vm2823_vm3 = vcmp.eq.f32.partialorder %v7824_v30, 0.0 }
 0x1cf   : > { %v7891_v0 = vpop.f32.mrf.mxu1  ;;  %v7893_v52 = vpop.f32.mrf.mxu0  ;;  %10239 = vst [vmem:[#allocation101_spill] sm:$0xff] %v7913_v5  ;;  %10242 = vst [vmem:[#allocation104_spill] sm:$0xff] %v7921_v60 }
 0x1d0   : > { %10229 = vst [vmem:[#allocation91_spill] sm:$0xff] %v7891_v0  ;;  %10230 = vst [vmem:[#allocation92_spill] sm:$0xff] %v7893_v52  ;;  %6320 = vrcp.f32 %v2854_v42 }
 0x1d1   : > { %v7895_v17 = vpop.f32.mrf.mxu1  ;;  %v7897_v26 = vpop.f32.mrf.mxu0  ;;  %6322 = vrsqrt.f32 %v7804_v56 }
 0x1d2   : > { %10231 = vst [vmem:[#allocation93_spill] sm:$0xff] %v7895_v17  ;;  %10232 = vst [vmem:[#allocation94_spill] sm:$0xff] %v7897_v26  ;;  %v6311_v17 = vpop.eup %6310 }
 0x1d3   : > { %v7899_v59 = vpop.f32.mrf.mxu1  ;;  %v7901_v21 = vpop.f32.mrf.mxu0 }
 0x1d4   : > { %10233 = vst [vmem:[#allocation95_spill] sm:$0xff] %v7899_v59  ;;  %10234 = vst [vmem:[#allocation96_spill] sm:$0xff] %v7901_v21  ;;  %v6313_v61 = vpop.eup %6312 }
 0x1d5   : > { %v7903_v37 = vpop.f32.mrf.mxu1  ;;  %v7906_v0 = vpop.f32.mrf.mxu0  ;;  %v2778_v11 = vmul.f32 %v6313_v61, %v7742_v34 }
 0x1d6   : > { %10235 = vst [vmem:[#allocation97_spill] sm:$0xff] %v7903_v37  ;;  %10236 = vst [vmem:[#allocation98_spill] sm:$0xff] %v7906_v0  ;;  %v2771_v37 = vmul.f32 %v6311_v17, %v7752_v16  ;;  %v2855_v17 = vmax.f32 %v7921_v60, 1e-12  ;;  %v6315_v61 = vpop.eup %6314 }
 0x1d7   : > { %v7908_v22 = vpop.f32.mrf.mxu1  ;;  %v7910_v59 = vpop.f32.mrf.mxu0 }
 0x1d8   : > { %10237 = vst [vmem:[#allocation99_spill] sm:$0xff] %v7908_v22  ;;  %10238 = vst [vmem:[#allocation100_spill] sm:$0xff] %v7910_v59  ;;  %6324 = vrcp.f32 %v2855_v17  ;;  %v6317_v45 = vpop.eup %6316  ;;  %v2785_v17 = vmul.f32 %v6315_v61, %v7779_v50 }
 0x1d9   : > { %v7915_v20 = vpop.f32.mrf.mxu1  ;;  %v7918_v12 = vpop.f32.mrf.mxu0  ;;  %6326 = vrsqrt.f32 %v7817_v10 }
 0x1da   : > { %10240 = vst [vmem:[#allocation102_spill] sm:$0xff] %v7915_v20  ;;  %10241 = vst [vmem:[#allocation103_spill] sm:$0xff] %v7918_v12  ;;  %v2773_v20 = vsel %vm2772_vm4, %v7752_v16, %v2771_v37  ;;  %v2782_v16 = vand.u32 2147483648, %v7742_v34  ;;  %vm2828_vm4 = vcmp.eq.f32.partialorder %v8049_v41, inf }
 0x1db   : > { %v7923_v27 = vpop.f32.mrf.mxu1  ;;  %v7926_v22 = vpop.f32.mrf.mxu0 }
 0x1dc   : > { %10243 = vst [vmem:[#allocation105_spill] sm:$0xff] %v7923_v27  ;;  %10244 = vst [vmem:[#allocation106_spill] sm:$0xff] %v7926_v22  ;;  %v2780_v27 = vsel %vm2779_vm6, %v7742_v34, %v2778_v11 }
 0x1dd   : > { %v7929_v29 = vpop.f32.mrf.mxu1  ;;  %v7934_v57 = vpop.f32.mrf.mxu0 }
 0x1de   : > { %10245 = vst [vmem:[#allocation107_spill] sm:$0xff] %v7929_v29  ;;  %10246 = vst [vmem:[#allocation108_spill] sm:$0xff] %v7934_v57  ;;  %v7943_v29 = vsel %vm2774_vm5, %v2775_v18, %v2773_v20  ;;  %vm2830_vm5 = vcmp.eq.f32.partialorder %v8049_v41, 0.0 }
 0x1df   : > { %v7938_v40 = vpop.f32.mrf.mxu1  ;;  %v7941_v5 = vpop.f32.mrf.mxu0  ;;  %10249 = vst [vmem:[#allocation111_spill] sm:$0xff] %v7943_v29  ;;  %v2858_v42 = vmax.f32 %v7943_v29, 1e-12 }
 0x1e0   : > { %10247 = vst [vmem:[#allocation109_spill] sm:$0xff] %v7938_v40  ;;  %10248 = vst [vmem:[#allocation110_spill] sm:$0xff] %v7941_v5 }
 0x1e1   : > { %v7946_v37 = vpop.f32.mrf.mxu1  ;;  %v7949_v60 = vpop.f32.mrf.mxu0  ;;  %6328 = vrcp.f32 %v2858_v42 }
 0x1e2   : > { %10250 = vst [vmem:[#allocation112_spill] sm:$0xff] %v7946_v37  ;;  %10251 = vst [vmem:[#allocation113_spill] sm:$0xff] %v7949_v60  ;;  %v7960_v37 = vsel %vm2781_vm7, %v2782_v16, %v2780_v27  ;;  %6330 = vrsqrt.f32 %v7824_v30  ;;  %v2787_v16 = vsel %vm2786_vm8, %v7779_v50, %v2785_v17  ;;  %v6319_v42 = vpop.eup %6318 }
 0x1e3   : > { %v7953_v40 = vpop.f32.mrf.mxu1  ;;  %v7956_v20 = vpop.f32.mrf.mxu0  ;;  %10255 = vst [vmem:[#allocation117_spill] sm:$0xff] %v7960_v37  ;;  %v2859_v29 = vmax.f32 %v7960_v37, 1e-12  ;;  %v2796_v37 = vand.u32 2147483648, %v7770_v2 }
 0x1e4   : > { %10252 = vst [vmem:[#allocation114_spill] sm:$0xff] %v7953_v40  ;;  %10253 = vst [vmem:[#allocation115_spill] sm:$0xff] %v7956_v20  ;;  %v2792_v40 = vmul.f32 %v6317_v45, %v7770_v2  ;;  %v7981_v45 = vpop.eup %6320 }
 0x1e5   : > { %v7958_v18 = vpop.f32.mrf.mxu1  ;;  %v7963_v5 = vpop.f32.mrf.mxu0  ;;  %6332 = vrcp.f32 %v2859_v29 }
 0x1e6   : > { %10254 = vst [vmem:[#allocation116_spill] sm:$0xff] %v7958_v18  ;;  %10256 = vst [vmem:[#allocation118_spill] sm:$0xff] %v7963_v5  ;;  %v2789_v18 = vand.u32 2147483648, %v7779_v50  ;;  %v2794_v20 = vsel %vm2793_vm9, %v7770_v2, %v2792_v40  ;;  %v6323_v17 = vpop.eup %6322 }
 0x1e7   : > { %v7967_v34 = vpop.f32.mrf.mxu1  ;;  %v1565_v11 = vpop.f32.mrf.mxu0  ;;  %v7994_v12 = vsel %vm2795_vm11, %v2796_v37, %v2794_v20 }
 0x1e8   : > { %10257 = vst [vmem:[#allocation119_spill] sm:$0xff] %v7967_v34  ;;  %v7989_v57 = vpop.eup %6324  ;;  %10263 = vst [vmem:[#allocation125_spill] sm:$0xff] %v7994_v12  ;;  %v7999_v2 = vmul.f32 %v7981_v45, %v1565_v11  ;;  %v2861_v11 = vmax.f32 %v7994_v12, 1e-12 }
 0x1e9   : > { %v7973_v27 = vpop.f32.mrf.mxu1  ;;  %v1567_v61 = vpop.f32.mrf.mxu0 }
 0x1ea   : > { %10258 = vst [vmem:[#allocation120_spill] sm:$0xff] %v7973_v27  ;;  %v7985_v27 = vsel %vm2788_vm10, %v2789_v18, %v2787_v16  ;;  %v2806_v18 = vmul.f32 %v6323_v17, %v7804_v56  ;;  %v8005_v16 = vmul.f32 %v7981_v45, %v1567_v61 }
 0x1eb   : > { %v7978_v34 = vpop.f32.mrf.mxu1  ;;  %v1569_v5 = vpop.f32.mrf.mxu0  ;;  %10260 = vst [vmem:[#allocation122_spill] sm:$0xff] %v7985_v27  ;;  %v2860_v29 = vmax.f32 %v7985_v27, 1e-12 }
 0x1ec   : > { %10259 = vst [vmem:[#allocation121_spill] sm:$0xff] %v7978_v34  ;;  %v2799_v34 = vmul.f32 %v6319_v42, %v7794_v63  ;;  %v2803_v42 = vand.u32 2147483648, %v7794_v63  ;;  %v8012_v37 = vmul.f32 %v7989_v57, %v1569_v5  ;;  %v5560_v5 = vmul.f32 -1.442695, %v7999_v2 }
 0x1ed   : > { %v7987_v60 = vpop.f32.mrf.mxu1  ;;  %v1571_v50 = vpop.f32.mrf.mxu0  ;;  %6334 = vrcp.f32 %v2860_v29  ;;  %v2808_v12 = vsel %vm2807_vm13, %v7804_v56, %v2806_v18 }
 0x1ee   : > { %10261 = vst [vmem:[#allocation123_spill] sm:$0xff] %v7987_v60  ;;  %v2801_v27 = vsel %vm2800_vm12, %v7794_v63, %v2799_v34  ;;  %v8020_v61 = vmul.f32 %v7989_v57, %v1571_v50  ;;  %v5561_v63 = vmul.f32 -1.442695, %v8005_v16  ;;  %v5562_v29 = vmul.f32 -1.442695, %v8012_v37 }
 0x1ef   : > { %v7992_v22 = vpop.f32.mrf.mxu1  ;;  %v8001_v40 = vpop.f32.mrf.mxu0  ;;  %6336 = vrcp.f32 %v2861_v11 }
 0x1f0   : > { %10262 = vst [vmem:[#allocation124_spill] sm:$0xff] %v7992_v22  ;;  %10264 = vst [vmem:[#allocation126_spill] sm:$0xff] %v8001_v40  ;;  %v2810_v22 = vand.u32 2147483648, %v7804_v56  ;;  %v5563_v0 = vmul.f32 -1.442695, %v8020_v61  ;;  %6338 = vpow2.f32 %v5560_v5 }
 0x1f1   : > { %v8007_v60 = vpop.f32.mrf.mxu1  ;;  %v8014_v20 = vpop.f32.mrf.mxu0  ;;  %6340 = vpow2.f32 %v5561_v63 }
 0x1f2   : > { %10265 = vst [vmem:[#allocation127_spill] sm:$0xff] %v8007_v60  ;;  %10266 = vst [vmem:[#allocation128_spill] sm:$0xff] %v8014_v20  ;;  %v6327_v60 = vpop.eup %6326  ;;  %v8045_v56 = vsel %vm2809_vm15, %v2810_v22, %v2808_v12  ;;  %v2817_v22 = vand.u32 2147483648, %v7817_v10  ;;  %6342 = vpow2.f32 %v5562_v29 }
 0x1f3   : > { %v8022_v17 = vpop.f32.mrf.mxu1  ;;  %v8026_v40 = vpop.f32.mrf.mxu0  ;;  %10271 = vst [vmem:[#allocation133_spill] sm:$0xff] %v8045_v56  ;;  %v2863_v63 = vmax.f32 %v8045_v56, 1e-12  ;;  %6344 = vpow2.f32 %v5563_v0 }
 0x1f4   : > { %10267 = vst [vmem:[#allocation129_spill] sm:$0xff] %v8022_v17  ;;  %10268 = vst [vmem:[#allocation130_spill] sm:$0xff] %v8026_v40  ;;  %v8028_v20 = vpop.eup %6328  ;;  %v8035_v17 = vsel %vm2802_vm14, %v2803_v42, %v2801_v27  ;;  %v2813_v40 = vmul.f32 %v6327_v60, %v7817_v10  ;;  %6346 = vrsqrt.f32 %v8049_v41 }
 0x1f5   : > { %v8033_v34 = vpop.f32.mrf.mxu1  ;;  %v6331_v50 = vpop.eup %6330  ;;  %10269 = vst [vmem:[#allocation131_spill] sm:$0xff] %v8035_v17  ;;  %v2862_v27 = vmax.f32 %v8035_v17, 1e-12  ;;  %v2824_v17 = vand.u32 2147483648, %v7824_v30 }
 0x1f6   : > { %v8038_v59 = vpop.f32.mrf.mxu0  ;;  %v2820_v42 = vmul.f32 %v6331_v50, %v7824_v30  ;;  %v2815_v5 = vsel %vm2814_vm0, %v7817_v10, %v2813_v40  ;;  %v8077_v40 = vpop.xlane.xlu1 %2736 }
 0x1f7   : > { %10270 = vst [vmem:[#allocation132_spill] sm:$0xff] %v8038_v59  ;;  %v8042_v21 = vpop.f32.mrf.mxu1  ;;  %v8058_v59 = vpop.eup %6332  ;;  %6348 = vrcp.f32 %v2862_v27  ;;  %v8086_v15 = vsel %vm2816_vm1, %v2817_v22, %v2815_v5  ;;  %vm2835_vm6 = vcmp.eq.f32.partialorder %v8077_v40, inf  ;;  %vm2837_vm7 = vcmp.eq.f32.partialorder %v8077_v40, 0.0 }
 0x1f8   : > { %v1585_v18 = vpop.f32.mrf.mxu0  ;;  %v2822_v52 = vsel %vm2821_vm2, %v7824_v30, %v2820_v42  ;;  %10273 = vst [vmem:[#allocation135_spill] sm:$0xff] %v8086_v15  ;;  %v2864_v5 = vmax.f32 %v8086_v15, 1e-12 }
 0x1f9   : > { %v8052_v11 = vmul.f32 %v8028_v20, %v1585_v18  ;;  %v8054_v60 = vpop.f32.mrf.mxu1 }
 0x1fa   : > { %v1587_v12 = vpop.f32.mrf.mxu0  ;;  %v8098_v22 = vpop.eup %6334 }
 0x1fb   : > { %v5568_v50 = vmul.f32 -1.442695, %v8052_v11  ;;  %v8068_v18 = vpop.f32.mrf.mxu1  ;;  %v8073_v26 = vmul.f32 %v8028_v20, %v1587_v12 }
 0x1fc   : > { %v1589_v29 = vpop.f32.mrf.mxu0 }
 0x1fd   : > { %v8080_v0 = vmul.f32 %v8058_v59, %v1589_v29  ;;  %v8082_v56 = vpop.f32.mrf.mxu1  ;;  %6350 = vpow2.f32 %v5568_v50  ;;  %v5569_v12 = vmul.f32 -1.442695, %v8073_v26  ;;  %v8095_v29 = vsel %vm2823_vm3, %v2824_v17, %v2822_v52  ;;  %v8108_v17 = vpop.eup %6336 }
 0x1fe   : > { %10272 = vst [vmem:[#allocation134_spill] sm:$0xff] %v8082_v56  ;;  %v1591_v27 = vpop.f32.mrf.mxu0  ;;  %6352 = vrcp.f32 %v2863_v63  ;;  %10275 = vst [vmem:[#allocation137_spill] sm:$0xff] %v8095_v29  ;;  %v410_v56 = vstv %s8056_s12  ;;  %v2865_v62 = vmax.f32 %v8095_v29, 1e-12 }
 0x1ff   : > { %v5570_v42 = vmul.f32 -1.442695, %v8080_v0  ;;  %v8091_v30 = vmul.f32 %v8058_v59, %v1591_v27  ;;  %v8093_v43 = vpop.f32.mrf.mxu1  ;;  %6354 = vrsqrt.f32 %v8077_v40 }
 0x200   : > { %10274 = vst [vmem:[#allocation136_spill] sm:$0xff] %v8093_v43  ;;  %v1595_v10 = vpop.f32.mrf.mxu0  ;;  %6356 = vpow2.f32 %v5569_v12  ;;  %v6339_v12 = vpop.eup %6338 }
 0x201   : > { %v5571_v50 = vmul.f32 -1.442695, %v8091_v30  ;;  %v8102_v63 = vpop.f32.mrf.mxu1  ;;  %6358 = vpow2.f32 %v5570_v42  ;;  %v8111_v43 = vmul.f32 %v8098_v22, %v1595_v10  ;;  %v6341_v42 = vpop.eup %6340  ;;  %v4377_v9 = vadd.f32 1.0, %v6339_v12 }
 0x202   : > { %10276 = vst [vmem:[#allocation138_spill] sm:$0xff] %v8102_v63  ;;  %v1597_v27 = vpop.f32.mrf.mxu0 }
 0x203   : > { %6360 = vpow2.f32 %v5571_v50  ;;  %v8106_v52 = vpop.f32.mrf.mxu1  ;;  %v8114_v15 = vmul.f32 %v8098_v22, %v1597_v27  ;;  %v6343_v50 = vpop.eup %6342 }
 0x204   : > { %10277 = vst [vmem:[#allocation139_spill] sm:$0xff] %v8106_v52  ;;  %v1599_v46 = vpop.f32.mrf.mxu0  ;;  %6362 = vrcp.f32 %v410_v56  ;;  %v4378_v52 = vadd.f32 1.0, %v6341_v42  ;;  %v6345_v38 = vpop.eup %6344  ;;  %v4379_v56 = vadd.f32 1.0, %v6343_v50 }
 0x205   : > { %6364 = vrcp.f32 %v2864_v5  ;;  %v8116_v63 = vpop.f32.mrf.mxu1  ;;  %v8119_v23 = vmul.f32 %v8108_v17, %v1599_v46  ;;  %v5572_v5 = vmul.f32 -1.442695, %v8111_v43  ;;  %v6347_v19 = vpop.eup %6346  ;;  %v4380_v12 = vadd.f32 1.0, %v6345_v38 }
 0x206   : > { %v1601_v29 = vpop.f32.mrf.mxu0  ;;  %6366 = vrcp.f32 %v2865_v62  ;;  %v5573_v62 = vmul.f32 -1.442695, %v8114_v15  ;;  %v8129_v46 = vpop.eup %6348 }
 0x207   : > { %v8121_v10 = vpop.f32.mrf.mxu1  ;;  %6368 = vrcp.f32 %v4377_v9  ;;  %v2827_v9 = vmul.f32 %v6347_v19, %v8049_v41  ;;  %v5574_v36 = vmul.f32 -1.442695, %v8119_v23 }
 0x208   : > { %v1605_v27 = vpop.f32.mrf.mxu0  ;;  %6370 = vrcp.f32 %v4378_v52 }
 0x209   : > { %v8127_v42 = vpop.f32.mrf.mxu1  ;;  %6372 = vrcp.f32 %v4379_v56  ;;  %v2829_v39 = vsel %vm2828_vm4, %v8049_v41, %v2827_v9 }
 0x20a   : > { %v1607_v50 = vpop.f32.mrf.mxu0  ;;  %v6351_v48 = vpop.eup %6350  ;;  %6374 = vrcp.f32 %v4380_v12  ;;  %v8141_v19 = vsel %vm2830_vm5, %v2831_v32, %v2829_v39  ;;  %v2838_v12 = vand.u32 2147483648, %v8077_v40  ;;  %v8151_v39 = vmul.f32 %v8108_v17, %v1601_v29 }
 0x20b   : > { %v8134_v52 = vpop.f32.mrf.mxu1  ;;  %v8136_v38 = vpop.eup %6352  ;;  %v4385_v14 = vadd.f32 1.0, %v6351_v48  ;;  %6376 = vpow2.f32 %v5572_v5  ;;  %10278 = vst [vmem:[#allocation140_spill] sm:$0xff] %v8141_v19  ;;  %v2866_v44 = vmax.f32 %v8141_v19, 1e-12 }
 0x20c   : > { %v1609_v56 = vpop.f32.mrf.mxu0  ;;  %v6355_v54 = vpop.eup %6354  ;;  %6378 = vpow2.f32 %v5573_v62 }
 0x20d   : > { %v8145_v3 = vpop.f32.mrf.mxu1  ;;  %v6357_v35 = vpop.eup %6356  ;;  %6380 = vrcp.f32 %v4385_v14  ;;  %v2834_v33 = vmul.f32 %v6355_v54, %v8077_v40  ;;  %v8159_v54 = vmul.f32 %v8129_v46, %v1605_v27  ;;  %v5575_v27 = vmul.f32 -1.442695, %v8151_v39 }
 0x20e   : > { %v1611_v41 = vpop.f32.mrf.mxu0  ;;  %v6359_v48 = vpop.eup %6358  ;;  %v4386_v5 = vadd.f32 1.0, %v6357_v35  ;;  %6382 = vpow2.f32 %v5574_v36  ;;  %v8164_v35 = vmul.f32 %v8129_v46, %v1607_v50 }
 0x20f   : > { %v8153_v32 = vpop.f32.mrf.mxu1  ;;  %6384 = vrcp.f32 %v2866_v44  ;;  %v2836_v9 = vsel %vm2835_vm6, %v8077_v40, %v2834_v33  ;;  %v4387_v14 = vadd.f32 1.0, %v6359_v48  ;;  %v8172_v33 = vmul.f32 %v8136_v38, %v1609_v56 }
 0x210   : > { %v6361_v62 = vpop.eup %6360  ;;  %v1615_v19 = vpop.f32.mrf.mxu0  ;;  %v8161_v1 = vsel %vm2837_vm7, %v2838_v12, %v2836_v9  ;;  %6386 = vrcp.f32 %v4386_v5  ;;  %v8176_v12 = vmul.f32 %v8136_v38, %v1611_v41  ;;  %v5576_v9 = vmul.f32 -1.442695, %v8159_v54 }
 0x211   : > { %v6363_v49 = vpop.eup %6362  ;;  %10279 = vst [vmem:[#allocation141_spill] sm:$0xff] %v8161_v1  ;;  %v8166_v36 = vpop.f32.mrf.mxu1  ;;  %v2867_v44 = vmax.f32 %v8161_v1, 1e-12  ;;  %v4388_v4 = vadd.f32 1.0, %v6361_v62  ;;  %6388 = vrcp.f32 %v4387_v14  ;;  %v5577_v56 = vmul.f32 -1.442695, %v8164_v35 }
 0x212   : > { %v8168_v29 = vpop.eup %6364  ;;  %v1617_v40 = vpop.f32.mrf.mxu0  ;;  %5875 = vpush %v6363_v49  ;;  %v2982_v49 = vmul.f32 %v7981_v45, %v8033_v34  ;;  %v5578_v53 = vmul.f32 -1.442695, %v8172_v33  ;;  %v5579_v13 = vmul.f32 -1.442695, %v8176_v12 }
 0x213   : > { %v8178_v50 = vpop.f32.mrf.mxu1  ;;  %v8180_v48 = vpop.eup %6366  ;;  %6390 = vrcp.f32 %v2867_v44  ;;  %v8187_v14 = vmul.f32 %v8168_v29, %v1615_v19  ;;  %v2984_v44 = vmul.f32 %v7989_v57, %v8054_v60 }
 0x214   : > { %v1619_v5 = vpop.f32.mrf.mxu0  ;;  %v6369_v62 = vpop.eup %6368  ;;  %6392 = vrcp.f32 %v4388_v4  ;;  %v8200_v4 = vmul.f32 %v8168_v29, %v1617_v40 }
 0x215   : > { %v6371_v1 = vpop.eup %6370  ;;  %v4473_v41 = vmul.f32 %v6369_v62, %v7999_v2  ;;  %6394 = vpow2.f32 %v5575_v27  ;;  %v8194_v51 = vpop.f32.mrf.mxu1  ;;  %v2983_v2 = vmul.f32 %v7981_v45, %v8042_v21  ;;  %v5580_v27 = vmul.f32 -1.442695, %v8187_v14 }
 0x216   : > { %v1621_v7 = vpop.f32.mrf.mxu0  ;;  %v6373_v25 = vpop.eup %6372  ;;  %6396 = vpow2.f32 %v5576_v9  ;;  %v8206_v8 = vmul.f32 %v8180_v48, %v1619_v5 }
 0x217   : > { %v6375_v34 = vpop.eup %6374  ;;  %v4475_v19 = vmul.f32 %v6373_v25, %v8012_v37  ;;  %6398 = vpow2.f32 %v5577_v56  ;;  %v8202_v60 = vmul.f32 %v4473_v41, %v2982_v49  ;;  %v8211_v21 = vmul.f32 %v8180_v48, %v1621_v7  ;;  %v8216_v49 = vpop.f32.mrf.mxu1 }
 0x218   : > { %v1625_v62 = vpop.f32.mrf.mxu0  ;;  %v6377_v28 = vpop.eup %6376  ;;  %6400 = vpow2.f32 %v5578_v53  ;;  %v4476_v40 = vmul.f32 %v6375_v34, %v8020_v61  ;;  %v2985_v56 = vmul.f32 %v7989_v57, %v8068_v18  ;;  %v5581_v53 = vmul.f32 -1.442695, %v8200_v4 }
 0x219   : > { %10280 = vst [vmem:[#allocation142_spill] sm:$0xff] %v8202_v60  ;;  %v6379_v55 = vpop.eup %6378  ;;  %v4389_v6 = vadd.f32 1.0, %v6377_v28  ;;  %v8208_v25 = vmul.f32 %v4475_v19, %v2984_v44  ;;  %6402 = vpow2.f32 %v5579_v13  ;;  %v2990_v7 = vmul.f32 %v8028_v20, %v8116_v63 }
 0x21a   : > { %v1627_v45 = vpop.f32.mrf.mxu0  ;;  %v6381_v37 = vpop.eup %6380  ;;  %v4390_v9 = vadd.f32 1.0, %v6379_v55  ;;  %v4474_v55 = vmul.f32 %v6371_v1, %v8005_v16  ;;  %v5582_v57 = vmul.f32 -1.442695, %v8206_v8  ;;  %v8235_v28 = vmul.f32 %v4476_v40, %v2985_v56 }
 0x21b   : > { %10281 = vst [vmem:[#allocation143_spill] sm:$0xff] %v8208_v25  ;;  %v6383_v5 = vpop.eup %6382  ;;  %6404 = vrcp.f32 %v4389_v6  ;;  %v5583_v6 = vmul.f32 -1.442695, %v8211_v21  ;;  %v4481_v19 = vmul.f32 %v6381_v37, %v8052_v11  ;;  %v2992_v1 = vmul.f32 %v8058_v59, %v8127_v42  ;;  %v8239_v16 = vpop.f32.mrf.mxu1 }
 0x21c   : > { %v1629_v41 = vpop.f32.mrf.mxu0  ;;  %v8223_v44 = vpop.eup %6384  ;;  %6406 = vrcp.f32 %v4390_v9  ;;  %v4391_v13 = vadd.f32 1.0, %v6383_v5  ;;  %10282 = vst [vmem:[#allocation144_spill] sm:$0xff] %v8235_v28  ;;  %v8248_v37 = vmul.f32 %v4474_v55, %v2983_v2  ;;  %v2991_v42 = vmul.f32 %v8028_v20, %v8121_v10 }
 0x21d   : > { %6408 = vpow2.f32 %v5580_v27  ;;  %v8229_v61 = vmul.f32 %v8223_v44, %v1625_v62  ;;  %v8232_v18 = vmul.f32 %v8223_v44, %v1627_v45  ;;  %v6387_v63 = vpop.eup %6386  ;;  %v8264_v55 = vpop.f32.mrf.mxu1 }
 0x21e   : > { %v1631_v34 = vpop.f32.mrf.mxu0  ;;  %6410 = vrcp.f32 %v4391_v13  ;;  %v6389_v27 = vpop.eup %6388  ;;  %10284 = vst [vmem:[#allocation146_spill] sm:$0xff] %v8248_v37  ;;  %v4482_v40 = vmul.f32 %v6387_v63, %v8073_v26 }
 0x21f   : > { %6412 = vpow2.f32 %v5581_v53  ;;  %v5584_v62 = vmul.f32 -1.442695, %v8229_v61  ;;  %v5585_v9 = vmul.f32 -1.442695, %v8232_v18  ;;  %v4483_v11 = vmul.f32 %v6389_v27, %v8080_v0 }
 0x220   : > { %v8243_v45 = vpop.f32.mrf.mxu0  ;;  %v8245_v5 = vpop.eup %6390  ;;  %6414 = vpow2.f32 %v5582_v57  ;;  %v2993_v53 = vmul.f32 %v8058_v59, %v8134_v52  ;;  %v8260_v0 = vmul.f32 %v4481_v19, %v2990_v7 }
 0x221   : > { %10283 = vst [vmem:[#allocation145_spill] sm:$0xff] %v8243_v45  ;;  %6416 = vpow2.f32 %v5583_v6  ;;  %v8254_v56 = vmul.f32 %v8245_v5, %v1629_v41  ;;  %v6393_v60 = vpop.eup %6392  ;;  %v8262_v2 = vmul.f32 %v4483_v11, %v2992_v1  ;;  %v8271_v59 = vmul.f32 %v8245_v5, %v1631_v34 }
 0x222   : > { %v8258_v13 = vpop.f32.mrf.mxu0  ;;  %6418 = vpow2.f32 %v5584_v62  ;;  %10286 = vst [vmem:[#allocation148_spill] sm:$0xff] %v8260_v0  ;;  %v6395_v20 = vpop.eup %6394  ;;  %v4484_v10 = vmul.f32 %v6393_v60, %v8091_v30  ;;  %v8277_v1 = vmul.f32 %v4482_v40, %v2991_v42  ;;  %v8286_v60 = vld [vmem:[%s10024_s3] ss:$0 sm:$0xff]  ;;  %v2996_v6 = vmul.f32 %v8108_v17, %v8166_v36 }
 0x223   : > { %10285 = vst [vmem:[#allocation147_spill] sm:$0xff] %v8258_v13  ;;  %10287 = vst [vmem:[#allocation149_spill] sm:$0xff] %v8262_v2  ;;  %6420 = vpow2.f32 %v5585_v9  ;;  %v5586_v41 = vmul.f32 -1.442695, %v8254_v56  ;;  %v6397_v7 = vpop.eup %6396  ;;  %v4392_v57 = vadd.f32 1.0, %v6395_v20  ;;  %v8288_v9 = vpop.f32.mrf.mxu1 }
 0x224   : > { %v8273_v52 = vpop.f32.mrf.mxu0  ;;  %v6399_v63 = vpop.eup %6398  ;;  %v4393_v19 = vadd.f32 1.0, %v6397_v7  ;;  %10289 = vst [vmem:[#allocation151_spill] sm:$0xff] %v8277_v1  ;;  %v8279_v27 = vmul.f32 %v4484_v10, %v2993_v53  ;;  %v5587_v42 = vmul.f32 -1.442695, %v8271_v59 }
 0x225   : > { %10288 = vst [vmem:[#allocation150_spill] sm:$0xff] %v8273_v52  ;;  %6422 = vpow2.f32 %v5586_v41  ;;  %v6401_v34 = vpop.eup %6400  ;;  %v4394_v62 = vadd.f32 1.0, %v6399_v63  ;;  %v2994_v63 = vmul.f32 %v8098_v22, %v8145_v3  ;;  %v8311_v3 = vpop.f32.mrf.mxu1 }
 0x226   : > { %10290 = vst [vmem:[#allocation152_spill] sm:$0xff] %v8279_v27  ;;  %v8281_v30 = vpop.f32.mrf.mxu0  ;;  %6424 = vrcp.f32 %v4392_v57  ;;  %v6403_v11 = vpop.eup %6402  ;;  %v4395_v20 = vadd.f32 1.0, %v6401_v34 }
 0x227   : > { %10291 = vst [vmem:[#allocation153_spill] sm:$0xff] %v8281_v30  ;;  %6426 = vrcp.f32 %v4393_v19  ;;  %v4396_v41 = vadd.f32 1.0, %v6403_v11 }
 0x228   : > { %v5845_v40 = vpop.f32.mrf.mxu0  ;;  %v6405_v10 = vpop.eup %6404  ;;  %6428 = vrcp.f32 %v4394_v62 }
 0x229   : > { %v8294_v7 = vadd.f32 %v5845_v40, %v8286_v60  ;;  %v6407_v57 = vpop.eup %6406  ;;  %6430 = vrcp.f32 %v4395_v20  ;;  %v4485_v26 = vmul.f32 %v6405_v10, %v8111_v43 }
 0x22a   : > { %v1791_v19 = vpop.f32.mrf.mxu0  ;;  %v6409_v34 = vpop.eup %6408  ;;  %6432 = vrcp.f32 %v4396_v41 }
 0x22b   : > { %1879 = vst [vmem:[%s8302_s9 + $0x10] sm:$0xff] %v8294_v7  ;;  %v8307_v62 = vadd.f32 %v8286_v60, %v1791_v19  ;;  %1913 = vrot.lane.b32.xlu0 %v8294_v7, %s7168_s18  ;;  %v6411_v43 = vpop.eup %6410  ;;  %v4397_v11 = vadd.f32 1.0, %v6409_v34  ;;  %6434 = vpow2.f32 %v5587_v42  ;;  %v8321_v25 = vmul.f32 %v4485_v26, %v2994_v63 }
 0x22c   : > { %v5846_v36 = vpop.f32.mrf.mxu0  ;;  %v6413_v20 = vpop.eup %6412  ;;  %v4487_v40 = vmul.f32 %v6411_v43, %v8119_v23  ;;  %v2995_v63 = vmul.f32 %v8098_v22, %v8153_v32 }
 0x22d   : > { %1877 = vst [vmem:[%s8302_s9] sm:$0xff] %v8307_v62  ;;  %v8317_v10 = vadd.f32 %v5846_v36, %v8286_v60  ;;  %1973 = vrot.lane.b32.xlu1 %v8307_v62, %s7169_s20  ;;  %v6415_v41 = vpop.eup %6414  ;;  %6436 = vrcp.f32 %v4397_v11  ;;  %v4398_v19 = vadd.f32 1.0, %v6413_v20  ;;  %10292 = vst [vmem:[#allocation154_spill] sm:$0xff] %v8321_v25  ;;  %v8332_v43 = vpop.f32.mrf.mxu1 }
 0x22e   : > { %v1794_v53 = vpop.f32.mrf.mxu0  ;;  %v6417_v34 = vpop.eup %6416  ;;  %v4399_v42 = vadd.f32 1.0, %v6415_v41  ;;  %v8323_v37 = vmul.f32 %v4487_v40, %v2996_v6 }
 0x22f   : > { %1880 = vst [vmem:[%s8302_s9 + $0x18] sm:$0xff] %v8317_v10  ;;  %v8328_v23 = vadd.f32 %v8286_v60, %v1794_v53  ;;  %1977 = vrot.lane.b32.xlu0 %v8294_v7, %s7169_s20  ;;  %v6419_v11 = vpop.eup %6418  ;;  %6438 = vrcp.f32 %v4398_v19  ;;  %v4400_v36 = vadd.f32 1.0, %v6417_v34  ;;  %v4486_v34 = vmul.f32 %v6407_v57, %v8114_v15 }
 0x230   : > { %10293 = vst [vmem:[#allocation155_spill] sm:$0xff] %v8323_v37  ;;  %v5849_v20 = vpop.f32.mrf.mxu0  ;;  %v6421_v41 = vpop.eup %6420  ;;  %6440 = vrcp.f32 %v4399_v42  ;;  %v4401_v26 = vadd.f32 1.0, %v6419_v11  ;;  %v2997_v42 = vmul.f32 %v8108_v17, %v8178_v50  ;;  %v2998_v57 = vmul.f32 %v8129_v46, %v8194_v51 }
 0x231   : > { %1878 = vst [vmem:[%s8302_s9 + $0x8] sm:$0xff] %v8328_v23  ;;  %1915 = vrot.lane.b32.xlu1 %v8317_v10, %s7168_s18  ;;  %v8341_v53 = vadd.f32 %v5849_v20, %v8286_v60  ;;  %6442 = vrcp.f32 %v4400_v36  ;;  %v1734_v11 = vpop.f32.mrf.mxu1  ;;  %v4402_v22 = vadd.f32 1.0, %v6421_v41  ;;  %v2999_v17 = vmul.f32 %v8129_v46, %v8216_v49 }
 0x232   : > { %v1807_v40 = vpop.f32.mrf.mxu0  ;;  %v6423_v19 = vpop.eup %6422  ;;  %6444 = vrcp.f32 %v4401_v26  ;;  %v3001_v51 = vmul.f32 %v8136_v38, %v8264_v55 }
 0x233   : > { %1909 = vrot.lane.b32.xlu0 %v8307_v62, %s7168_s18  ;;  %1883 = vst [vmem:[%s8302_s9 + $0x30] sm:$0xff] %v8341_v53  ;;  %v8353_v36 = vadd.f32 %v8286_v60, %v1807_v40  ;;  %v6425_v20 = vpop.eup %6424  ;;  %v4403_v32 = vadd.f32 1.0, %v6423_v19  ;;  %v8373_v19 = vmul.f32 %v4486_v34, %v2995_v63 }
 0x234   : > { %v5850_v6 = vpop.f32.mrf.mxu0  ;;  %v6427_v28 = vpop.eup %6426  ;;  %v4488_v15 = vmul.f32 %v6425_v20, %v8151_v39  ;;  %v3000_v39 = vmul.f32 %v8136_v38, %v8239_v16 }
 0x235   : > { %1979 = vrot.lane.b32.xlu1 %v8317_v10, %s7169_s20  ;;  %1881 = vst [vmem:[%s8302_s9 + $0x20] sm:$0xff] %v8353_v36  ;;  %v8365_v50 = vadd.f32 %v5850_v6, %v8286_v60  ;;  %v6429_v41 = vpop.eup %6428  ;;  %v4489_v26 = vmul.f32 %v6427_v28, %v8159_v54  ;;  %6446 = vrcp.f32 %v4403_v32  ;;  %10294 = vst [vmem:[#allocation156_spill] sm:$0xff] %v8373_v19  ;;  %v1738_v54 = vpop.f32.mrf.mxu1 }
 0x236   : > { %v1810_v46 = vpop.f32.mrf.mxu0  ;;  %v6431_v49 = vpop.eup %6430  ;;  %v4490_v40 = vmul.f32 %v6429_v41, %v8164_v35  ;;  %v8375_v20 = vmul.f32 %v4488_v15, %v2997_v42  ;;  %6448 = vrcp.f32 %v4402_v22 }
 0x237   : > { %1911 = vrot.lane.b32.xlu0 %v8328_v23, %s7168_s18  ;;  %1884 = vst [vmem:[%s8302_s9 + $0x38] sm:$0xff] %v8365_v50  ;;  %v8382_v28 = vadd.f32 %v8286_v60, %v1810_v46  ;;  %v6433_v16 = vpop.eup %6432  ;;  %v4491_v38 = vmul.f32 %v6431_v49, %v8172_v33  ;;  %v8395_v32 = vmul.f32 %v4489_v26, %v2998_v57  ;;  %v1740_v46 = vpop.f32.mrf.mxu1 }
 0x238   : > { %10295 = vst [vmem:[#allocation157_spill] sm:$0xff] %v8375_v20  ;;  %v5853_v55 = vpop.f32.mrf.mxu0  ;;  %v6435_v35 = vpop.eup %6434  ;;  %v4492_v6 = vmul.f32 %v6433_v16, %v8176_v12  ;;  %v8399_v12 = vmul.f32 %v4490_v40, %v2999_v17  ;;  %v3002_v26 = vmul.f32 %v8168_v29, %v8288_v9  ;;  %v3004_v40 = vmul.f32 %v8180_v48, %v8332_v43 }
 0x239   : > { %1975 = vrot.lane.b32.xlu1 %v8328_v23, %s7169_s20  ;;  %1882 = vst [vmem:[%s8302_s9 + $0x28] sm:$0xff] %v8382_v28  ;;  %v8391_v63 = vadd.f32 %v5853_v55, %v8286_v60  ;;  %v4404_v42 = vadd.f32 1.0, %v6435_v35  ;;  %10296 = vst [vmem:[#allocation158_spill] sm:$0xff] %v8395_v32  ;;  %v8397_v33 = vmul.f32 %v4491_v38, %v3000_v39 }
 0x23a   : > { %v1823_v22 = vpop.f32.mrf.mxu0  ;;  %v6437_v15 = vpop.eup %6436  ;;  %10298 = vst [vmem:[#allocation160_spill] sm:$0xff] %v8399_v12  ;;  %v8401_v41 = vmul.f32 %v4492_v6, %v3001_v51  ;;  %v3005_v43 = vmul.f32 %v8180_v48, %v1734_v11 }
 0x23b   : > { %10297 = vst [vmem:[#allocation159_spill] sm:$0xff] %v8397_v33  ;;  %1921 = vrot.lane.b32.xlu0 %v8341_v53, %s7168_s18  ;;  %1887 = vst [vmem:[%s8302_s9 + $0x50] sm:$0xff] %v8391_v63  ;;  %v8408_v49 = vadd.f32 %v8286_v60, %v1823_v22  ;;  %6450 = vrcp.f32 %v4404_v42  ;;  %v4493_v51 = vmul.f32 %v6437_v15, %v8187_v14  ;;  %v1742_v22 = vpop.f32.mrf.mxu1 }
 0x23c   : > { %10299 = vst [vmem:[#allocation161_spill] sm:$0xff] %v8401_v41  ;;  %v5854_v17 = vpop.f32.mrf.mxu0  ;;  %v6439_v39 = vpop.eup %6438  ;;  %v3003_v14 = vmul.f32 %v8168_v29, %v8311_v3 }
 0x23d   : > { %1923 = vrot.lane.b32.xlu1 %v8365_v50, %s7168_s18  ;;  %1885 = vst [vmem:[%s8302_s9 + $0x40] sm:$0xff] %v8408_v49  ;;  %v8422_v16 = vadd.f32 %v5854_v17, %v8286_v60  ;;  %v6441_v9 = vpop.eup %6440  ;;  %v4494_v55 = vmul.f32 %v6439_v39, %v8200_v4  ;;  %v8439_v3 = vmul.f32 %v4493_v51, %v3002_v26 }
 0x23e   : > { %v1826_v35 = vpop.f32.mrf.mxu0  ;;  %v6443_v6 = vpop.eup %6442  ;;  %v4495_v42 = vmul.f32 %v6441_v9, %v8206_v8  ;;  %v3006_v8 = vmul.f32 %v8223_v44, %v1738_v54  ;;  %v3008_v26 = vmul.f32 %v8245_v5, %v1742_v22 }
 0x23f   : > { %1985 = vrot.lane.b32.xlu0 %v8341_v53, %s7169_s20  ;;  %1888 = vst [vmem:[%s8302_s9 + $0x58] sm:$0xff] %v8422_v16  ;;  %v8436_v15 = vadd.f32 %v8286_v60, %v1826_v35  ;;  %v6445_v4 = vpop.eup %6444  ;;  %v4496_v17 = vmul.f32 %v6443_v6, %v8211_v21  ;;  %10300 = vst [vmem:[#allocation162_spill] sm:$0xff] %v8439_v3  ;;  %v8452_v21 = vmul.f32 %v4494_v55, %v3003_v14  ;;  %v1744_v6 = vpop.f32.mrf.mxu1 }
 0x240   : > { %v5857_v29 = vpop.f32.mrf.mxu0  ;;  %v8441_v48 = vmul.f32 %v4495_v42, %v3004_v40  ;;  %v4497_v39 = vmul.f32 %v6445_v4, %v8229_v61 }
 0x241   : > { %1987 = vrot.lane.b32.xlu1 %v8365_v50, %s7169_s20  ;;  %1886 = vst [vmem:[%s8302_s9 + $0x48] sm:$0xff] %v8436_v15  ;;  %v8449_v11 = vadd.f32 %v5857_v29, %v8286_v60  ;;  %10302 = vst [vmem:[#allocation164_spill] sm:$0xff] %v8452_v21  ;;  %v8454_v9 = vmul.f32 %v4496_v17, %v3005_v43 }
 0x242   : > { %10301 = vst [vmem:[#allocation163_spill] sm:$0xff] %v8441_v48  ;;  %v1839_v51 = vpop.f32.mrf.mxu0  ;;  %v6447_v40 = vpop.eup %6446  ;;  %v8476_v22 = vmul.f32 %v4497_v39, %v3006_v8  ;;  %v3009_v8 = vmul.f32 %v8245_v5, %v1744_v6 }
 0x243   : > { %10303 = vst [vmem:[#allocation165_spill] sm:$0xff] %v8454_v9  ;;  %1917 = vrot.lane.b32.xlu0 %v8353_v36, %s7168_s18  ;;  %1891 = vst [vmem:[%s8302_s9 + $0x70] sm:$0xff] %v8449_v11  ;;  %v8464_v61 = vadd.f32 %v8286_v60, %v1839_v51  ;;  %v4499_v55 = vmul.f32 %v6447_v40, %v8254_v56  ;;  %v6449_v35 = vpop.eup %6448  ;;  %v3007_v51 = vmul.f32 %v8223_v44, %v1740_v46  ;;  %s5876_s19 = spop %5875 }
 0x244   : > { %v5858_v14 = vpop.f32.mrf.mxu0  ;;  %10304 = vst [vmem:[#allocation166_spill] sm:$0xff] %v8476_v22  ;;  %v4498_v29 = vmul.f32 %v6449_v35, %v8232_v18 }
 0x245   : > { %1919 = vrot.lane.b32.xlu1 %v8382_v28, %s7168_s18  ;;  %1889 = vst [vmem:[%s8302_s9 + $0x60] sm:$0xff] %v8464_v61  ;;  %v8474_v42 = vadd.f32 %v5858_v14, %v8286_v60  ;;  %v8478_v4 = vmul.f32 %v4499_v55, %v3008_v26 }
 0x246   : > { %v1842_v56 = vpop.f32.mrf.mxu0 }
 0x247   : > { %10305 = vst [vmem:[#allocation167_spill] sm:$0xff] %v8478_v4  ;;  %1981 = vrot.lane.b32.xlu0 %v8353_v36, %s7169_s20  ;;  %1892 = vst [vmem:[%s8302_s9 + $0x78] sm:$0xff] %v8474_v42  ;;  %v8485_v17 = vadd.f32 %v8286_v60, %v1842_v56  ;;  %v8499_v60 = vmul.f32 %v4498_v29, %v3007_v51 }
 0x248   : > { %v6451_v39 = vpop.eup %6450 }
 0x249   : > { %1983 = vrot.lane.b32.xlu1 %v8382_v28, %s7169_s20  ;;  %1890 = vst [vmem:[%s8302_s9 + $0x68] sm:$0xff] %v8485_v17  ;;  %v4500_v26 = vmul.f32 %v6451_v39, %v8271_v59  ;;  %10306 = vst [vmem:[#allocation168_spill] sm:$0xff] %v8499_v60 }
 0x24b   : > { %1929 = vrot.lane.b32.xlu0 %v8391_v63, %s7168_s18  ;;  %v8501_v18 = vmul.f32 %v4500_v26, %v3009_v8 }
 0x24d   : > { %10307 = vst [vmem:[#allocation169_spill] sm:$0xff] %v8501_v18  ;;  %1931 = vrot.lane.b32.xlu1 %v8422_v16, %s7168_s18 }
 0x24f   : > { %1993 = vrot.lane.b32.xlu0 %v8391_v63, %s7169_s20 }
 0x251   : > { %1995 = vrot.lane.b32.xlu1 %v8422_v16, %s7169_s20 }
 0x253   : > { %1925 = vrot.lane.b32.xlu0 %v8408_v49, %s7168_s18 }
 0x255   : > { %1927 = vrot.lane.b32.xlu1 %v8436_v15, %s7168_s18 }
 0x257   : > { %1989 = vrot.lane.b32.xlu0 %v8408_v49, %s7169_s20 }
 0x259   : > { %1991 = vrot.lane.b32.xlu1 %v8436_v15, %s7169_s20 }
 0x25b   : > { %1937 = vrot.lane.b32.xlu0 %v8449_v11, %s7168_s18 }
 0x25d   : > { %1939 = vrot.lane.b32.xlu1 %v8474_v42, %s7168_s18 }
 0x25f   : > { %2001 = vrot.lane.b32.xlu0 %v8449_v11, %s7169_s20 }
 0x261   : > { %2003 = vrot.lane.b32.xlu1 %v8474_v42, %s7169_s20 }
 0x263   : > { %1933 = vrot.lane.b32.xlu0 %v8464_v61, %s7168_s18 }
 0x265   : > { %1935 = vrot.lane.b32.xlu1 %v8485_v17, %s7168_s18 }
 0x267   : > { %1997 = vrot.lane.b32.xlu0 %v8464_v61, %s7169_s20 }
 0x269   : > { %1999 = vrot.lane.b32.xlu1 %v8485_v17, %s7169_s20 }
 0x29d   : > { %v1914_v5 = vpop.permute.xlu0 %1913 }
 0x29e   : > { %v1959_v46 = vmax.f32 %v8294_v7, %v1914_v5 }
 0x29f   : > { %v1974_v59 = vpop.permute.xlu1 %1973 }
 0x2a1   : > { %v1978_v55 = vpop.permute.xlu0 %1977 }
 0x2a2   : > { %v8536_v14 = vmax.f32 %v1959_v46, %v1978_v55 }
 0x2a3   : > { %v1916_v35 = vpop.permute.xlu1 %1915 }
 0x2a4   : > { %2122 = vrot.lane.b32.xlu0 %v8536_v14, %s7170_s24  ;;  %v1960_v56 = vmax.f32 %v8317_v10, %v1916_v35 }
 0x2a5   : > { %v1910_v6 = vpop.permute.xlu0 %1909 }
 0x2a6   : > { %v1957_v29 = vmax.f32 %v8307_v62, %v1910_v6 }
 0x2a7   : > { %v1980_v51 = vpop.permute.xlu1 %1979 }
 0x2a8   : > { %v8542_v8 = vmax.f32 %v1960_v56, %v1980_v51  ;;  %2234 = vrot.lane.b32.xlu0 %v8536_v14, %s7171_s23  ;;  %v8546_v26 = vmax.f32 %v1957_v29, %v1974_v59 }
 0x2a9   : > { %v1912_v39 = vpop.permute.xlu0 %1911 }
 0x2aa   : > { %2124 = vrot.lane.b32.xlu1 %v8542_v8, %s7170_s24  ;;  %v1958_v46 = vmax.f32 %v8328_v23, %v1912_v39 }
 0x2ab   : > { %v1976_v5 = vpop.permute.xlu1 %1975 }
 0x2ac   : > { %2118 = vrot.lane.b32.xlu0 %v8546_v26, %s7170_s24  ;;  %v8555_v6 = vmax.f32 %v1958_v46, %v1976_v5 }
 0x2ad   : > { %v1922_v55 = vpop.permute.xlu0 %1921 }
 0x2ae   : > { %2236 = vrot.lane.b32.xlu1 %v8542_v8, %s7171_s23  ;;  %v1963_v56 = vmax.f32 %v8341_v53, %v1922_v55 }
 0x2af   : > { %v1924_v35 = vpop.permute.xlu1 %1923 }
 0x2b0   : > { %2230 = vrot.lane.b32.xlu0 %v8546_v26, %s7171_s23  ;;  %v1964_v40 = vmax.f32 %v8365_v50, %v1924_v35 }
 0x2b1   : > { %v1986_v59 = vpop.permute.xlu0 %1985 }
 0x2b2   : > { %v8560_v29 = vmax.f32 %v1963_v56, %v1986_v59  ;;  %2120 = vrot.lane.b32.xlu1 %v8555_v6, %s7170_s24 }
 0x2b3   : > { %v1988_v51 = vpop.permute.xlu1 %1987 }
 0x2b4   : > { %2130 = vrot.lane.b32.xlu0 %v8560_v29, %s7170_s24  ;;  %v8569_v46 = vmax.f32 %v1964_v40, %v1988_v51 }
 0x2b5   : > { %v1918_v39 = vpop.permute.xlu0 %1917 }
 0x2b6   : > { %2232 = vrot.lane.b32.xlu1 %v8555_v6, %s7171_s23  ;;  %v1961_v55 = vmax.f32 %v8353_v36, %v1918_v39 }
 0x2b7   : > { %v1920_v5 = vpop.permute.xlu1 %1919 }
 0x2b8   : > { %2242 = vrot.lane.b32.xlu0 %v8560_v29, %s7171_s23  ;;  %v1962_v54 = vmax.f32 %v8382_v28, %v1920_v5 }
 0x2b9   : > { %v1982_v56 = vpop.permute.xlu0 %1981 }
 0x2ba   : > { %v8574_v59 = vmax.f32 %v1961_v55, %v1982_v56  ;;  %2132 = vrot.lane.b32.xlu1 %v8569_v46, %s7170_s24 }
 0x2bb   : > { %v1984_v44 = vpop.permute.xlu1 %1983 }
 0x2bc   : > { %2126 = vrot.lane.b32.xlu0 %v8574_v59, %s7170_s24  ;;  %v8583_v51 = vmax.f32 %v1962_v54, %v1984_v44 }
 0x2bd   : > { %v1930_v35 = vpop.permute.xlu0 %1929 }
 0x2be   : > { %2244 = vrot.lane.b32.xlu1 %v8569_v46, %s7171_s23  ;;  %v1967_v39 = vmax.f32 %v8391_v63, %v1930_v35 }
 0x2bf   : > { %v1932_v40 = vpop.permute.xlu1 %1931 }
 0x2c0   : > { %2238 = vrot.lane.b32.xlu0 %v8574_v59, %s7171_s23  ;;  %v1968_v57 = vmax.f32 %v8422_v16, %v1932_v40 }
 0x2c1   : > { %v1994_v55 = vpop.permute.xlu0 %1993 }
 0x2c2   : > { %v8588_v56 = vmax.f32 %v1967_v39, %v1994_v55  ;;  %2128 = vrot.lane.b32.xlu1 %v8583_v51, %s7170_s24 }
 0x2c3   : > { %v1996_v43 = vpop.permute.xlu1 %1995 }
 0x2c4   : > { %2138 = vrot.lane.b32.xlu0 %v8588_v56, %s7170_s24  ;;  %v8597_v44 = vmax.f32 %v1968_v57, %v1996_v43 }
 0x2c5   : > { %v1926_v5 = vpop.permute.xlu0 %1925 }
 0x2c6   : > { %2240 = vrot.lane.b32.xlu1 %v8583_v51, %s7171_s23  ;;  %v1965_v35 = vmax.f32 %v8408_v49, %v1926_v5 }
 0x2c7   : > { %v1928_v54 = vpop.permute.xlu1 %1927 }
 0x2c8   : > { %2250 = vrot.lane.b32.xlu0 %v8588_v56, %s7171_s23  ;;  %v1966_v34 = vmax.f32 %v8436_v15, %v1928_v54 }
 0x2c9   : > { %v1990_v39 = vpop.permute.xlu0 %1989 }
 0x2ca   : > { %v8602_v55 = vmax.f32 %v1965_v35, %v1990_v39  ;;  %2140 = vrot.lane.b32.xlu1 %v8597_v44, %s7170_s24 }
 0x2cb   : > { %v1992_v38 = vpop.permute.xlu1 %1991 }
 0x2cc   : > { %2134 = vrot.lane.b32.xlu0 %v8602_v55, %s7170_s24  ;;  %v8611_v43 = vmax.f32 %v1966_v34, %v1992_v38 }
 0x2cd   : > { %v1938_v40 = vpop.permute.xlu0 %1937 }
 0x2ce   : > { %2252 = vrot.lane.b32.xlu1 %v8597_v44, %s7171_s23  ;;  %v1971_v5 = vmax.f32 %v8449_v11, %v1938_v40 }
 0x2cf   : > { %v1940_v57 = vpop.permute.xlu1 %1939 }
 0x2d0   : > { %2246 = vrot.lane.b32.xlu0 %v8602_v55, %s7171_s23  ;;  %v1972_v4 = vmax.f32 %v8474_v42, %v1940_v57 }
 0x2d1   : > { %v2002_v35 = vpop.permute.xlu0 %2001 }
 0x2d2   : > { %v8616_v39 = vmax.f32 %v1971_v5, %v2002_v35  ;;  %2136 = vrot.lane.b32.xlu1 %v8611_v43, %s7170_s24 }
 0x2d3   : > { %v2004_v22 = vpop.permute.xlu1 %2003 }
 0x2d4   : > { %2146 = vrot.lane.b32.xlu0 %v8616_v39, %s7170_s24  ;;  %v8625_v38 = vmax.f32 %v1972_v4, %v2004_v22  ;;  %v6884_v4 = vld [vmem:[%s7389_s21 + $0x18] sm:$0xff] }
 0x2d5   : > { %v1934_v54 = vpop.permute.xlu0 %1933 }
 0x2d6   : > { %2248 = vrot.lane.b32.xlu1 %v8611_v43, %s7171_s23  ;;  %v1969_v40 = vmax.f32 %v8464_v61, %v1934_v54  ;;  %v2697_v54 = vmul.f32 %v6884_v4, %v6884_v4 }
 0x2d7   : > { %v1936_v34 = vpop.permute.xlu1 %1935 }
 0x2d8   : > { %2258 = vrot.lane.b32.xlu0 %v8616_v39, %s7171_s23  ;;  %v1970_v60 = vmax.f32 %v8485_v17, %v1936_v34 }
 0x2d9   : > { %v1998_v5 = vpop.permute.xlu0 %1997 }
 0x2da   : > { %v8630_v35 = vmax.f32 %v1969_v40, %v1998_v5  ;;  %2148 = vrot.lane.b32.xlu1 %v8625_v38, %s7170_s24  ;;  %v6885_v40 = vld [vmem:[%s7389_s21 + $0x10] sm:$0xff] }
 0x2db   : > { %v2000_v57 = vpop.permute.xlu1 %1999  ;;  %v2696_v5 = vmul.f32 %v6885_v40, %v6885_v40 }
 0x2dc   : > { %2142 = vrot.lane.b32.xlu0 %v8630_v35, %s7170_s24  ;;  %v8639_v22 = vmax.f32 %v1970_v60, %v2000_v57  ;;  %v8650_v57 = vstv %s5876_s19 }
 0x2de   : > { %2260 = vrot.lane.b32.xlu1 %v8625_v38, %s7171_s23 }
 0x2e0   : > { %2254 = vrot.lane.b32.xlu0 %v8630_v35, %s7171_s23 }
 0x2e2   : > { %2144 = vrot.lane.b32.xlu1 %v8639_v22, %s7170_s24 }
 0x2e6   : > { %2256 = vrot.lane.b32.xlu1 %v8639_v22, %s7171_s23 }
 0x2ff   : > { %2716 = vadd.xlane.f32.xlu0 %v2697_v54 }
 0x30a   : > { %2714 = vadd.xlane.f32.xlu1 %v2696_v5 }
 0x316   : > { %v2123_v34 = vpop.permute.xlu0 %2122 }
 0x317   : > { %v2168_v60 = vsub.f32 %v8294_v7, %v2123_v34 }
 0x319   : > { %v2184_v18 = vmul.f32 %v2168_v60, %v8650_v57 }
 0x31a   : > { %v2235_v3 = vpop.permute.xlu0 %2234 }
 0x31b   : > { %v2202_v48 = vmul.f32 1.442695, %v2184_v18  ;;  %v2280_v21 = vsub.f32 %v8294_v7, %v2235_v3 }
 0x31c   : > { %v2125_v9 = vpop.permute.xlu1 %2124 }
 0x31d   : > { %6452 = vpow2.f32 %v2202_v48  ;;  %v2296_v4 = vmul.f32 %v2280_v21, %v8650_v57  ;;  %v2169_v54 = vsub.f32 %v8317_v10, %v2125_v9 }
 0x31e   : > { %v2119_v40 = vpop.permute.xlu0 %2118 }
 0x31f   : > { %v2314_v5 = vmul.f32 1.442695, %v2296_v4  ;;  %v2185_v32 = vmul.f32 %v2169_v54, %v8650_v57  ;;  %v2166_v34 = vsub.f32 %v8307_v62, %v2119_v40 }
 0x320   : > { %v2237_v33 = vpop.permute.xlu1 %2236 }
 0x321   : > { %6454 = vpow2.f32 %v2314_v5  ;;  %v2204_v12 = vmul.f32 1.442695, %v2185_v32  ;;  %v2182_v60 = vmul.f32 %v2166_v34, %v8650_v57  ;;  %v2281_v18 = vsub.f32 %v8317_v10, %v2237_v33 }
 0x322   : > { %v2231_v3 = vpop.permute.xlu0 %2230 }
 0x323   : > { %6456 = vpow2.f32 %v2204_v12  ;;  %v2198_v48 = vmul.f32 1.442695, %v2182_v60  ;;  %v2297_v21 = vmul.f32 %v2281_v18, %v8650_v57  ;;  %v2278_v9 = vsub.f32 %v8307_v62, %v2231_v3 }
 0x324   : > { %v2121_v41 = vpop.permute.xlu1 %2120 }
 0x325   : > { %6458 = vpow2.f32 %v2198_v48  ;;  %v2316_v4 = vmul.f32 1.442695, %v2297_v21  ;;  %v2294_v54 = vmul.f32 %v2278_v9, %v8650_v57  ;;  %v2167_v40 = vsub.f32 %v8328_v23, %v2121_v41 }
 0x326   : > { %v2131_v5 = vpop.permute.xlu0 %2130 }
 0x327   : > { %6460 = vpow2.f32 %v2316_v4  ;;  %v2310_v32 = vmul.f32 1.442695, %v2294_v54  ;;  %v2183_v34 = vmul.f32 %v2167_v40, %v8650_v57  ;;  %v2172_v33 = vsub.f32 %v8341_v53, %v2131_v5 }
 0x328   : > { %v2233_v12 = vpop.permute.xlu1 %2232 }
 0x329   : > { %6462 = vpow2.f32 %v2310_v32  ;;  %v2200_v60 = vmul.f32 1.442695, %v2183_v34  ;;  %v2188_v18 = vmul.f32 %v2172_v33, %v8650_v57  ;;  %v2279_v3 = vsub.f32 %v8328_v23, %v2233_v12 }
 0x32a   : > { %v8668_v48 = vpop.eup %6452  ;;  %v2243_v21 = vpop.permute.xlu0 %2242 }
 0x32b   : > { %6464 = vpow2.f32 %v2200_v60  ;;  %v2210_v9 = vmul.f32 1.442695, %v2188_v18  ;;  %v2295_v41 = vmul.f32 %v2279_v3, %v8650_v57  ;;  %v2284_v4 = vsub.f32 %v8341_v53, %v2243_v21  ;;  %2362 = vrot.lane.b32.xlu0 %v8668_v48, %s7168_s18 }
 0x32c   : > { %v2133_v54 = vpop.permute.xlu1 %2132 }
 0x32d   : > { %6466 = vpow2.f32 %v2210_v9  ;;  %v2312_v40 = vmul.f32 1.442695, %v2295_v41  ;;  %v2300_v5 = vmul.f32 %v2284_v4, %v8650_v57  ;;  %v2173_v32 = vsub.f32 %v8365_v50, %v2133_v54 }
 0x32e   : > { %v8676_v34 = vpop.eup %6454  ;;  %v2127_v33 = vpop.permute.xlu0 %2126 }
 0x32f   : > { %10308 = vst [vmem:[#allocation170_spill] sm:$0xff] %v8676_v34  ;;  %6468 = vpow2.f32 %v2312_v40  ;;  %v2322_v12 = vmul.f32 1.442695, %v2300_v5  ;;  %v2189_v60 = vmul.f32 %v2173_v32, %v8650_v57  ;;  %v2170_v18 = vsub.f32 %v8353_v36, %v2127_v33  ;;  %2442 = vrot.lane.b32.xlu0 %v8676_v34, %s7169_s20 }
 0x330   : > { %v8682_v3 = vpop.eup %6456  ;;  %v2245_v21 = vpop.permute.xlu1 %2244 }
 0x331   : > { %6470 = vpow2.f32 %v2322_v12  ;;  %v2212_v9 = vmul.f32 1.442695, %v2189_v60  ;;  %v2186_v41 = vmul.f32 %v2170_v18, %v8650_v57  ;;  %v2285_v4 = vsub.f32 %v8365_v50, %v2245_v21  ;;  %2364 = vrot.lane.b32.xlu1 %v8682_v3, %s7168_s18 }
 0x332   : > { %v8688_v54 = vpop.eup %6458  ;;  %v2239_v40 = vpop.permute.xlu0 %2238 }
 0x333   : > { %6472 = vpow2.f32 %v2212_v9  ;;  %v2206_v5 = vmul.f32 1.442695, %v2186_v41  ;;  %v2301_v32 = vmul.f32 %v2285_v4, %v8650_v57  ;;  %v2282_v33 = vsub.f32 %v8353_v36, %v2239_v40  ;;  %2358 = vrot.lane.b32.xlu0 %v8688_v54, %s7168_s18 }
 0x334   : > { %v8694_v12 = vpop.eup %6460  ;;  %v2129_v60 = vpop.permute.xlu1 %2128 }
 0x335   : > { %10309 = vst [vmem:[#allocation171_spill] sm:$0xff] %v8694_v12  ;;  %6474 = vpow2.f32 %v2206_v5  ;;  %v2324_v18 = vmul.f32 1.442695, %v2301_v32  ;;  %v2298_v21 = vmul.f32 %v2282_v33, %v8650_v57  ;;  %v2171_v34 = vsub.f32 %v8382_v28, %v2129_v60  ;;  %2444 = vrot.lane.b32.xlu1 %v8694_v12, %s7169_s20 }
 0x336   : > { %v8700_v9 = vpop.eup %6462  ;;  %v2139_v41 = vpop.permute.xlu0 %2138 }
 0x337   : > { %10310 = vst [vmem:[#allocation172_spill] sm:$0xff] %v8700_v9  ;;  %6476 = vpow2.f32 %v2324_v18  ;;  %v2318_v4 = vmul.f32 1.442695, %v2298_v21  ;;  %v2187_v40 = vmul.f32 %v2171_v34, %v8650_v57  ;;  %v2176_v25 = vsub.f32 %v8391_v63, %v2139_v41  ;;  %2438 = vrot.lane.b32.xlu0 %v8700_v9, %s7169_s20 }
 0x338   : > { %v8706_v5 = vpop.eup %6464  ;;  %v2241_v32 = vpop.permute.xlu1 %2240 }
 0x339   : > { %6478 = vpow2.f32 %v2318_v4  ;;  %v2208_v33 = vmul.f32 1.442695, %v2187_v40  ;;  %v2192_v60 = vmul.f32 %v2176_v25, %v8650_v57  ;;  %v2283_v12 = vsub.f32 %v8382_v28, %v2241_v32  ;;  %2360 = vrot.lane.b32.xlu1 %v8706_v5, %s7168_s18 }
 0x33a   : > { %v8712_v18 = vpop.eup %6466  ;;  %v2251_v34 = vpop.permute.xlu0 %2250 }
 0x33b   : > { %6480 = vpow2.f32 %v2208_v33  ;;  %v2218_v21 = vmul.f32 1.442695, %v2192_v60  ;;  %v2299_v41 = vmul.f32 %v2283_v12, %v8650_v57  ;;  %v2288_v9 = vsub.f32 %v8391_v63, %v2251_v34  ;;  %2370 = vrot.lane.b32.xlu0 %v8712_v18, %s7168_s18 }
 0x33c   : > { %v8718_v4 = vpop.eup %6468  ;;  %v2141_v25 = vpop.permute.xlu1 %2140 }
 0x33d   : > { %10311 = vst [vmem:[#allocation173_spill] sm:$0xff] %v8718_v4  ;;  %6482 = vpow2.f32 %v2218_v21  ;;  %v2320_v40 = vmul.f32 1.442695, %v2299_v41  ;;  %v2304_v32 = vmul.f32 %v2288_v9, %v8650_v57  ;;  %v2177_v37 = vsub.f32 %v8422_v16, %v2141_v25  ;;  %2440 = vrot.lane.b32.xlu1 %v8718_v4, %s7169_s20 }
 0x33e   : > { %v8724_v33 = vpop.eup %6470  ;;  %v2135_v12 = vpop.permute.xlu0 %2134 }
 0x33f   : > { %10312 = vst [vmem:[#allocation174_spill] sm:$0xff] %v8724_v33  ;;  %6484 = vpow2.f32 %v2320_v40  ;;  %v2330_v60 = vmul.f32 1.442695, %v2304_v32  ;;  %v2193_v34 = vmul.f32 %v2177_v37, %v8650_v57  ;;  %v2174_v19 = vsub.f32 %v8408_v49, %v2135_v12  ;;  %2450 = vrot.lane.b32.xlu0 %v8724_v33, %s7169_s20 }
 0x340   : > { %v8730_v21 = vpop.eup %6472  ;;  %v2253_v9 = vpop.permute.xlu1 %2252 }
 0x341   : > { %6486 = vpow2.f32 %v2330_v60  ;;  %v2220_v41 = vmul.f32 1.442695, %v2193_v34  ;;  %v2190_v25 = vmul.f32 %v2174_v19, %v8650_v57  ;;  %v2289_v4 = vsub.f32 %v8422_v16, %v2253_v9  ;;  %2372 = vrot.lane.b32.xlu1 %v8730_v21, %s7168_s18 }
 0x342   : > { %v8736_v40 = vpop.eup %6474  ;;  %v2247_v37 = vpop.permute.xlu0 %2246 }
 0x343   : > { %6488 = vpow2.f32 %v2220_v41  ;;  %v2214_v32 = vmul.f32 1.442695, %v2190_v25  ;;  %v2305_v12 = vmul.f32 %v2289_v4, %v8650_v57  ;;  %v2286_v33 = vsub.f32 %v8408_v49, %v2247_v37  ;;  %2366 = vrot.lane.b32.xlu0 %v8736_v40, %s7168_s18 }
 0x344   : > { %v8742_v60 = vpop.eup %6476  ;;  %v2137_v19 = vpop.permute.xlu1 %2136 }
 0x345   : > { %10313 = vst [vmem:[#allocation175_spill] sm:$0xff] %v8742_v60  ;;  %6490 = vpow2.f32 %v2214_v32  ;;  %v2332_v34 = vmul.f32 1.442695, %v2305_v12  ;;  %v2302_v9 = vmul.f32 %v2286_v33, %v8650_v57  ;;  %v2175_v20 = vsub.f32 %v8436_v15, %v2137_v19  ;;  %2452 = vrot.lane.b32.xlu1 %v8742_v60, %s7169_s20 }
 0x346   : > { %v8748_v41 = vpop.eup %6478  ;;  %v2147_v4 = vpop.permute.xlu0 %2146 }
 0x347   : > { %10314 = vst [vmem:[#allocation176_spill] sm:$0xff] %v8748_v41  ;;  %6492 = vpow2.f32 %v2332_v34  ;;  %v2326_v25 = vmul.f32 1.442695, %v2302_v9  ;;  %v2191_v37 = vmul.f32 %v2175_v20, %v8650_v57  ;;  %v2180_v0 = vsub.f32 %v8449_v11, %v2147_v4  ;;  %2446 = vrot.lane.b32.xlu0 %v8748_v41, %s7169_s20 }
 0x348   : > { %v8754_v32 = vpop.eup %6480  ;;  %v2249_v33 = vpop.permute.xlu1 %2248 }
 0x349   : > { %6494 = vpow2.f32 %v2326_v25  ;;  %v2216_v12 = vmul.f32 1.442695, %v2191_v37  ;;  %v2196_v19 = vmul.f32 %v2180_v0, %v8650_v57  ;;  %v2287_v60 = vsub.f32 %v8436_v15, %v2249_v33  ;;  %2368 = vrot.lane.b32.xlu1 %v8754_v32, %s7168_s18 }
 0x34a   : > { %v8760_v34 = vpop.eup %6482  ;;  %v2259_v20 = vpop.permute.xlu0 %2258 }
 0x34b   : > { %6496 = vpow2.f32 %v2216_v12  ;;  %v2226_v9 = vmul.f32 1.442695, %v2196_v19  ;;  %v2303_v4 = vmul.f32 %v2287_v60, %v8650_v57  ;;  %v2292_v41 = vsub.f32 %v8449_v11, %v2259_v20  ;;  %2378 = vrot.lane.b32.xlu0 %v8760_v34, %s7168_s18 }
 0x34c   : > { %v8766_v25 = vpop.eup %6484  ;;  %v2149_v0 = vpop.permute.xlu1 %2148 }
 0x34d   : > { %10315 = vst [vmem:[#allocation177_spill] sm:$0xff] %v8766_v25  ;;  %6498 = vpow2.f32 %v2226_v9  ;;  %v2328_v37 = vmul.f32 1.442695, %v2303_v4  ;;  %v2308_v33 = vmul.f32 %v2292_v41, %v8650_v57  ;;  %v2181_v2 = vsub.f32 %v8474_v42, %v2149_v0  ;;  %2448 = vrot.lane.b32.xlu1 %v8766_v25, %s7169_s20 }
 0x34e   : > { %v8772_v12 = vpop.eup %6486  ;;  %v2143_v60 = vpop.permute.xlu0 %2142 }
 0x34f   : > { %10316 = vst [vmem:[#allocation178_spill] sm:$0xff] %v8772_v12  ;;  %6500 = vpow2.f32 %v2328_v37  ;;  %v2338_v19 = vmul.f32 1.442695, %v2308_v33  ;;  %v2197_v20 = vmul.f32 %v2181_v2, %v8650_v57  ;;  %v2178_v1 = vsub.f32 %v8464_v61, %v2143_v60  ;;  %2458 = vrot.lane.b32.xlu0 %v8772_v12, %s7169_s20 }
 0x350   : > { %v8778_v9 = vpop.eup %6488  ;;  %v2261_v41 = vpop.permute.xlu1 %2260 }
 0x351   : > { %6502 = vpow2.f32 %v2338_v19  ;;  %v2228_v4 = vmul.f32 1.442695, %v2197_v20  ;;  %v2194_v0 = vmul.f32 %v2178_v1, %v8650_v57  ;;  %v2293_v25 = vsub.f32 %v8474_v42, %v2261_v41  ;;  %2380 = vrot.lane.b32.xlu1 %v8778_v9, %s7168_s18 }
 0x352   : > { %v8784_v37 = vpop.eup %6490  ;;  %v2255_v2 = vpop.permute.xlu0 %2254 }
 0x353   : > { %6504 = vpow2.f32 %v2228_v4  ;;  %v2222_v33 = vmul.f32 1.442695, %v2194_v0  ;;  %v2309_v60 = vmul.f32 %v2293_v25, %v8650_v57  ;;  %v2290_v12 = vsub.f32 %v8464_v61, %v2255_v2  ;;  %2374 = vrot.lane.b32.xlu0 %v8784_v37, %s7168_s18 }
 0x354   : > { %v8790_v19 = vpop.eup %6492  ;;  %v2145_v1 = vpop.permute.xlu1 %2144 }
 0x355   : > { %10317 = vst [vmem:[#allocation179_spill] sm:$0xff] %v8790_v19  ;;  %6506 = vpow2.f32 %v2222_v33  ;;  %v2340_v20 = vmul.f32 1.442695, %v2309_v60  ;;  %v2306_v41 = vmul.f32 %v2290_v12, %v8650_v57  ;;  %v2179_v27 = vsub.f32 %v8485_v17, %v2145_v1  ;;  %2460 = vrot.lane.b32.xlu1 %v8790_v19, %s7169_s20 }
 0x356   : > { %v8796_v4 = vpop.eup %6494  ;;  %v2040_v19 = vsub.f32 %v8317_v10, %v8542_v8 }
 0x357   : > { %10318 = vst [vmem:[#allocation180_spill] sm:$0xff] %v8796_v4  ;;  %6508 = vpow2.f32 %v2340_v20  ;;  %v2334_v25 = vmul.f32 1.442695, %v2306_v41  ;;  %v2195_v0 = vmul.f32 %v2179_v27, %v8650_v57  ;;  %2454 = vrot.lane.b32.xlu0 %v8796_v4, %s7169_s20 }
 0x358   : > { %v8801_v2 = vpop.eup %6496  ;;  %v2257_v33 = vpop.permute.xlu1 %2256  ;;  %v2057_v4 = vmul.f32 %v8650_v57, %v2040_v19  ;;  %v2041_v19 = vsub.f32 %v8353_v36, %v8574_v59  ;;  %v2042_v36 = vsub.f32 %v8382_v28, %v8583_v51 }
 0x359   : > { %6510 = vpow2.f32 %v2334_v25  ;;  %v2224_v60 = vmul.f32 1.442695, %v2195_v0  ;;  %v2291_v12 = vsub.f32 %v8485_v17, %v2257_v33  ;;  %2376 = vrot.lane.b32.xlu1 %v8801_v2, %s7168_s18 }
 0x35a   : > { %v8806_v1 = vpop.eup %6498  ;;  %v2076_v45 = vmul.f32 1.442695, %v2057_v4  ;;  %v2059_v28 = vmul.f32 %v8650_v57, %v2042_v36 }
 0x35b   : > { %6512 = vpow2.f32 %v2224_v60  ;;  %v2307_v20 = vmul.f32 %v2291_v12, %v8650_v57  ;;  %2386 = vrot.lane.b32.xlu0 %v8806_v1, %s7168_s18 }
 0x35c   : > { %v8811_v27 = vpop.eup %6500 }
 0x35d   : > { %10319 = vst [vmem:[#allocation181_spill] sm:$0xff] %v8811_v27  ;;  %v2336_v41 = vmul.f32 1.442695, %v2307_v20  ;;  %2456 = vrot.lane.b32.xlu1 %v8811_v27, %s7169_s20 }
 0x35e   : > { %v8815_v25 = vpop.eup %6502 }
 0x35f   : > { %10320 = vst [vmem:[#allocation182_spill] sm:$0xff] %v8815_v25  ;;  %6514 = vpow2.f32 %v2336_v41  ;;  %2466 = vrot.lane.b32.xlu0 %v8815_v25, %s7169_s20  ;;  %v2039_v25 = vsub.f32 %v8294_v7, %v8536_v14  ;;  %v2043_v7 = vsub.f32 %v8341_v53, %v8560_v29  ;;  %v2058_v29 = vmul.f32 %v8650_v57, %v2041_v19 }
 0x360   : > { %v8819_v0 = vpop.eup %6504 }
 0x361   : > { %2388 = vrot.lane.b32.xlu1 %v8819_v0, %s7168_s18 }
 0x362   : > { %v8823_v33 = vpop.eup %6506 }
 0x363   : > { %2382 = vrot.lane.b32.xlu0 %v8823_v33, %s7168_s18 }
 0x364   : > { %v8827_v60 = vpop.eup %6508 }
 0x365   : > { %10321 = vst [vmem:[#allocation183_spill] sm:$0xff] %v8827_v60  ;;  %2468 = vrot.lane.b32.xlu1 %v8827_v60, %s7169_s20  ;;  %v2056_v60 = vmul.f32 %v8650_v57, %v2039_v25  ;;  %v2078_v25 = vmul.f32 1.442695, %v2058_v29  ;;  %v2045_v29 = vsub.f32 %v8408_v49, %v8602_v55 }
 0x366   : > { %v8831_v12 = vpop.eup %6510 }
 0x367   : > { %10322 = vst [vmem:[#allocation184_spill] sm:$0xff] %v8831_v12  ;;  %2462 = vrot.lane.b32.xlu0 %v8831_v12, %s7169_s20  ;;  %v2037_v12 = vsub.f32 %v8307_v62, %v8546_v26  ;;  %v2074_v27 = vmul.f32 1.442695, %v2056_v60  ;;  %v2060_v62 = vmul.f32 %v8650_v57, %v2043_v7  ;;  %v2044_v26 = vsub.f32 %v8365_v50, %v8569_v46 }
 0x368   : > { %v8835_v20 = vpop.eup %6512  ;;  %v2047_v60 = vsub.f32 %v8391_v63, %v8588_v56  ;;  %v10124_v7 = vmov 1  }
 0x369   : > { %2384 = vrot.lane.b32.xlu1 %v8835_v20, %s7168_s18  ;;  %v2054_v52 = vmul.f32 %v8650_v57, %v2037_v12  ;;  %6516 = vpow2.f32 %v2074_v27  ;;  %5994 = vset.pattern.permute.xlu0 %v10124_v7  ;;  %s5153_s18 = scalar_lea.sflag [#allocation15], %s7382_s0 }
 0x36a   : > { %6518 = vpow2.f32 %v2076_v45  ;;  %v2061_v45 = vmul.f32 %v8650_v57, %v2044_v26  ;;  %5995 = vset.pattern.permute.xlu1 %v10124_v7  ;;  %v2064_v63 = vmul.f32 %v8650_v57, %v2047_v60 }
 0x36b   : > { %v2070_v30 = vmul.f32 1.442695, %v2054_v52  ;;  %v2082_v52 = vmul.f32 1.442695, %v2060_v62 }
 0x36c   : > { %v8839_v41 = vpop.eup %6514  ;;  %v2084_v46 = vmul.f32 1.442695, %v2061_v45 }
 0x36d   : > { %10323 = vst [vmem:[#allocation185_spill] sm:$0xff] %v8839_v41  ;;  %2464 = vrot.lane.b32.xlu1 %v8839_v41, %s7169_s20  ;;  %v2038_v41 = vsub.f32 %v8328_v23, %v8555_v6  ;;  %6520 = vpow2.f32 %v2070_v30  ;;  %s7047_s20 = scalar_lea.vmem %s9890_s25, 2048 }
 0x36e   : > { %p7048_p9 = scmp.ne.s32.totalorder %s9890_s25, %s7047_s20 }
 0x36f   : > { %v2055_v10 = vmul.f32 %v8650_v57, %v2038_v41 }
 0x370   : > { %p7049_p4 = pnand %p7048_p9, %p10553_p11 }
 0x371   : > { %v2072_v8 = vmul.f32 1.442695, %v2055_v10 }
 0x372   : > { %p7050_p12 = pneg %p7049_p4 }
 0x373   : > { %6522 = vpow2.f32 %v2072_v8 }
 0x374   : > { %6524 = vpow2.f32 %v2082_v52  ;;  %v2048_v52 = vsub.f32 %v8422_v16, %v8597_v44  ;;  %v2062_v44 = vmul.f32 %v8650_v57, %v2045_v29 }
 0x376   : > { %v8864_v6 = vpop.eup %6516  ;;  %v2065_v36 = vmul.f32 %v8650_v57, %v2048_v52 }
 0x377   : > { %v8873_v59 = vpop.eup %6518 }
 0x37a   : > { %v8880_v10 = vpop.eup %6520 }
 0x380   : > { %v8887_v45 = vpop.eup %6522 }
 0x388   : > { %v8857_v14 = vpop.xlane.xlu0 %2716 }
 0x389   : > { %10324 = vst [vmem:[#allocation186_spill] sm:$0xff] %v8857_v14  ;;  %v6170_v14 = vld [vmem:[#allocation10 + $0x58] sm:$0xff]  }
 0x393   : > { %v8866_v53 = vpop.xlane.xlu1 %2714 }
 0x394   : > { %10325 = vst [vmem:[#allocation187_spill] sm:$0xff] %v8866_v53  ;;  %v6171_v53 = vld [vmem:[#allocation10 + $0x18] sm:$0xff]  }
 0x39d   : > { %v2363_v23 = vpop.permute.xlu0 %2362 }
 0x39e   : > { %v2408_v30 = vadd.f32 %v8864_v6, %v2363_v23  ;;  %v2080_v23 = vmul.f32 1.442695, %v2059_v28 }
 0x3a1   : > { %v2443_v4 = vpop.permute.xlu0 %2442 }
 0x3a2   : > { %v2488_v27 = vadd.f32 %v2443_v4, %v2408_v30  ;;  %v2090_v30 = vmul.f32 1.442695, %v2064_v63 }
 0x3a3   : > { %v2365_v50 = vpop.permute.xlu1 %2364 }
 0x3a4   : > { %6526 = vrcp.f32 %v2488_v27  ;;  %v2409_v41 = vadd.f32 %v8873_v59, %v2365_v50  ;;  %v8892_v50 = vpop.eup %6524 }
 0x3a5   : > { %v2359_v12 = vpop.permute.xlu0 %2358  ;;  %6528 = vpow2.f32 %v2084_v46 }
 0x3a6   : > { %v2406_v51 = vadd.f32 %v8880_v10, %v2359_v12  ;;  %6530 = vpow2.f32 %v2078_v25 }
 0x3a7   : > { %v2445_v62 = vpop.permute.xlu1 %2444 }
 0x3a8   : > { %v2489_v8 = vadd.f32 %v2445_v62, %v2409_v41  ;;  %v2092_v41 = vmul.f32 1.442695, %v2065_v36  ;;  %v2046_v62 = vsub.f32 %v8436_v15, %v8611_v43 }
 0x3a9   : > { %v2439_v56 = vpop.permute.xlu0 %2438 }
 0x3aa   : > { %6532 = vrcp.f32 %v2489_v8  ;;  %v2486_v26 = vadd.f32 %v2439_v56, %v2406_v51  ;;  %v2086_v51 = vmul.f32 1.442695, %v2062_v44  ;;  %v2051_v8 = vsub.f32 %v8449_v11, %v8616_v39 }
 0x3ab   : > { %v2361_v19 = vpop.permute.xlu1 %2360  ;;  %v2063_v52 = vmul.f32 %v8650_v57, %v2046_v62 }
 0x3ac   : > { %6534 = vrcp.f32 %v2486_v26  ;;  %v2407_v27 = vadd.f32 %v8887_v45, %v2361_v19  ;;  %v2068_v11 = vmul.f32 %v8650_v57, %v2051_v8 }
 0x3ad   : > { %v2371_v4 = vpop.permute.xlu0 %2370  ;;  %6536 = vpow2.f32 %v2080_v23 }
 0x3ae   : > { %v2412_v25 = vadd.f32 %v8892_v50, %v2371_v4  ;;  %6538 = vpow2.f32 %v2090_v30 }
 0x3af   : > { %v2441_v46 = vpop.permute.xlu1 %2440 }
 0x3b0   : > { %v2487_v60 = vadd.f32 %v2441_v46, %v2407_v27  ;;  %v2088_v27 = vmul.f32 1.442695, %v2063_v52  ;;  %v2052_v46 = vsub.f32 %v8474_v42, %v8625_v38 }
 0x3b1   : > { %v8896_v16 = vpop.eup %6526  ;;  %v2451_v12 = vpop.permute.xlu0 %2450 }
 0x3b2   : > { %6540 = vrcp.f32 %v2487_v60  ;;  %v2492_v49 = vadd.f32 %v2451_v12, %v2412_v25  ;;  %2570 = vrot.lane.b32.xlu0 %v8896_v16, %s7170_s24  ;;  %v8903_v28 = vpop.eup %6528  ;;  %v2098_v25 = vmul.f32 1.442695, %v2068_v11  ;;  %v2049_v60 = vsub.f32 %v8464_v61, %v8630_v35 }
 0x3b3   : > { %v2373_v55 = vpop.permute.xlu1 %2372  ;;  %v8907_v56 = vpop.eup %6530  ;;  %v2069_v62 = vmul.f32 %v8650_v57, %v2052_v46 }
 0x3b4   : > { %6542 = vrcp.f32 %v2492_v49  ;;  %v2413_v26 = vadd.f32 %v8903_v28, %v2373_v55  ;;  %v2066_v61 = vmul.f32 %v8650_v57, %v2049_v60 }
 0x3b5   : > { %v2367_v63 = vpop.permute.xlu0 %2366  ;;  %6544 = vpow2.f32 %v2092_v41 }
 0x3b6   : > { %v2410_v15 = vadd.f32 %v8907_v56, %v2367_v63  ;;  %6546 = vpow2.f32 %v2086_v51 }
 0x3b7   : > { %v8910_v19 = vpop.eup %6532  ;;  %v2453_v23 = vpop.permute.xlu1 %2452 }
 0x3b8   : > { %v2493_v43 = vadd.f32 %v2453_v23, %v2413_v26  ;;  %2572 = vrot.lane.b32.xlu1 %v8910_v19, %s7170_s24  ;;  %v2100_v26 = vmul.f32 1.442695, %v2069_v62  ;;  %v2050_v23 = vsub.f32 %v8485_v17, %v8639_v22 }
 0x3b9   : > { %v8916_v30 = vpop.eup %6534  ;;  %v2447_v39 = vpop.permute.xlu0 %2446 }
 0x3ba   : > { %6548 = vrcp.f32 %v2493_v43  ;;  %v2490_v29 = vadd.f32 %v2447_v39, %v2410_v15  ;;  %2566 = vrot.lane.b32.xlu0 %v8916_v30, %s7170_s24  ;;  %v8923_v36 = vpop.eup %6536  ;;  %v2094_v15 = vmul.f32 1.442695, %v2066_v61 }
 0x3bb   : > { %v2369_v4 = vpop.permute.xlu1 %2368  ;;  %v8927_v12 = vpop.eup %6538 }
 0x3bc   : > { %6550 = vrcp.f32 %v2490_v29  ;;  %v2411_v49 = vadd.f32 %v8923_v36, %v2369_v4 }
 0x3bd   : > { %v2379_v44 = vpop.permute.xlu0 %2378  ;;  %6552 = vpow2.f32 %v2088_v27  ;;  %v2067_v27 = vmul.f32 %v8650_v57, %v2050_v23 }
 0x3be   : > { %v2416_v42 = vadd.f32 %v8927_v12, %v2379_v44  ;;  %6554 = vpow2.f32 %v2098_v25 }
 0x3bf   : > { %v8930_v55 = vpop.eup %6540  ;;  %v2449_v41 = vpop.permute.xlu1 %2448 }
 0x3c0   : > { %v2491_v38 = vadd.f32 %v2449_v41, %v2411_v49  ;;  %2568 = vrot.lane.b32.xlu1 %v8930_v55, %s7170_s24  ;;  %v2096_v49 = vmul.f32 1.442695, %v2067_v27 }
 0x3c1   : > { %v8936_v51 = vpop.eup %6542  ;;  %v2459_v35 = vpop.permute.xlu0 %2458 }
 0x3c2   : > { %6556 = vrcp.f32 %v2491_v38  ;;  %v2496_v8 = vadd.f32 %v2459_v35, %v2416_v42  ;;  %2578 = vrot.lane.b32.xlu0 %v8936_v51, %s7170_s24  ;;  %v8943_v52 = vpop.eup %6544 }
 0x3c3   : > { %v2381_v63 = vpop.permute.xlu1 %2380  ;;  %v8945_v11 = vpop.eup %6546 }
 0x3c4   : > { %6558 = vrcp.f32 %v2496_v8  ;;  %v2417_v39 = vadd.f32 %v8943_v52, %v2381_v63 }
 0x3c5   : > { %v2375_v43 = vpop.permute.xlu0 %2374  ;;  %6560 = vpow2.f32 %v2100_v26 }
 0x3c6   : > { %v2414_v46 = vadd.f32 %v8945_v11, %v2375_v43  ;;  %6562 = vpow2.f32 %v2094_v15 }
 0x3c7   : > { %v8948_v29 = vpop.eup %6548  ;;  %v2461_v4 = vpop.permute.xlu1 %2460 }
 0x3c8   : > { %v2497_v25 = vadd.f32 %v2461_v4, %v2417_v39  ;;  %2580 = vrot.lane.b32.xlu1 %v8948_v29, %s7170_s24 }
 0x3c9   : > { %v8954_v17 = vpop.eup %6550  ;;  %v2455_v22 = vpop.permute.xlu0 %2454 }
 0x3ca   : > { %6564 = vrcp.f32 %v2497_v25  ;;  %v2494_v60 = vadd.f32 %v2455_v22, %v2414_v46  ;;  %2574 = vrot.lane.b32.xlu0 %v8954_v17, %s7170_s24  ;;  %v8958_v41 = vpop.eup %6552 }
 0x3cb   : > { %v2377_v44 = vpop.permute.xlu1 %2376  ;;  %v8960_v62 = vpop.eup %6554 }
 0x3cc   : > { %6566 = vrcp.f32 %v2494_v60  ;;  %v2415_v42 = vadd.f32 %v8958_v41, %v2377_v44 }
 0x3cd   : > { %v2387_v57 = vpop.permute.xlu0 %2386  ;;  %6568 = vpow2.f32 %v2096_v49 }
 0x3ce   : > { %v2420_v35 = vadd.f32 %v8960_v62, %v2387_v57 }
 0x3cf   : > { %v8963_v38 = vpop.eup %6556  ;;  %v2457_v61 = vpop.permute.xlu1 %2456 }
 0x3d0   : > { %v2495_v8 = vadd.f32 %v2457_v61, %v2415_v42  ;;  %2576 = vrot.lane.b32.xlu1 %v8963_v38, %s7170_s24 }
 0x3d1   : > { %v8968_v63 = vpop.eup %6558  ;;  %v2467_v26 = vpop.permute.xlu0 %2466 }
 0x3d2   : > { %10326 = vst [vmem:[#allocation188_spill] sm:$0xff] %v8968_v63  ;;  %6570 = vrcp.f32 %v2495_v8  ;;  %v2500_v23 = vadd.f32 %v2467_v26, %v2420_v35  ;;  %2586 = vrot.lane.b32.xlu0 %v8968_v63, %s7170_s24  ;;  %v8972_v43 = vpop.eup %6560 }
 0x3d3   : > { %v2389_v15 = vpop.permute.xlu1 %2388  ;;  %v8974_v4 = vpop.eup %6562 }
 0x3d4   : > { %6572 = vrcp.f32 %v2500_v23  ;;  %v2421_v27 = vadd.f32 %v8972_v43, %v2389_v15 }
 0x3d5   : > { %v2383_v39 = vpop.permute.xlu0 %2382 }
 0x3d6   : > { %v2418_v22 = vadd.f32 %v8974_v4, %v2383_v39 }
 0x3d7   : > { %v8977_v46 = vpop.eup %6564  ;;  %v2469_v25 = vpop.permute.xlu1 %2468 }
 0x3d8   : > { %10327 = vst [vmem:[#allocation189_spill] sm:$0xff] %v8977_v46  ;;  %v2501_v60 = vadd.f32 %v2469_v25, %v2421_v27  ;;  %2588 = vrot.lane.b32.xlu1 %v8977_v46, %s7170_s24 }
 0x3d9   : > { %v8982_v44 = vpop.eup %6566  ;;  %v2463_v49 = vpop.permute.xlu0 %2462 }
 0x3da   : > { %6574 = vrcp.f32 %v2501_v60  ;;  %v2498_v57 = vadd.f32 %v2463_v49, %v2418_v22  ;;  %2582 = vrot.lane.b32.xlu0 %v8982_v44, %s7170_s24  ;;  %v8986_v61 = vpop.eup %6568  ;;  %v6162_v22 = vld [vmem:[#allocation10 + $0x78] sm:$0xff]   ;;  %v6164_v49 = vld [vmem:[#allocation10 + $0x70] sm:$0xff]  }
 0x3db   : > { %v2385_v42 = vpop.permute.xlu1 %2384  ;;  %5635 = vmatprep.subr.bf16.mxu1 %v6162_v22  ;;  %v6163_v60 = vld [vmem:[#allocation10 + $0x38] sm:$0xff]  }
 0x3dc   : > { %6576 = vrcp.f32 %v2498_v57  ;;  %v2419_v35 = vadd.f32 %v8986_v61, %v2385_v42  ;;  %5636 = vmatpush3.bf16.msra.mxu1 %v6163_v60  ;;  %v6165_v57 = vld [vmem:[#allocation10 + $0x30] sm:$0xff]   ;;  %v6166_v42 = vld [vmem:[#allocation10 + $0x68] sm:$0xff]  }
 0x3dd   : > { %5637 = vmatprep.subr.bf16.mxu1 %v6164_v49  ;;  %v6172_v49 = vld [vmem:[#allocation10 + $0x50] sm:$0xff]  }
 0x3df   : > { %v8989_v8 = vpop.eup %6570  ;;  %v2465_v26 = vpop.permute.xlu1 %2464 }
 0x3e0   : > { %10328 = vst [vmem:[#allocation190_spill] sm:$0xff] %v8989_v8  ;;  %v2499_v23 = vadd.f32 %v2465_v26, %v2419_v35  ;;  %2584 = vrot.lane.b32.xlu1 %v8989_v8, %s7170_s24  ;;  %5638 = vmatpush3.bf16.msra.mxu1 %v6165_v57  ;;  %v6167_v35 = vld [vmem:[#allocation10 + $0x28] sm:$0xff]   ;;  %v6168_v26 = vld [vmem:[#allocation10 + $0x60] sm:$0xff]   ;;  %v6173_v57 = vld [vmem:[#allocation10 + $0x10] sm:$0xff]  }
 0x3e1   : > { %v8993_v15 = vpop.eup %6572  ;;  %5639 = vmatprep.subr.bf16.mxu1 %v6166_v42  ;;  %v6174_v42 = vld [vmem:[#allocation10 + $0x48] sm:$0xff]  }
 0x3e2   : > { %10329 = vst [vmem:[#allocation191_spill] sm:$0xff] %v8993_v15  ;;  %6578 = vrcp.f32 %v2499_v23  ;;  %2594 = vrot.lane.b32.xlu0 %v8993_v15, %s7170_s24  ;;  %v6169_v23 = vld [vmem:[#allocation10 + $0x20] sm:$0xff]  }
 0x3e4   : > { %5640 = vmatpush3.bf16.msra.mxu1 %v6167_v35 }
 0x3e5   : > { %5641 = vmatprep.subr.bf16.mxu1 %v6168_v26  ;;  %v6175_v26 = vld [vmem:[#allocation10 + $0x8] sm:$0xff]  }
 0x3e7   : > { %v8997_v39 = vpop.eup %6574 }
 0x3e8   : > { %10330 = vst [vmem:[#allocation192_spill] sm:$0xff] %v8997_v39  ;;  %2596 = vrot.lane.b32.xlu1 %v8997_v39, %s7170_s24  ;;  %5642 = vmatpush3.bf16.msra.mxu1 %v6169_v23 }
 0x3e9   : > { %v9001_v27 = vpop.eup %6576  ;;  %5643 = vmatprep.subr.bf16.mxu1 %v6170_v14  ;;  %v6176_v14 = vld [vmem:[#allocation10 + $0x40] sm:$0xff]  }
 0x3ea   : > { %10331 = vst [vmem:[#allocation193_spill] sm:$0xff] %v9001_v27  ;;  %2590 = vrot.lane.b32.xlu0 %v9001_v27, %s7170_s24 }
 0x3ec   : > { %5644 = vmatpush3.bf16.msra.mxu1 %v6171_v53  ;;  %v6177_v53 = vld [vmem:[#allocation10] sm:$0xff]  }
 0x3ed   : > { %5645 = vmatprep.subr.bf16.mxu1 %v6172_v49  ;;  %v6182_v49 = vld [vmem:[#allocation9 + $0x68] sm:$0xff]  }
 0x3ef   : > { %v9005_v25 = vpop.eup %6578 }
 0x3f0   : > { %10332 = vst [vmem:[#allocation194_spill] sm:$0xff] %v9005_v25  ;;  %2592 = vrot.lane.b32.xlu1 %v9005_v25, %s7170_s24  ;;  %5646 = vmatpush3.bf16.msra.mxu1 %v6173_v57  ;;  %v6183_v57 = vld [vmem:[#allocation9 + $0x28] sm:$0xff]   ;;  %s7174_s24 = smov [#allocation14]  }
 0x3f1   : > { %5647 = vmatprep.subr.bf16.mxu1 %v6174_v42  ;;  %v6184_v42 = vld [vmem:[#allocation9 + $0x60] sm:$0xff]  }
 0x3f4   : > { %5648 = vmatpush3.bf16.msra.mxu1 %v6175_v26 }
 0x3f5   : > { %5649 = vmatprep.subr.bf16.mxu1 %v6176_v14 }
 0x3f8   : > { %5650 = vmatpush3.bf16.msra.mxu1 %v6177_v53 }
 0x424   : > { %v2571_v7 = vpop.permute.xlu0 %2570 }
 0x425   : > { %v2616_v13 = vmul.f32 %v8668_v48, %v2571_v7 }
 0x427   : > { %3698 = vperm.xlu0 %5994, %v2616_v13  }
 0x42a   : > { %v2573_v22 = vpop.permute.xlu1 %2572 }
 0x42b   : > { %v2617_v60 = vmul.f32 %v8682_v3, %v2573_v22  ;;  %v6178_v22 = vld [vmem:[#allocation9 + $0x78] sm:$0xff]  }
 0x42c   : > { %v2567_v15 = vpop.permute.xlu0 %2566  ;;  %5699 = vmatprep.subr.bf16.mxu0 %v6178_v22 }
 0x42d   : > { %v2614_v35 = vmul.f32 %v8688_v54, %v2567_v15  ;;  %3703 = vperm.xlu1 %5995, %v2617_v60   ;;  %v10333_v54 = vmov 0   ;;  %v6180_v60 = vld [vmem:[#allocation9 + $0x70] sm:$0xff]  }
 0x42f   : > { %3688 = vperm.xlu0 %5994, %v2614_v35   ;;  %v6886_v35 = vld [vmem:[%s7389_s21 + $0x78] sm:$0xff] }
 0x430   : > { %v2709_v26 = vmul.f32 %v6886_v35, %v6886_v35 }
 0x432   : > { %v2569_v48 = vpop.permute.xlu1 %2568 }
 0x433   : > { %v2615_v13 = vmul.f32 %v8706_v5, %v2569_v48  ;;  %v6179_v5 = vld [vmem:[#allocation9 + $0x38] sm:$0xff]   ;;  %v6887_v48 = vld [vmem:[%s7389_s21 + $0x70] sm:$0xff] }
 0x434   : > { %v2579_v7 = vpop.permute.xlu0 %2578  ;;  %5700 = vmatpush3.bf16.msra.mxu0 %v6179_v5  ;;  %v10334_v5 = vmov 1  }
 0x435   : > { %v2620_v3 = vmul.f32 %v8712_v18, %v2579_v7  ;;  %3693 = vperm.xlu1 %5995, %v2615_v13   ;;  %v6181_v18 = vld [vmem:[#allocation9 + $0x30] sm:$0xff]   ;;  %5701 = vmatprep.subr.bf16.mxu0 %v6180_v60  ;;  %v2708_v13 = vmul.f32 %v6887_v48, %v6887_v48  ;;  %v2535_v7 = vmul.f32 %v8930_v55, %v8887_v45  ;;  %v6187_v45 = vld [vmem:[#allocation9 + $0x18] sm:$0xff]  }
 0x436   : > { %v2534_v60 = vmul.f32 %v8916_v30, %v8880_v10  ;;  %v6189_v10 = vld [vmem:[#allocation9 + $0x10] sm:$0xff]   ;;  %v2537_v48 = vmul.f32 %v8910_v19, %v8873_v59  ;;  %v5496_v59 = vmul.f32 -1.442695, %v7749_v47 }
 0x437   : > { %3718 = vperm.xlu0 %5994, %v2620_v3  }
 0x438   : > { %5702 = vmatpush3.bf16.msra.mxu0 %v6181_v18  ;;  %v6186_v18 = vld [vmem:[#allocation9 + $0x58] sm:$0xff]  }
 0x439   : > { %5997 = vset.pattern.permute.xlu1 %v10333_v54  ;;  %5703 = vmatprep.subr.bf16.mxu0 %v6182_v49 }
 0x43a   : > { %v2581_v14 = vpop.permute.xlu1 %2580 }
 0x43b   : > { %v2621_v22 = vmul.f32 %v8730_v21, %v2581_v14  ;;  %v6188_v21 = vld [vmem:[#allocation9 + $0x50] sm:$0xff]  }
 0x43c   : > { %v2575_v15 = vpop.permute.xlu0 %2574  ;;  %5704 = vmatpush3.bf16.msra.mxu0 %v6183_v57 }
 0x43d   : > { %v2618_v23 = vmul.f32 %v8736_v40, %v2575_v15  ;;  %v6185_v40 = vld [vmem:[#allocation9 + $0x20] sm:$0xff]   ;;  %5705 = vmatprep.subr.bf16.mxu0 %v6184_v42  ;;  %v2536_v15 = vmul.f32 %v8896_v16, %v8864_v6  ;;  %v2539_v6 = vmul.f32 %v8963_v38, %v8923_v36  ;;  %v6190_v36 = vld [vmem:[#allocation9 + $0x48] sm:$0xff]  }
 0x43f   : > { %3708 = vperm.xlu0 %5994, %v2618_v23  }
 0x440   : > { %5706 = vmatpush3.bf16.msra.mxu0 %v6185_v40  ;;  %v5500_v40 = vmul.f32 -1.442695, %v7783_v31 }
 0x441   : > { %5707 = vmatprep.subr.bf16.mxu0 %v6186_v18  ;;  %v10335_v18 = vld [vmem:[#allocation50_spill] sm:$0xff] }
 0x442   : > { %v2577_v53 = vpop.permute.xlu1 %2576  ;;  %6580 = vpow2.f32 %v5500_v40 }
 0x443   : > { %5996 = vset.pattern.permute.xlu0 %v10333_v54  ;;  %v2619_v42 = vmul.f32 %v8754_v32, %v2577_v53  ;;  %v5502_v32 = vmul.f32 -1.442695, %v7798_v24  ;;  %v6191_v53 = vld [vmem:[#allocation9 + $0x8] sm:$0xff]  }
 0x444   : > { %v2587_v49 = vpop.permute.xlu0 %2586  ;;  %5708 = vmatpush3.bf16.msra.mxu0 %v6187_v45  ;;  %v5498_v45 = vmul.f32 -1.442695, %v10335_v18 }
 0x445   : > { %5709 = vmatprep.subr.bf16.mxu0 %v6188_v21  ;;  %6582 = vpow2.f32 %v5502_v32  ;;  %v10337_v21 = vld [vmem:[#allocation52_spill] sm:$0xff]  ;;  %v2547_v32 = vmul.f32 %v9005_v25, %v8986_v61 }
 0x446   : > { %6584 = vpow2.f32 %v5496_v59 }
 0x448   : > { %5710 = vmatpush3.bf16.msra.mxu0 %v6189_v10 }
 0x449   : > { %5711 = vmatprep.subr.bf16.mxu0 %v6190_v36 }
 0x44a   : > { %v9021_v3 = vpop.permute.xlu1 %2588 }
 0x44c   : > { %v2583_v35 = vpop.permute.xlu0 %2582  ;;  %5712 = vmatpush3.bf16.msra.mxu0 %v6191_v53 }
 0x44d   : > { %v2622_v10 = vmul.f32 %v8784_v37, %v2583_v35  ;;  %v2625_v35 = vmul.f32 %v8778_v9, %v9021_v3 }
 0x44f   : > { %v6581_v37 = vpop.eup %6580 }
 0x452   : > { %v2585_v23 = vpop.permute.xlu1 %2584 }
 0x453   : > { %v2623_v40 = vmul.f32 %v8801_v2, %v2585_v23  ;;  %v2538_v2 = vmul.f32 %v8954_v17, %v8907_v56 }
 0x454   : > { %v2595_v14 = vpop.permute.xlu0 %2594 }
 0x459   : > { %2740 = vadd.xlane.f32.xlu1 %v2709_v26 }
 0x45a   : > { %v9029_v57 = vpop.permute.xlu1 %2596 }
 0x45c   : > { %v2591_v9 = vpop.permute.xlu0 %2590 }
 0x45d   : > { %v2626_v56 = vmul.f32 %v8823_v33, %v2591_v9  ;;  %v6194_v33 = vld [vmem:[#allocation12 + $0x78] sm:$0xff]  }
 0x45e   : > { %2738 = vadd.xlane.f32.xlu0 %v2708_v13  ;;  %5859 = vmatprep.subr.bf16.mxu1 %v6194_v33 }
 0x462   : > { %v2593_v26 = vpop.permute.xlu1 %2592 }
 0x463   : > { %v2627_v13 = vmul.f32 %v8835_v20, %v2593_v26  ;;  %v2628_v20 = vmul.f32 %v8806_v1, %v2595_v14  ;;  %v5499_v26 = vmul.f32 -1.442695, %v10337_v21 }
 0x46a   : > { %3277 = vperm.xlu1 %5997, %v2535_v7   ;;  %v6192_v7 = vld [vmem:[#allocation9 + $0x40] sm:$0xff]  }
 0x46b   : > { %5713 = vmatprep.subr.bf16.mxu0 %v6192_v7 }
 0x46e   : > { %3282 = vperm.xlu1 %5997, %v2536_v15   ;;  %v6193_v15 = vld [vmem:[#allocation9] sm:$0xff]  }
 0x46f   : > { %5714 = vmatpush3.bf16.msra.mxu0 %v6193_v15 }
 0x470   : > { %5763 = vmatprep.subr.bf16.mxu0 %v6194_v33 }
 0x472   : > { %5998 = vset.pattern.permute.xlu1 %v10334_v5 }
 0x473   : > { %3723 = vperm.xlu1 %5998, %v2621_v22   ;;  %v2624_v22 = vmul.f32 %v8760_v34, %v2587_v49  ;;  %v10338_v34 = vld [vmem:[#allocation54_spill] sm:$0xff]  ;;  %v2542_v49 = vmul.f32 %v8982_v44, %v8945_v11  ;;  %v6583_v11 = vpop.eup %6582 }
 0x474   : > { %3272 = vperm.xlu0 %5996, %v2534_v60   ;;  %v5497_v60 = vmul.f32 -1.442695, %v7756_v58  ;;  %v5501_v1 = vmul.f32 -1.442695, %v10338_v34  ;;  %v3532_v36 = vadd.f32 1.0, %v6583_v11  ;;  %v6585_v14 = vpop.eup %6584 }
 0x475   : > { %v3526_v3 = vadd.f32 1.0, %v6585_v14 }
 0x476   : > { %6586 = vpow2.f32 %v5497_v60 }
 0x477   : > { %3713 = vperm.xlu1 %5998, %v2619_v42   ;;  %v10336_v42 = vld [vmem:[#allocation59_spill] sm:$0xff]  ;;  %6588 = vpow2.f32 %v5498_v45  ;;  %v2540_v45 = vmul.f32 %v8936_v51, %v8892_v50 }
 0x478   : > { %3297 = vperm.xlu0 %5996, %v2539_v6   ;;  %v5503_v6 = vmul.f32 -1.442695, %v10336_v42 }
 0x47a   : > { %6590 = vpow2.f32 %v5503_v6 }
 0x47b   : > { %5999 = vset.pattern.permute.xlu1 %v10333_v54  ;;  %6592 = vpow2.f32 %v5499_v26 }
 0x47c   : > { %3287 = vperm.xlu1 %5999, %v2537_v48   ;;  %6003 = vset.pattern.permute.xlu0 %v10334_v5  ;;  %6594 = vpow2.f32 %v5501_v1  ;;  %v2545_v48 = vmul.f32 %v8977_v46, %v8943_v52  ;;  %v2549_v52 = vmul.f32 %v8997_v39, %v8972_v43 }
 0x47d   : > { %3753 = vperm.xlu0 %6003, %v2627_v13   ;;  %v3530_v13 = vadd.f32 1.0, %v6581_v37 }
 0x47f   : > { %6596 = vrcp.f32 %v3530_v13 }
 0x480   : > { %6000 = vset.pattern.permute.xlu1 %v10334_v5  ;;  %6598 = vrcp.f32 %v3532_v36 }
 0x481   : > { %3738 = vperm.xlu1 %6000, %v2624_v22   ;;  %3758 = vperm.xlu0 %6003, %v2628_v20   ;;  %6600 = vrcp.f32 %v3526_v3 }
 0x483   : > { %v6587_v23 = vpop.eup %6586 }
 0x484   : > { %v6589_v53 = vpop.eup %6588  ;;  %v3527_v15 = vadd.f32 1.0, %v6587_v23 }
 0x485   : > { %3728 = vperm.xlu1 %6000, %v2622_v10   ;;  %6006 = vset.pattern.permute.xlu0 %v10333_v54  ;;  %v3528_v22 = vadd.f32 1.0, %v6589_v53  ;;  %v2629_v10 = vmul.f32 %v8819_v0, %v9029_v57  ;;  %v10341_v53 = vld [vmem:[#allocation22_spill] sm:$0xff] }
 0x486   : > { %3312 = vperm.xlu0 %6006, %v2542_v49   ;;  %6602 = vrcp.f32 %v3527_v15  ;;  %v5467_v9 = vmul.f32 -1.442695, %v10341_v53  ;;  %v10345_v15 = vld [vmem:[#allocation63_spill] sm:$0xff] }
 0x487   : > { %v6591_v61 = vpop.eup %6590  ;;  %6604 = vrcp.f32 %v3528_v22  ;;  %v10347_v22 = vld [vmem:[#allocation23_spill] sm:$0xff] }
 0x488   : > { %v6593_v7 = vpop.eup %6592  ;;  %v3533_v20 = vadd.f32 1.0, %v6591_v61 }
 0x489   : > { %3733 = vperm.xlu1 %6000, %v2623_v40   ;;  %v6595_v59 = vpop.eup %6594  ;;  %v3529_v43 = vadd.f32 1.0, %v6593_v7  ;;  %v10344_v7 = vld [vmem:[#allocation61_spill] sm:$0xff] }
 0x48a   : > { %3327 = vperm.xlu0 %6006, %v2545_v48   ;;  %v3531_v60 = vadd.f32 1.0, %v6595_v59  ;;  %6606 = vrcp.f32 %v3533_v20  ;;  %v10339_v48 = vld [vmem:[#allocation68_spill] sm:$0xff]  ;;  %v10346_v59 = vld [vmem:[#allocation65_spill] sm:$0xff] }
 0x48b   : > { %6608 = vrcp.f32 %v3529_v43 }
 0x48c   : > { %6610 = vrcp.f32 %v3531_v60  ;;  %v6597_v6 = vpop.eup %6596  ;;  %v2546_v60 = vmul.f32 %v9001_v27, %v8974_v4  ;;  %v9115_v4 = vld [vmem:[#allocation12 + $0x70] sm:$0xff]  }
 0x48d   : > { %3743 = vperm.xlu1 %6000, %v2625_v35   ;;  %v6599_v26 = vpop.eup %6598  ;;  %v3626_v50 = vmul.f32 %v6597_v6, %v7783_v31  ;;  %v10340_v35 = vld [vmem:[#allocation74_spill] sm:$0xff]  ;;  %v2543_v31 = vmul.f32 %v8989_v8, %v8958_v41  ;;  %v2544_v41 = vmul.f32 %v8968_v63, %v8927_v12  ;;  %6612 = vpow2.f32 %v5467_v9 }
 0x48e   : > { %3337 = vperm.xlu0 %6006, %v2547_v32   ;;  %v6601_v1 = vpop.eup %6600 }
 0x48f   : > { %v3658_v37 = vmul.f32 %v3626_v50, %v10339_v48  ;;  %v10351_v48 = vld [vmem:[#allocation191_spill] sm:$0xff] }
 0x491   : > { %6001 = vset.pattern.permute.xlu1 %v10333_v54 }
 0x492   : > { %3292 = vperm.xlu1 %6001, %v2538_v2   ;;  %3347 = vperm.xlu0 %6006, %v2549_v52  }
 0x496   : > { %6002 = vset.pattern.permute.xlu1 %v10334_v5  ;;  %2630 = vrot.lane.b32.xlu0 %v8916_v30, %s7171_s23  ;;  %v2541_v30 = vmul.f32 %v8948_v29, %v8903_v28 }
 0x497   : > { %3748 = vperm.xlu1 %6002, %v2626_v56   ;;  %v5471_v56 = vmul.f32 -1.442695, %v10347_v22 }
 0x499   : > { %6614 = vpow2.f32 %v5471_v56 }
 0x49a   : > { %2636 = vrot.lane.b32.xlu0 %v8910_v19, %s7171_s23  ;;  %v3628_v19 = vmul.f32 %v6599_v26, %v7798_v24  ;;  %v10349_v26 = vld [vmem:[#allocation25_spill] sm:$0xff] }
 0x49b   : > { %6004 = vset.pattern.permute.xlu1 %v10333_v54  ;;  %v5475_v50 = vmul.f32 -1.442695, %v10349_v26 }
 0x49c   : > { %3302 = vperm.xlu1 %6004, %v2540_v45   ;;  %v3660_v11 = vmul.f32 %v3628_v19, %v10340_v35 }
 0x49d   : > { %6616 = vpow2.f32 %v5475_v50  ;;  %v10366_v50 = vld [vmem:[#allocation88_spill] sm:$0xff] }
 0x49e   : > { %2640 = vrot.lane.b32.xlu0 %v8963_v38, %s7171_s23  ;;  %v6603_v38 = vpop.eup %6602 }
 0x49f   : > { %v6605_v28 = vpop.eup %6604  ;;  %v3623_v36 = vmul.f32 %v6603_v38, %v7756_v58  ;;  %v9110_v38 = vld [vmem:[#allocation12 + $0x38] sm:$0xff]  }
 0x4a0   : > { %3307 = vperm.xlu1 %6004, %v2541_v30   ;;  %v6607_v40 = vpop.eup %6606  ;;  %v3624_v14 = vmul.f32 %v6605_v28, %v10335_v18  ;;  %v10350_v28 = vld [vmem:[#allocation27_spill] sm:$0xff] }
 0x4a1   : > { %v3629_v57 = vmul.f32 %v6607_v40, %v10336_v42  ;;  %v10343_v42 = vld [vmem:[#allocation58_spill] sm:$0xff]  ;;  %v3655_v58 = vmul.f32 %v3623_v36, %v10344_v7  ;;  %v5479_v40 = vmul.f32 -1.442695, %v10350_v28 }
 0x4a2   : > { %2644 = vrot.lane.b32.xlu0 %v8948_v29, %s7171_s23  ;;  %v3699_v49 = vpop.permute.xlu0 %3698  ;;  %v6609_v29 = vpop.eup %6608  ;;  %v3656_v18 = vmul.f32 %v3624_v14, %v10345_v15 }
 0x4a3   : > { %v6611_v24 = vpop.eup %6610  ;;  %v3770_v13 = vmul.f32 %v3699_v49, %v3658_v37  ;;  %v3625_v2 = vmul.f32 %v6609_v29, %v10337_v21  ;;  %v2548_v37 = vmul.f32 %v10351_v48, %v8960_v62  ;;  %6618 = vpow2.f32 %v5479_v40  ;;  %v10352_v29 = vld [vmem:[#allocation62_spill] sm:$0xff]  ;;  %v10353_v62 = vld [vmem:[#allocation64_spill] sm:$0xff] }
 0x4a4   : > { %6005 = vset.pattern.permute.xlu1 %v10334_v5  ;;  %v3622_v5 = vmul.f32 %v6601_v1, %v7749_v47  ;;  %v3627_v23 = vmul.f32 %v6611_v24, %v10338_v34  ;;  %v10348_v34 = vld [vmem:[#allocation71_spill] sm:$0xff]  ;;  %v10368_v40 = vld [vmem:[#allocation90_spill] sm:$0xff] }
 0x4a5   : > { %3763 = vperm.xlu1 %6005, %v2629_v10   ;;  %v3657_v21 = vmul.f32 %v3625_v2, %v10346_v59  ;;  %v9128_v24 = vld [vmem:[#allocation12 + $0x28] sm:$0xff]   ;;  %v9139_v2 = vld [vmem:[#allocation12 + $0x20] sm:$0xff]  }
 0x4a6   : > { %v3654_v3 = vmul.f32 %v3622_v5, %v10343_v42  ;;  %v3659_v20 = vmul.f32 %v3627_v23, %v10348_v34  ;;  %v6613_v23 = vpop.eup %6612 }
 0x4a7   : > { %v3113_v7 = vadd.f32 1.0, %v6613_v23  ;;  %v9179_v23 = vld [vmem:[#allocation12] sm:$0xff]  }
 0x4a8   : > { %v3704_v32 = vpop.permute.xlu1 %3703  ;;  %v3771_v19 = vmul.f32 %v3699_v49, %v3659_v20  ;;  %v9118_v49 = vld [vmem:[#allocation12 + $0x30] sm:$0xff]   ;;  %10371 = vst [vmem:[#allocation68_spill] sm:$0xff] %v9179_v23 }
 0x4a9   : > { %v3772_v0 = vmul.f32 %v3704_v32, %v3660_v11  ;;  %6007 = vset.pattern.permute.xlu1 %v10333_v54  ;;  %v10342_v54 = vld [vmem:[#allocation76_spill] sm:$0xff]  ;;  %v9121_v11 = vld [vmem:[#allocation12 + $0x68] sm:$0xff]  }
 0x4aa   : > { %3317 = vperm.xlu1 %6007, %v2543_v31   ;;  %v3661_v61 = vmul.f32 %v3629_v57, %v10342_v54  ;;  %v3689_v47 = vpop.permute.xlu0 %3688  ;;  %v5505_v31 = vmul.f32 -1.442695, %v10353_v62  ;;  %v10355_v57 = vld [vmem:[#allocation73_spill] sm:$0xff] }
 0x4ab   : > { %v3800_v52 = vpack.c.bf16 %v3772_v0, %v3770_v13  ;;  %v3766_v45 = vmul.f32 %v3689_v47, %v3654_v3  ;;  %v3767_v33 = vmul.f32 %v3689_v47, %v3655_v58  ;;  %v9131_v13 = vld [vmem:[#allocation12 + $0x60] sm:$0xff]   ;;  %v10354_v0 = vld [vmem:[#allocation67_spill] sm:$0xff]  ;;  %v5508_v36 = vmul.f32 -1.442695, %v10355_v57  ;;  %v9143_v54 = vld [vmem:[#allocation12 + $0x58] sm:$0xff]  }
 0x4ac   : > { %v3773_v43 = vmul.f32 %v3704_v32, %v3661_v61  ;;  %v5504_v32 = vmul.f32 -1.442695, %v10352_v29  ;;  %v5506_v5 = vmul.f32 -1.442695, %v10354_v0  ;;  %v6615_v61 = vpop.eup %6614  ;;  %v10358_v47 = vld [vmem:[#allocation81_spill] sm:$0xff] }
 0x4ad   : > { %v5511_v42 = vmul.f32 -1.442695, %v10358_v47  ;;  %v6617_v3 = vpop.eup %6616  ;;  %v9150_v58 = vld [vmem:[#allocation12 + $0x18] sm:$0xff]   ;;  %v3117_v15 = vadd.f32 1.0, %v6615_v61  ;;  %v10372_v61 = vld [vmem:[#allocation94_spill] sm:$0xff] }
 0x4ae   : > { %3322 = vperm.xlu1 %6007, %v2544_v41   ;;  %v3801_v35 = vpack.c.bf16 %v3773_v43, %v3771_v19  ;;  %6620 = vpow2.f32 %v5504_v32  ;;  %v10357_v41 = vld [vmem:[#allocation78_spill] sm:$0xff]  ;;  %v3121_v34 = vadd.f32 1.0, %v6617_v3  ;;  %v9160_v43 = vld [vmem:[#allocation12 + $0x10] sm:$0xff]   ;;  %v5514_v19 = vmul.f32 -1.442695, %v10366_v50 }
 0x4af   : > { %6622 = vpow2.f32 %v5505_v31  ;;  %v5510_v9 = vmul.f32 -1.442695, %v10357_v41  ;;  %10362 = vst [vmem:[#allocation50_spill] sm:$0xff] %v9160_v43  ;;  %v10370_v32 = vld [vmem:[#allocation92_spill] sm:$0xff] }
 0x4b0   : > { %v3694_v12 = vpop.permute.xlu1 %3693  ;;  %6624 = vpow2.f32 %v5506_v5  ;;  %v6619_v59 = vpop.eup %6618  ;;  %v5516_v31 = vmul.f32 -1.442695, %v10370_v32 }
 0x4b1   : > { %v3768_v30 = vmul.f32 %v3694_v12, %v3656_v18  ;;  %v3769_v6 = vmul.f32 %v3694_v12, %v3657_v21  ;;  %6626 = vpow2.f32 %v5508_v36  ;;  %v9153_v18 = vld [vmem:[#allocation12 + $0x50] sm:$0xff]   ;;  %v10360_v21 = vld [vmem:[#allocation31_spill] sm:$0xff]  ;;  %v3125_v12 = vadd.f32 1.0, %v6619_v59 }
 0x4b2   : > { %3332 = vperm.xlu1 %6007, %v2546_v60   ;;  %v5483_v56 = vmul.f32 -1.442695, %v10360_v21  ;;  %v9163_v60 = vld [vmem:[#allocation12 + $0x48] sm:$0xff]   ;;  %v10381_v21 = vld [vmem:[#allocation108_spill] sm:$0xff] }
 0x4b3   : > { %v3798_v10 = vpack.c.bf16 %v3768_v30, %v3766_v45  ;;  %v3799_v1 = vpack.c.bf16 %v3769_v6, %v3767_v33  ;;  %10363 = vst [vmem:[#allocation59_spill] sm:$0xff] %v9163_v60  ;;  %v10364_v45 = vld [vmem:[#allocation84_spill] sm:$0xff]  ;;  %v10365_v30 = vld [vmem:[#allocation86_spill] sm:$0xff] }
 0x4b4   : > { %v5512_v33 = vmul.f32 -1.442695, %v10364_v45  ;;  %v5513_v6 = vmul.f32 -1.442695, %v10365_v30 }
 0x4b5   : > { %3974 = vmatprep.mubr.bf16.mxu1 %v3799_v1 }
 0x4b6   : > { %3342 = vperm.xlu1 %6007, %v2548_v37   ;;  %3975 = vmatmul.mubr.bf16.vlgmr.msra.gmra.mxu1 %v3798_v10  ;;  %v9171_v10 = vld [vmem:[#allocation12 + $0x8] sm:$0xff]   ;;  %v5515_v37 = vmul.f32 -1.442695, %v10368_v40 }
 0x4b7   : > { %3982 = vmatprep.mubr.bf16.mxu1 %v3801_v35  ;;  %5867 = vmatpush3.bf16.msra.mxu1 %v9110_v38  ;;  %10367 = vst [vmem:[#allocation52_spill] sm:$0xff] %v9171_v10  ;;  %v9175_v35 = vld [vmem:[#allocation12 + $0x40] sm:$0xff]  }
 0x4b8   : > { %5860 = vmatprep.subr.bf16.mxu1 %v9115_v4  ;;  %10369 = vst [vmem:[#allocation54_spill] sm:$0xff] %v9175_v35 }
 0x4ba   : > { %2632 = vrot.lane.b32.xlu1 %v8930_v55, %s7171_s23  ;;  %v10356_v55 = vld [vmem:[#allocation75_spill] sm:$0xff] }
 0x4bb   : > { %5868 = vmatpush3.bf16.msra.mxu1 %v9118_v49  ;;  %v5509_v14 = vmul.f32 -1.442695, %v10356_v55 }
 0x4bc   : > { %5861 = vmatprep.subr.bf16.mxu1 %v9121_v11 }
 0x4bd   : > { %6628 = vpow2.f32 %v5509_v14 }
 0x4be   : > { %2634 = vrot.lane.b32.xlu1 %v8896_v16, %s7171_s23  ;;  %3983 = vmatmul.mubr.bf16.gmra.mxu1 %v3800_v52  ;;  %v10359_v16 = vld [vmem:[#allocation70_spill] sm:$0xff]  ;;  %6630 = vpow2.f32 %v5510_v9 }
 0x4bf   : > { %5869 = vmatpush3.bf16.msra.mxu1 %v9128_v24  ;;  %v5507_v52 = vmul.f32 -1.442695, %v10359_v16  ;;  %6632 = vpow2.f32 %v5511_v42  ;;  %v5517_v42 = vmul.f32 -1.442695, %v10372_v61 }
 0x4c0   : > { %5862 = vmatprep.subr.bf16.mxu1 %v9131_v13 }
 0x4c1   : > { %6634 = vpow2.f32 %v5507_v52 }
 0x4c2   : > { %2638 = vrot.lane.b32.xlu1 %v8954_v17, %s7171_s23  ;;  %6636 = vrcp.f32 %v3113_v7  ;;  %v10361_v17 = vld [vmem:[#allocation36_spill] sm:$0xff] }
 0x4c3   : > { %5870 = vmatpush3.bf16.msra.mxu1 %v9139_v2  ;;  %v5487_v20 = vmul.f32 -1.442695, %v10361_v17  ;;  %6638 = vrcp.f32 %v3117_v15 }
 0x4c4   : > { %5863 = vmatprep.subr.bf16.mxu1 %v9143_v54  ;;  %6640 = vpow2.f32 %v5483_v56 }
 0x4c5   : > { %6642 = vrcp.f32 %v3121_v34 }
 0x4c6   : > { %2642 = vrot.lane.b32.xlu1 %v8936_v51, %s7171_s23  ;;  %v6621_v51 = vpop.eup %6620  ;;  %6644 = vpow2.f32 %v5487_v20 }
 0x4c7   : > { %5871 = vmatpush3.bf16.msra.mxu1 %v9150_v58  ;;  %v6623_v1 = vpop.eup %6622  ;;  %6646 = vrcp.f32 %v3125_v12  ;;  %v3534_v5 = vadd.f32 1.0, %v6621_v51 }
 0x4c8   : > { %5864 = vmatprep.subr.bf16.mxu1 %v9153_v18  ;;  %6648 = vpow2.f32 %v5512_v33  ;;  %v3535_v14 = vadd.f32 1.0, %v6623_v1  ;;  %v10373_v1 = vld [vmem:[#allocation41_spill] sm:$0xff] }
 0x4c9   : > { %6650 = vpow2.f32 %v5513_v6 }
 0x4ca   : > { %2646 = vrot.lane.b32.xlu1 %v8982_v44, %s7171_s23  ;;  %v6625_v44 = vpop.eup %6624  ;;  %6652 = vpow2.f32 %v5514_v19 }
 0x4cb   : > { %5872 = vmatpush3.bf16.msra.mxu1 %v9160_v43  ;;  %v6627_v36 = vpop.eup %6626  ;;  %6654 = vpow2.f32 %v5515_v37  ;;  %v3536_v3 = vadd.f32 1.0, %v6625_v44  ;;  %v5491_v37 = vmul.f32 -1.442695, %v10373_v1  ;;  %v10375_v44 = vld [vmem:[#allocation96_spill] sm:$0xff] }
 0x4cc   : > { %5865 = vmatprep.subr.bf16.mxu1 %v9163_v60  ;;  %v6629_v9 = vpop.eup %6628  ;;  %6656 = vpow2.f32 %v5516_v31  ;;  %v3538_v15 = vadd.f32 1.0, %v6627_v36 }
 0x4cd   : > { %v6631_v52 = vpop.eup %6630  ;;  %6658 = vrcp.f32 %v3534_v5  ;;  %v3539_v56 = vadd.f32 1.0, %v6629_v9  ;;  %v5518_v5 = vmul.f32 -1.442695, %v10375_v44 }
 0x4ce   : > { %v6633_v7 = vpop.eup %6632  ;;  %6660 = vrcp.f32 %v3535_v14  ;;  %v3540_v20 = vadd.f32 1.0, %v6631_v52  ;;  %v10377_v14 = vld [vmem:[#allocation98_spill] sm:$0xff]  ;;  %v10378_v52 = vld [vmem:[#allocation100_spill] sm:$0xff] }
 0x4cf   : > { %5873 = vmatpush3.bf16.msra.mxu1 %v9171_v10  ;;  %v6635_v59 = vpop.eup %6634  ;;  %6662 = vpow2.f32 %v5517_v42  ;;  %v3541_v33 = vadd.f32 1.0, %v6633_v7  ;;  %v5519_v9 = vmul.f32 -1.442695, %v10377_v14  ;;  %v10392_v10 = vld [vmem:[#allocation85_spill] sm:$0xff] }
 0x4d0   : > { %5866 = vmatprep.subr.bf16.mxu1 %v9175_v35  ;;  %v6637_v34 = vpop.eup %6636  ;;  %6664 = vrcp.f32 %v3536_v3  ;;  %v3537_v51 = vadd.f32 1.0, %v6635_v59  ;;  %v5520_v3 = vmul.f32 -1.442695, %v10378_v52  ;;  %v10395_v52 = vld [vmem:[#allocation93_spill] sm:$0xff] }
 0x4d1   : > { %v9184_v12 = vpop.eup %6638  ;;  %6666 = vrcp.f32 %v3538_v15  ;;  %v10379_v15 = vld [vmem:[#allocation103_spill] sm:$0xff] }
 0x4d2   : > { %v9186_v6 = vpop.eup %6640  ;;  %6668 = vrcp.f32 %v3539_v56  ;;  %v5521_v59 = vmul.f32 -1.442695, %v10379_v15  ;;  %v10380_v56 = vld [vmem:[#allocation106_spill] sm:$0xff] }
 0x4d3   : > { %5874 = vmatpush3.bf16.msra.mxu1 %v9179_v23  ;;  %v9188_v19 = vpop.eup %6642  ;;  %6670 = vrcp.f32 %v3540_v20  ;;  %v5522_v25 = vmul.f32 -1.442695, %v10380_v56  ;;  %v10396_v56 = vld [vmem:[#allocation95_spill] sm:$0xff] }
 0x4d4   : > { %v9191_v31 = vpop.eup %6644  ;;  %6672 = vrcp.f32 %v3541_v33 }
 0x4d5   : > { %10374 = vst [vmem:[#allocation74_spill] sm:$0xff] %v9191_v31  ;;  %v9194_v36 = vpop.eup %6646  ;;  %6674 = vrcp.f32 %v3537_v51  ;;  %v9200_v51 = vpop.permute.xlu0 %3718  ;;  %v10383_v31 = vld [vmem:[#allocation187_spill] sm:$0xff] }
 0x4d6   : > { %10376 = vst [vmem:[#allocation22_spill] sm:$0xff] %v9194_v36  ;;  %v6649_v42 = vpop.eup %6648  ;;  %6676 = vpow2.f32 %v5491_v37  ;;  %v5523_v36 = vmul.f32 -1.442695, %v10381_v21  ;;  %vm2758_vm9 = vcmp.eq.f32.partialorder %v10383_v31, inf  ;;  %vm2760_vm12 = vcmp.eq.f32.partialorder %v10383_v31, 0.0 }
 0x4d7   : > { %v6651_v7 = vpop.eup %6650  ;;  %6678 = vpow2.f32 %v5518_v5  ;;  %v3542_v48 = vadd.f32 1.0, %v6649_v42 }
 0x4d8   : > { %v6653_v39 = vpop.eup %6652  ;;  %6680 = vpow2.f32 %v5519_v9  ;;  %v3543_v27 = vadd.f32 1.0, %v6651_v7 }
 0x4d9   : > { %v6655_v20 = vpop.eup %6654  ;;  %6682 = vpow2.f32 %v5520_v3  ;;  %v3544_v8 = vadd.f32 1.0, %v6653_v39  ;;  %v9205_v3 = vpop.permute.xlu0 %3708 }
 0x4da   : > { %v6657_v46 = vpop.eup %6656  ;;  %6684 = vpow2.f32 %v5521_v59  ;;  %v3545_v1 = vadd.f32 1.0, %v6655_v20  ;;  %v3209_v20 = vmul.f32 %v6637_v34, %v10341_v53 }
 0x4db   : > { %v6659_v33 = vpop.eup %6658  ;;  %6686 = vpow2.f32 %v5522_v25  ;;  %v3546_v17 = vadd.f32 1.0, %v6657_v46 }
 0x4dc   : > { %v6661_v63 = vpop.eup %6660  ;;  %6688 = vrcp.f32 %v3542_v48  ;;  %v3630_v46 = vmul.f32 %v6659_v33, %v10352_v29  ;;  %v10385_v29 = vld [vmem:[#allocation113_spill] sm:$0xff]  ;;  %v10386_v33 = vld [vmem:[#allocation24_spill] sm:$0xff] }
 0x4dd   : > { %v6663_v37 = vpop.eup %6662  ;;  %6690 = vrcp.f32 %v3543_v27  ;;  %v3631_v28 = vmul.f32 %v6661_v63, %v10353_v62  ;;  %v5525_v34 = vmul.f32 -1.442695, %v10385_v29  ;;  %v3241_v63 = vmul.f32 %v3209_v20, %v10386_v33  ;;  %v10389_v20 = vld [vmem:[#allocation46_spill] sm:$0xff] }
 0x4de   : > { %v6665_v5 = vpop.eup %6664  ;;  %6692 = vrcp.f32 %v3544_v8  ;;  %v3547_v7 = vadd.f32 1.0, %v6663_v37  ;;  %v10382_v8 = vld [vmem:[#allocation110_spill] sm:$0xff] }
 0x4df   : > { %v6667_v9 = vpop.eup %6666  ;;  %6694 = vrcp.f32 %v3545_v1  ;;  %v3632_v23 = vmul.f32 %v6665_v5, %v10354_v0  ;;  %v5524_v35 = vmul.f32 -1.442695, %v10382_v8  ;;  %v10387_v5 = vld [vmem:[#allocation186_spill] sm:$0xff] }
 0x4e0   : > { %v6669_v39 = vpop.eup %6668  ;;  %6696 = vrcp.f32 %v3546_v17  ;;  %v3634_v53 = vmul.f32 %v6667_v9, %v10355_v57  ;;  %vm2765_vm8 = vcmp.eq.f32.partialorder %v10387_v5, inf  ;;  %vm2767_vm11 = vcmp.eq.f32.partialorder %v10387_v5, 0.0 }
 0x4e1   : > { %v6671_v59 = vpop.eup %6670  ;;  %6698 = vpow2.f32 %v5523_v36  ;;  %v3635_v17 = vmul.f32 %v6669_v39, %v10356_v55  ;;  %v10388_v55 = vld [vmem:[#allocation115_spill] sm:$0xff] }
 0x4e2   : > { %v9203_v42 = vpop.xlane.xlu1 %2740  ;;  %v6673_v25 = vpop.eup %6672  ;;  %6700 = vrsqrt.f32 %v10383_v31  ;;  %v3636_v62 = vmul.f32 %v6671_v59, %v10357_v41  ;;  %v5526_v9 = vmul.f32 -1.442695, %v10388_v55  ;;  %v5495_v41 = vmul.f32 -1.442695, %v10389_v20  ;;  %v10390_v59 = vld [vmem:[#allocation79_spill] sm:$0xff] }
 0x4e3   : > { %v6675_v48 = vpop.eup %6674  ;;  %6702 = vrcp.f32 %v3547_v7  ;;  %v3637_v0 = vmul.f32 %v6673_v25, %v10358_v47  ;;  %v3662_v47 = vmul.f32 %v3630_v46, %v10390_v59  ;;  %v10391_v25 = vld [vmem:[#allocation82_spill] sm:$0xff]  ;;  %vm2849_vm14 = vcmp.eq.f32.partialorder %v9203_v42, inf }
 0x4e4   : > { %v9215_v37 = vpop.eup %6676  ;;  %6704 = vrsqrt.f32 %v10387_v5  ;;  %v3633_v57 = vmul.f32 %v6675_v48, %v10359_v16  ;;  %v3663_v33 = vmul.f32 %v3631_v28, %v10391_v25  ;;  %v10394_v48 = vld [vmem:[#allocation91_spill] sm:$0xff]  ;;  %v3668_v60 = vmul.f32 %v3636_v62, %v10395_v52  ;;  %v10398_v25 = vld [vmem:[#allocation118_spill] sm:$0xff] }
 0x4e5   : > { %10384 = vst [vmem:[#allocation76_spill] sm:$0xff] %v9215_v37  ;;  %v6679_v36 = vpop.eup %6678  ;;  %v9226_v37 = vmul.f32 %v9184_v12, %v10347_v22  ;;  %v3664_v22 = vmul.f32 %v3632_v23, %v10392_v10  ;;  %v10393_v12 = vld [vmem:[#allocation89_spill] sm:$0xff]  ;;  %v3667_v55 = vmul.f32 %v3635_v17, %v10394_v48  ;;  %v3669_v43 = vmul.f32 %v3637_v0, %v10396_v56  ;;  %v10397_v28 = vld [vmem:[#allocation87_spill] sm:$0xff]  ;;  %v10399_v0 = vld [vmem:[#allocation32_spill] sm:$0xff] }
 0x4e6   : > { %v3278_v27 = vpop.permute.xlu1 %3277  ;;  %v6681_v8 = vpop.eup %6680  ;;  %v3666_v16 = vmul.f32 %v3634_v53, %v10393_v12  ;;  %v3548_v15 = vadd.f32 1.0, %v6679_v36  ;;  %v5527_v10 = vmul.f32 -1.442695, %v10398_v25  ;;  %v10401_v48 = vld [vmem:[#allocation30_spill] sm:$0xff]  ;;  %vm2851_vm15 = vcmp.eq.f32.partialorder %v9203_v42, 0.0 }
 0x4e7   : > { %v9213_v1 = vpop.xlane.xlu0 %2738  ;;  %v6683_v7 = vpop.eup %6682  ;;  %v3549_v59 = vadd.f32 1.0, %v6681_v8  ;;  %v3779_v17 = vmul.f32 %v9200_v51, %v3667_v55  ;;  %v3352_v8 = vmul.f32 %v3278_v27, %v10399_v0  ;;  %v3353_v12 = vmul.f32 %v3278_v27, %v3241_v63 }
 0x4e8   : > { %6706 = vrsqrt.f32 %v9213_v1  ;;  %v6685_v29 = vpop.eup %6684  ;;  %v9247_v53 = vmul.f32 %v9200_v51, %v3666_v16  ;;  %v3550_v25 = vadd.f32 1.0, %v6683_v7  ;;  %v3774_v63 = vmul.f32 %v9205_v3, %v3662_v47 }
 0x4e9   : > { %6708 = vpow2.f32 %v5524_v35  ;;  %v6687_v21 = vpop.eup %6686  ;;  %v3665_v35 = vmul.f32 %v3633_v57, %v10397_v28  ;;  %v10400_v57 = vld [vmem:[#allocation28_spill] sm:$0xff]  ;;  %v9269_v47 = vadd.f32 1.0, %v9186_v6  ;;  %vm2842_vm10 = vcmp.eq.f32.partialorder %v9213_v1, inf }
 0x4ea   : > { %v9231_v39 = vpop.permute.xlu1 %3282  ;;  %6710 = vpow2.f32 %v5525_v34  ;;  %v6689_v46 = vpop.eup %6688  ;;  %vm2844_vm13 = vcmp.eq.f32.partialorder %v9213_v1, 0.0 }
 0x4eb   : > { %6712 = vrsqrt.f32 %v9203_v42  ;;  %v9244_v34 = vpop.eup %6690 }
 0x4ec   : > { %6714 = vpow2.f32 %v5526_v9  ;;  %v6693_v62 = vpop.eup %6692 }
 0x4ed   : > { %v9255_v20 = vpop.eup %6694  ;;  %6716 = vrcp.f32 %v3548_v15 }
 0x4ee   : > { %v3724_v23 = vpop.permute.xlu1 %3723  ;;  %6718 = vrcp.f32 %v3549_v59 }
 0x4ef   : > { %v9250_v52 = vmul.f32 %v3724_v23, %v3668_v60  ;;  %v3781_v56 = vmul.f32 %v3724_v23, %v3669_v43  ;;  %v3273_v36 = vpop.permute.xlu0 %3272  ;;  %v9259_v60 = vpop.eup %6696  ;;  %v3551_v43 = vadd.f32 1.0, %v6685_v29  ;;  %6720 = vpow2.f32 %v5495_v41 }
 0x4f0   : > { %v3350_v9 = vmul.f32 %v3273_v36, %v10400_v57  ;;  %v3351_v28 = vmul.f32 %v3273_v36, %v10401_v48  ;;  %v6699_v27 = vpop.eup %6698  ;;  %v3775_v36 = vmul.f32 %v9205_v3, %v3663_v33  ;;  %6722 = vpow2.f32 %v5527_v10 }
 0x4f1   : > { %v3804_v16 = vpack.c.bf16 %v9250_v52, %v9247_v53  ;;  %v3805_v51 = vpack.c.bf16 %v3781_v56, %v3779_v17  ;;  %v6701_v15 = vpop.eup %6700  ;;  %v3552_v17 = vadd.f32 1.0, %v6687_v21  ;;  %6724 = vrcp.f32 %v3550_v25 }
 0x4f2   : > { %v3382_v55 = vpack.c.bf16 %v3352_v8, %v3350_v9  ;;  %v3383_v23 = vpack.c.bf16 %v3353_v12, %v3351_v28  ;;  %v3714_v0 = vpop.permute.xlu1 %3713  ;;  %v9263_v7 = vpop.eup %6702  ;;  %v10402_v8 = vld [vmem:[#allocation26_spill] sm:$0xff]  ;;  %6726 = vrcp.f32 %v3551_v43  ;;  %v3553_v41 = vadd.f32 1.0, %v6699_v27 }
 0x4f3   : > { %v3776_v57 = vmul.f32 %v3714_v0, %v3664_v22  ;;  %v3777_v48 = vmul.f32 %v3714_v0, %v3665_v35  ;;  %v6705_v29 = vpop.eup %6704  ;;  %v3245_v12 = vmul.f32 %v9226_v37, %v10402_v8  ;;  %v2757_v33 = vmul.f32 %v6701_v15, %v10383_v31  ;;  %v10403_v35 = vld [vmem:[#allocation33_spill] sm:$0xff]  ;;  %v10404_v37 = vld [vmem:[#allocation35_spill] sm:$0xff] }
 0x4f4   : > { %4216 = vmatprep.mubr.bf16.mxu0 %v3383_v23  ;;  %v3354_v10 = vmul.f32 %v9231_v39, %v10403_v35  ;;  %v3355_v25 = vmul.f32 %v9231_v39, %v10404_v37  ;;  %v3638_v43 = vmul.f32 %v6689_v46, %v10364_v45  ;;  %6728 = vrcp.f32 %v3552_v17 }
 0x4f5   : > { %v3802_v56 = vpack.c.bf16 %v3776_v57, %v3774_v63  ;;  %v3803_v59 = vpack.c.bf16 %v3777_v48, %v3775_v36  ;;  %4217 = vmatmul.mubr.bf16.vlgmr.msra.gmra.mxu0 %v3382_v55  ;;  %v6707_v3 = vpop.eup %6706  ;;  %v2764_v55 = vmul.f32 %v6705_v29, %v10387_v5  ;;  %v3639_v63 = vmul.f32 %v9244_v34, %v10365_v30  ;;  %v10407_v29 = vld [vmem:[#allocation99_spill] sm:$0xff] }
 0x4f6   : > { %5764 = vmatpush3.bf16.msra.mxu0 %v9110_v38  ;;  %v6709_v22 = vpop.eup %6708  ;;  %v10405_v38 = vld [vmem:[#allocation37_spill] sm:$0xff]  ;;  %v2841_v23 = vmul.f32 %v6707_v3, %v9213_v1  ;;  %v3640_v45 = vmul.f32 %v6693_v62, %v10366_v50  ;;  %v2759_v46 = vsel %vm2758_vm9, %v10383_v31, %v2757_v33  ;;  %6730 = vrcp.f32 %v3553_v41 }
 0x4f7   : > { %v3288_v21 = vpop.permute.xlu1 %3287  ;;  %3990 = vmatprep.mubr.bf16.mxu1 %v3803_v59  ;;  %5765 = vmatprep.subr.bf16.mxu0 %v9115_v4  ;;  %v6711_v6 = vpop.eup %6710  ;;  %v2761_v36 = vand.u32 2147483648, %v10383_v31  ;;  %v2766_v30 = vsel %vm2765_vm8, %v10387_v5, %v2764_v55  ;;  %v3554_v62 = vadd.f32 1.0, %v6709_v22  ;;  %v3641_v31 = vmul.f32 %v9255_v20, %v10368_v40  ;;  %v10412_v55 = vld [vmem:[#allocation112_spill] sm:$0xff] }
 0x4f8   : > { %v3356_v9 = vmul.f32 %v3288_v21, %v10405_v38  ;;  %v3357_v28 = vmul.f32 %v3288_v21, %v3245_v12  ;;  %3991 = vmatmul.mubr.bf16.gmra.mxu1 %v3802_v56  ;;  %v6713_v4 = vpop.eup %6712  ;;  %v2843_v48 = vsel %vm2842_vm10, %v9213_v1, %v2841_v23  ;;  %v3555_v17 = vadd.f32 1.0, %v6711_v6  ;;  %v10406_v56 = vld [vmem:[#allocation97_spill] sm:$0xff]  ;;  %v10408_v21 = vld [vmem:[#allocation102_spill] sm:$0xff] }
 0x4f9   : > { %3998 = vmatprep.mubr.bf16.mxu1 %v3805_v51  ;;  %v6715_v27 = vpop.eup %6714  ;;  %v2768_v51 = vand.u32 2147483648, %v10387_v5  ;;  %v2848_v50 = vmul.f32 %v6713_v4, %v9203_v42  ;;  %v9301_v57 = vsel %vm2760_vm12, %v2761_v36, %v2759_v46  ;;  %v3670_v59 = vmul.f32 %v3638_v43, %v10406_v56  ;;  %v10413_v23 = vld [vmem:[#allocation114_spill] sm:$0xff]  ;;  %v3298_v36 = vpop.permute.xlu0 %3297  ;;  %v10419_v56 = vld [vmem:[#allocation103_spill] sm:$0xff] }
 0x4fa   : > { %v3384_v0 = vpack.c.bf16 %v3356_v9, %v3354_v10  ;;  %v3385_v39 = vpack.c.bf16 %v3357_v28, %v3355_v25  ;;  %5766 = vmatpush3.bf16.msra.mxu0 %v9118_v49  ;;  %v6717_v34 = vpop.eup %6716  ;;  %v3671_v8 = vmul.f32 %v3639_v63, %v10407_v29  ;;  %v3642_v12 = vmul.f32 %v9259_v60, %v10370_v32  ;;  %v10410_v25 = vld [vmem:[#allocation107_spill] sm:$0xff]  ;;  %v10420_v29 = vld [vmem:[#allocation108_spill] sm:$0xff] }
 0x4fb   : > { %5767 = vmatprep.subr.bf16.mxu0 %v9121_v11  ;;  %v2845_v11 = vand.u32 2147483648, %v9213_v1  ;;  %v6719_v15 = vpop.eup %6718  ;;  %v3556_v3 = vadd.f32 1.0, %v6715_v27  ;;  %v9317_v41 = vsel %vm2767_vm11, %v2768_v51, %v2766_v30  ;;  %v2856_v20 = vmax.f32 %v9301_v57, 1e-12 }
 0x4fc   : > { %v9293_v49 = vpop.permute.xlu1 %3738  ;;  %4224 = vmatprep.mubr.bf16.mxu0 %v3385_v39  ;;  %v9323_v40 = vpop.eup %6720  ;;  %v2850_v32 = vsel %vm2849_vm14, %v9203_v42, %v2848_v50  ;;  %v3644_v33 = vmul.f32 %v6717_v34, %v10375_v44  ;;  %6732 = vrcp.f32 %v3554_v62  ;;  %v3672_v53 = vmul.f32 %v3640_v45, %v10408_v21  ;;  %v10409_v44 = vld [vmem:[#allocation105_spill] sm:$0xff]  ;;  %v10414_v62 = vld [vmem:[#allocation50_spill] sm:$0xff] }
 0x4fd   : > { %4225 = vmatmul.mubr.bf16.gmra.mxu0 %v3384_v0  ;;  %v9331_v5 = vsel %vm2844_vm13, %v2845_v11, %v2843_v48  ;;  %v6723_v60 = vpop.eup %6722  ;;  %v2852_v52 = vand.u32 2147483648, %v9203_v42  ;;  %6734 = vrcp.f32 %v3555_v17  ;;  %v3673_v22 = vmul.f32 %v3641_v31, %v10409_v44  ;;  %v10416_v48 = vld [vmem:[#allocation106_spill] sm:$0xff]  ;;  %v10417_v31 = vld [vmem:[#allocation59_spill] sm:$0xff]  ;;  %v10418_v17 = vld [vmem:[#allocation100_spill] sm:$0xff] }
 0x4fe   : > { %5768 = vmatpush3.bf16.msra.mxu0 %v9128_v24  ;;  %6736 = vrcp.f32 %v3556_v3  ;;  %v2868_v10 = vmax.f32 %v9331_v5, 1e-12  ;;  %v3674_v38 = vmul.f32 %v3642_v12, %v10410_v25  ;;  %v3676_v4 = vmul.f32 %v3644_v33, %v10412_v55  ;;  %v10421_v3 = vld [vmem:[#allocation42_spill] sm:$0xff] }
 0x4ff   : > { %5769 = vmatprep.subr.bf16.mxu0 %v9131_v13  ;;  %v3643_v13 = vmul.f32 %v9263_v7, %v10372_v61  ;;  %v3645_v61 = vmul.f32 %v6719_v15, %v10377_v14  ;;  %v2857_v7 = vmax.f32 %v9317_v41, 1e-12  ;;  %v9342_v35 = vsel %vm2851_vm15, %v2852_v52, %v2850_v32  ;;  %v10411_v14 = vld [vmem:[#allocation109_spill] sm:$0xff]  ;;  %v10424_v52 = vld [vmem:[#allocation52_spill] sm:$0xff] }
 0x500   : > { %v3729_v24 = vpop.permute.xlu1 %3728  ;;  %3999 = vmatmul.mubr.bf16.gmra.mxu1 %v3804_v16  ;;  %v6725_v16 = vpop.eup %6724  ;;  %6738 = vrcp.f32 %v2856_v20  ;;  %v2869_v39 = vmax.f32 %v9342_v35, 1e-12  ;;  %v3217_v27 = vmul.f32 %v9188_v19, %v10349_v26  ;;  %v10415_v26 = vld [vmem:[#allocation29_spill] sm:$0xff]  ;;  %v10422_v20 = vld [vmem:[#allocation39_spill] sm:$0xff] }
 0x501   : > { %v6727_v1 = vpop.eup %6726  ;;  %v3675_v9 = vmul.f32 %v3643_v13, %v10411_v14  ;;  %v3782_v6 = vmul.f32 %v3729_v24, %v3670_v59  ;;  %v3783_v42 = vmul.f32 %v3729_v24, %v3671_v8  ;;  %v3677_v0 = vmul.f32 %v3645_v61, %v10413_v23  ;;  %v10425_v61 = vld [vmem:[#allocation74_spill] sm:$0xff] }
 0x502   : > { %5770 = vmatpush3.bf16.msra.mxu0 %v9139_v2  ;;  %v3557_v2 = vadd.f32 1.0, %v6723_v60  ;;  %v6729_v28 = vpop.eup %6728  ;;  %6740 = vrcp.f32 %v2857_v7  ;;  %v3249_v19 = vmul.f32 %v3217_v27, %v10415_v26  ;;  %v3647_v59 = vmul.f32 %v6727_v1, %v10419_v56  ;;  %v10423_v60 = vld [vmem:[#allocation40_spill] sm:$0xff] }
 0x503   : > { %5771 = vmatprep.subr.bf16.mxu0 %v9143_v54  ;;  %6742 = vrcp.f32 %v2868_v10  ;;  %v6731_v51 = vpop.eup %6730  ;;  %v3787_v30 = vmul.f32 %v9293_v49, %v3675_v9  ;;  %v3648_v15 = vmul.f32 %v6729_v28, %v10416_v48  ;;  %v3360_v24 = vmul.f32 %v3298_v36, %v10421_v3  ;;  %v10426_v7 = vld [vmem:[#allocation120_spill] sm:$0xff]  ;;  %v10427_v10 = vld [vmem:[#allocation54_spill] sm:$0xff]  ;;  %v10430_v9 = vld [vmem:[#allocation121_spill] sm:$0xff] }
 0x504   : > { %v3734_v37 = vpop.permute.xlu1 %3733  ;;  %6744 = vrcp.f32 %v3557_v2  ;;  %v3649_v8 = vmul.f32 %v6731_v51, %v10420_v29  ;;  %v3361_v13 = vmul.f32 %v3298_v36, %v3249_v19  ;;  %v10428_v2 = vld [vmem:[#allocation116_spill] sm:$0xff]  ;;  %v10433_v51 = vld [vmem:[#allocation27_spill] sm:$0xff]  ;;  %v10434_v36 = vld [vmem:[#allocation22_spill] sm:$0xff]  ;;  %v3141_v48 = vadd.f32 1.0, %v9323_v40 }
 0x505   : > { %v3784_v43 = vmul.f32 %v3734_v37, %v3672_v53  ;;  %v3785_v54 = vmul.f32 %v3734_v37, %v3673_v22  ;;  %6746 = vrcp.f32 %v2869_v39  ;;  %v3754_v53 = vpop.permute.xlu0 %3753  ;;  %v3680_v1 = vmul.f32 %v3648_v15, %v10426_v7  ;;  %v10432_v27 = vld [vmem:[#allocation76_spill] sm:$0xff]  ;;  %v10437_v15 = vld [vmem:[#allocation110_spill] sm:$0xff]  ;;  %v10441_v3 = vld [vmem:[#allocation115_spill] sm:$0xff] }
 0x506   : > { %5772 = vmatpush3.bf16.msra.mxu0 %v9150_v58  ;;  %v3786_v58 = vmul.f32 %v9293_v49, %v3674_v38  ;;  %6748 = vrcp.f32 %v9269_v47  ;;  %v3646_v49 = vmul.f32 %v6725_v16, %v10418_v17  ;;  %v3133_v16 = vadd.f32 1.0, %v10425_v61  ;;  %v10429_v38 = vld [vmem:[#allocation119_spill] sm:$0xff]  ;;  %v10445_v61 = vld [vmem:[#allocation44_spill] sm:$0xff] }
 0x507   : > { %5773 = vmatprep.subr.bf16.mxu0 %v9153_v18  ;;  %v3806_v63 = vpack.c.bf16 %v3784_v43, %v3782_v6  ;;  %v3807_v45 = vpack.c.bf16 %v3785_v54, %v3783_v42  ;;  %v3679_v14 = vmul.f32 %v3647_v59, %v10429_v38  ;;  %v3681_v28 = vmul.f32 %v3649_v8, %v10430_v9  ;;  %v10438_v17 = vld [vmem:[#allocation147_spill] sm:$0xff]  ;;  %v10439_v59 = vld [vmem:[#allocation34_spill] sm:$0xff]  ;;  %v10440_v8 = vld [vmem:[#allocation113_spill] sm:$0xff] }
 0x508   : > { %v3744_v46 = vpop.permute.xlu1 %3743  ;;  %v3678_v25 = vmul.f32 %v3646_v49, %v10428_v2  ;;  %v3792_v42 = vmul.f32 %v3754_v53, %v3680_v1  ;;  %6750 = vrcp.f32 %v3133_v16  ;;  %v10446_v16 = vld [vmem:[#allocation45_spill] sm:$0xff]  ;;  %v10447_v1 = vld [vmem:[#allocation47_spill] sm:$0xff]  ;;  %v10450_v9 = vld [vmem:[#allocation124_spill] sm:$0xff] }
 0x509   : > { %v3788_v50 = vmul.f32 %v3744_v46, %v3676_v4  ;;  %v3789_v11 = vmul.f32 %v3744_v46, %v3677_v0  ;;  %4006 = vmatprep.mubr.bf16.mxu1 %v3807_v45  ;;  %v6733_v21 = vpop.eup %6732  ;;  %v3793_v54 = vmul.f32 %v3754_v53, %v3681_v28  ;;  %v10431_v0 = vld [vmem:[#allocation68_spill] sm:$0xff]  ;;  %v10444_v53 = vld [vmem:[#allocation126_spill] sm:$0xff]  ;;  %v10449_v2 = vld [vmem:[#allocation123_spill] sm:$0xff] }
 0x50a   : > { %4007 = vmatmul.mubr.bf16.gmra.mxu1 %v3806_v63  ;;  %5774 = vmatpush3.bf16.msra.mxu0 %v10414_v62  ;;  %v6735_v47 = vpop.eup %6734  ;;  %v3137_v63 = vadd.f32 1.0, %v10432_v27  ;;  %v10436_v62 = vld [vmem:[#allocation132_spill] sm:$0xff] }
 0x50b   : > { %v3808_v34 = vpack.c.bf16 %v3788_v50, %v3786_v58  ;;  %v3809_v18 = vpack.c.bf16 %v3789_v11, %v3787_v30  ;;  %5775 = vmatprep.subr.bf16.mxu0 %v10417_v31  ;;  %v6737_v37 = vpop.eup %6736  ;;  %v3221_v58 = vmul.f32 %v10434_v36, %v10433_v51  ;;  %v10435_v30 = vld [vmem:[#allocation128_spill] sm:$0xff]  ;;  %v3650_v31 = vmul.f32 %v6733_v21, %v10437_v15  ;;  %v10454_v51 = vld [vmem:[#allocation145_spill] sm:$0xff]  ;;  %v10455_v15 = vld [vmem:[#allocation150_spill] sm:$0xff] }
 0x50c   : > { %6752 = vrcp.f32 %v3137_v63  ;;  %v10453_v63 = vld [vmem:[#allocation130_spill] sm:$0xff] }
 0x50d   : > { %v3293_v12 = vpop.permute.xlu1 %3292  ;;  %4014 = vmatprep.mubr.bf16.mxu1 %v3809_v18  ;;  %v9374_v6 = vpop.eup %6738  ;;  %v3253_v29 = vmul.f32 %v3221_v58, %v10439_v59  ;;  %6754 = vrcp.f32 %v3141_v48 }
 0x50e   : > { %v3358_v32 = vmul.f32 %v3293_v12, %v10422_v20  ;;  %v3359_v33 = vmul.f32 %v3293_v12, %v10423_v60  ;;  %5776 = vmatpush3.bf16.msra.mxu0 %v10424_v52  ;;  %v9386_v50 = vmul.f32 %v9374_v6, %v10435_v30  ;;  %v3651_v12 = vmul.f32 %v6735_v47, %v10440_v8  ;;  %v10442_v20 = vld [vmem:[#allocation118_spill] sm:$0xff]  ;;  %v10443_v60 = vld [vmem:[#allocation153_spill] sm:$0xff]  ;;  %v10456_v8 = vld [vmem:[#allocation36_spill] sm:$0xff] }
 0x50f   : > { %5777 = vmatprep.subr.bf16.mxu0 %v10427_v10  ;;  %v9376_v23 = vpop.eup %6740  ;;  %v9412_v52 = vmul.f32 %v9374_v6, %v10444_v53  ;;  %v10448_v10 = vld [vmem:[#allocation31_spill] sm:$0xff] }
 0x510   : > { %v3386_v44 = vpack.c.bf16 %v3360_v24, %v3358_v32  ;;  %v3387_v22 = vpack.c.bf16 %v3361_v13, %v3359_v33  ;;  %v9379_v39 = vpop.eup %6742  ;;  %v9390_v26 = vmul.f32 %v9376_v23, %v10436_v62  ;;  %v3652_v24 = vmul.f32 %v6737_v37, %v10441_v3  ;;  %v10457_v3 = vld [vmem:[#allocation38_spill] sm:$0xff] }
 0x511   : > { %v6745_v11 = vpop.eup %6744  ;;  %v9398_v49 = vmul.f32 %v9379_v39, %v10438_v17  ;;  %v5565_v13 = vmul.f32 -1.442695, %v9386_v50  ;;  %v3683_v28 = vmul.f32 %v3651_v12, %v10450_v9  ;;  %v9430_v36 = vmul.f32 %v9379_v39, %v10454_v51  ;;  %v10466_v9 = vld [vmem:[#allocation60_spill] sm:$0xff] }
 0x512   : > { %v3749_v43 = vpop.permute.xlu1 %3748  ;;  %4232 = vmatprep.mubr.bf16.mxu0 %v3387_v22  ;;  %4015 = vmatmul.mubr.bf16.gmra.mxu1 %v3808_v34  ;;  %v3759_v34 = vpop.permute.xlu0 %3758  ;;  %v3653_v32 = vmul.f32 %v6745_v11, %v10442_v20  ;;  %v5567_v21 = vmul.f32 -1.442695, %v9390_v26  ;;  %v5564_v30 = vmul.f32 -1.442695, %v9412_v52 }
 0x513   : > { %v3790_v55 = vmul.f32 %v3749_v43, %v3678_v25  ;;  %v3791_v4 = vmul.f32 %v3749_v43, %v3679_v14  ;;  %4233 = vmatmul.mubr.bf16.gmra.mxu0 %v3386_v44  ;;  %v9392_v19 = vpop.eup %6746  ;;  %v3682_v25 = vmul.f32 %v3650_v31, %v10449_v2  ;;  %v5589_v38 = vmul.f32 -1.442695, %v9398_v49 }
 0x514   : > { %5778 = vmatpush3.bf16.msra.mxu0 %v10431_v0  ;;  %v6749_v56 = vpop.eup %6748  ;;  %v9407_v40 = vmul.f32 %v9392_v19, %v10443_v60  ;;  %6756 = vpow2.f32 %v5565_v13  ;;  %v9435_v31 = vmul.f32 %v9392_v19, %v10455_v15  ;;  %v10458_v13 = vld [vmem:[#allocation48_spill] sm:$0xff] }
 0x515   : > { %v3810_v45 = vpack.c.bf16 %v3792_v42, %v3790_v55  ;;  %v3811_v46 = vpack.c.bf16 %v3793_v54, %v3791_v4  ;;  %v3225_v37 = vmul.f32 %v6749_v56, %v10448_v10  ;;  %v10451_v54 = vld [vmem:[#allocation127_spill] sm:$0xff]  ;;  %v10452_v4 = vld [vmem:[#allocation129_spill] sm:$0xff]  ;;  %6758 = vpow2.f32 %v5567_v21  ;;  %v6751_v11 = vpop.eup %6750 }
 0x516   : > { %v3313_v14 = vpop.permute.xlu0 %3312  ;;  %v3684_v55 = vmul.f32 %v3652_v24, %v10451_v54  ;;  %v3685_v0 = vmul.f32 %v3653_v32, %v10452_v4  ;;  %v5591_v27 = vmul.f32 -1.442695, %v9407_v40  ;;  %6760 = vpow2.f32 %v5589_v38 }
 0x517   : > { %v3303_v18 = vpop.permute.xlu1 %3302  ;;  %4022 = vmatprep.mubr.bf16.mxu1 %v3811_v46  ;;  %v3794_v46 = vmul.f32 %v3759_v34, %v3682_v25  ;;  %v3229_v12 = vmul.f32 %v6751_v11, %v10456_v8  ;;  %v3257_v24 = vmul.f32 %v3225_v37, %v10457_v3  ;;  %v3366_v20 = vmul.f32 %v3313_v14, %v10458_v13  ;;  %v10465_v25 = vld [vmem:[#allocation41_spill] sm:$0xff] }
 0x518   : > { %v3362_v47 = vmul.f32 %v3303_v18, %v10445_v61  ;;  %v3363_v7 = vmul.f32 %v3303_v18, %v10446_v16  ;;  %v3795_v18 = vmul.f32 %v3759_v34, %v3683_v28  ;;  %6762 = vpow2.f32 %v5591_v27  ;;  %v10460_v61 = vld [vmem:[#allocation53_spill] sm:$0xff] }
 0x519   : > { %v5588_v34 = vmul.f32 -1.442695, %v9430_v36  ;;  %6764 = vpow2.f32 %v5564_v30  ;;  %v6753_v60 = vpop.eup %6752  ;;  %v5590_v53 = vmul.f32 -1.442695, %v9435_v31  ;;  %v10469_v30 = vld [vmem:[#allocation49_spill] sm:$0xff] }
 0x51a   : > { %4023 = vmatmul.mubr.bf16.gmra.mxu1 %v3810_v45  ;;  %v9426_v45 = vmul.f32 %v9376_v23, %v10453_v63  ;;  %v3328_v17 = vpop.permute.xlu0 %3327  ;;  %v3233_v38 = vmul.f32 %v6753_v60, %v10465_v25  ;;  %v10473_v8 = vld [vmem:[#allocation149_spill] sm:$0xff] }
 0x51b   : > { %v3308_v33 = vpop.permute.xlu1 %3307  ;;  %v10476_v13 = vld [vmem:[#allocation157_spill] sm:$0xff] }
 0x51c   : > { %v3364_v44 = vmul.f32 %v3308_v33, %v10447_v1  ;;  %v3365_v22 = vmul.f32 %v3308_v33, %v3253_v29  ;;  %v5566_v29 = vmul.f32 -1.442695, %v9426_v45  ;;  %v10459_v33 = vld [vmem:[#allocation51_spill] sm:$0xff]  ;;  %v3265_v11 = vmul.f32 %v3233_v38, %v10469_v30 }
 0x51d   : > { %v3367_v21 = vmul.f32 %v3313_v14, %v10459_v33  ;;  %v10462_v1 = vld [vmem:[#allocation151_spill] sm:$0xff]  ;;  %v3372_v14 = vmul.f32 %v3328_v17, %v10466_v9 }
 0x51e   : > { %v3388_v42 = vpack.c.bf16 %v3364_v44, %v3362_v47  ;;  %v3389_v43 = vpack.c.bf16 %v3365_v22, %v3363_v7  ;;  %v10461_v7 = vld [vmem:[#allocation152_spill] sm:$0xff]  ;;  %6766 = vpow2.f32 %v5566_v29  ;;  %v10464_v22 = vld [vmem:[#allocation43_spill] sm:$0xff]  ;;  %v3338_v28 = vpop.permute.xlu0 %3337  ;;  %v10472_v29 = vld [vmem:[#allocation69_spill] sm:$0xff] }
 0x51f   : > { %v10463_v44 = vpack.c.bf16 %v10461_v7, %v10462_v1  ;;  %v3261_v10 = vmul.f32 %v3229_v12, %v10464_v22  ;;  %6768 = vpow2.f32 %v5588_v34  ;;  %v10474_v12 = vld [vmem:[#allocation148_spill] sm:$0xff]  ;;  %v3377_v33 = vmul.f32 %v3338_v28, %v3265_v11 }
 0x520   : > { %v3764_v58 = vpop.permute.xlu1 %3763  ;;  %4240 = vmatprep.mubr.bf16.mxu0 %v3389_v43  ;;  %v6755_v43 = vpop.eup %6754  ;;  %6770 = vpow2.f32 %v5590_v53  ;;  %v10475_v3 = vpack.c.bf16 %v10473_v8, %v10474_v12  ;;  %v10493_v12 = vld [vmem:[#allocation165_spill] sm:$0xff] }
 0x521   : > { %v3796_v62 = vmul.f32 %v3764_v58, %v3684_v55  ;;  %v3797_v48 = vmul.f32 %v3764_v58, %v3685_v0  ;;  %4241 = vmatmul.mubr.bf16.gmra.mxu0 %v3388_v42  ;;  %v3373_v54 = vmul.f32 %v3328_v17, %v3261_v10  ;;  %v10467_v55 = vld [vmem:[#allocation55_spill] sm:$0xff]  ;;  %v10468_v0 = vld [vmem:[#allocation57_spill] sm:$0xff]  ;;  %v6757_v63 = vpop.eup %6756 }
 0x522   : > { %v6759_v58 = vpop.eup %6758  ;;  %v3348_v34 = vpop.permute.xlu0 %3347 }
 0x523   : > { %v3812_v56 = vpack.c.bf16 %v3796_v62, %v3794_v46  ;;  %v3813_v59 = vpack.c.bf16 %v3797_v48, %v3795_v18  ;;  %v6761_v62 = vpop.eup %6760  ;;  %v10470_v48 = vld [vmem:[#allocation72_spill] sm:$0xff]  ;;  %v4384_v53 = vadd.f32 1.0, %v6759_v58 }
 0x524   : > { %v3376_v15 = vmul.f32 %v3338_v28, %v10470_v48  ;;  %v10488_v58 = vld [vmem:[#allocation160_spill] sm:$0xff] }
 0x525   : > { %v3318_v32 = vpop.permute.xlu1 %3317  ;;  %4030 = vmatprep.mubr.bf16.mxu1 %v3813_v59  ;;  %v6763_v60 = vpop.eup %6762 }
 0x526   : > { %v3368_v47 = vmul.f32 %v3318_v32, %v10460_v61  ;;  %v3369_v16 = vmul.f32 %v3318_v32, %v3257_v24  ;;  %4031 = vmatmul.mubr.bf16.gmra.mxu1 %v3812_v56  ;;  %v10471_v56 = vld [vmem:[#allocation66_spill] sm:$0xff]  ;;  %v4382_v24 = vadd.f32 1.0, %v6757_v63  ;;  %v6765_v1 = vpop.eup %6764  ;;  %v4408_v25 = vadd.f32 1.0, %v6763_v60 }
 0x527   : > { %4729 = vmatprep.mubr.bf16.mxu1 %v10463_v44  ;;  %v10479_v61 = vld [vmem:[#allocation46_spill] sm:$0xff]  ;;  %v10480_v44 = vld [vmem:[#allocation83_spill] sm:$0xff]  ;;  %v4381_v28 = vadd.f32 1.0, %v6765_v1 }
 0x528   : > { %v3390_v37 = vpack.c.bf16 %v3368_v47, %v3366_v20  ;;  %v3391_v2 = vpack.c.bf16 %v3369_v16, %v3367_v21  ;;  %v10477_v20 = vld [vmem:[#allocation156_spill] sm:$0xff]  ;;  %v3237_v47 = vmul.f32 %v6755_v43, %v10479_v61  ;;  %v4406_v16 = vadd.f32 1.0, %v6761_v62  ;;  %v1748_v62 = vpop.f32.mrf.mxu1 }
 0x529   : > { %v3323_v42 = vpop.permute.xlu1 %3322  ;;  %v10478_v32 = vpack.c.bf16 %v10476_v13, %v10477_v20  ;;  %v3380_v22 = vmul.f32 %v3348_v34, %v10480_v44  ;;  %6772 = vrcp.f32 %v4382_v24  ;;  %v10499_v61 = vld [vmem:[#allocation136_spill] sm:$0xff] }
 0x52a   : > { %v3370_v4 = vmul.f32 %v3323_v42, %v10467_v55  ;;  %v3371_v27 = vmul.f32 %v3323_v42, %v10468_v0  ;;  %4248 = vmatprep.mubr.bf16.mxu0 %v3391_v2  ;;  %6774 = vrcp.f32 %v4384_v53  ;;  %v10482_v42 = vld [vmem:[#allocation56_spill] sm:$0xff]  ;;  %v10485_v0 = vld [vmem:[#allocation154_spill] sm:$0xff] }
 0x52b   : > { %4249 = vmatmul.mubr.bf16.gmra.mxu0 %v3390_v37  ;;  %v10481_v37 = vld [vmem:[#allocation77_spill] sm:$0xff]  ;;  %v6767_v38 = vpop.eup %6766  ;;  %6776 = vrcp.f32 %v4406_v16  ;;  %v3269_v43 = vmul.f32 %v3237_v47, %v10482_v42  ;;  %v2987_v47 = vmul.f32 %v9374_v6, %v10499_v61 }
 0x52c   : > { %v3392_v46 = vpack.c.bf16 %v3372_v14, %v3370_v4  ;;  %v3393_v51 = vpack.c.bf16 %v3373_v54, %v3371_v27  ;;  %v6769_v14 = vpop.eup %6768  ;;  %v10483_v54 = vld [vmem:[#allocation80_spill] sm:$0xff]  ;;  %v10484_v4 = vld [vmem:[#allocation155_spill] sm:$0xff]  ;;  %6778 = vrcp.f32 %v4408_v25  ;;  %v4383_v30 = vadd.f32 1.0, %v6767_v38 }
 0x52d   : > { %v3333_v18 = vpop.permute.xlu1 %3332  ;;  %v10486_v27 = vpack.c.bf16 %v10484_v4, %v10485_v0  ;;  %v6771_v63 = vpop.eup %6770  ;;  %v4405_v11 = vadd.f32 1.0, %v6769_v14  ;;  %6780 = vrcp.f32 %v4381_v28  ;;  %v10504_v14 = vld [vmem:[#allocation169_spill] sm:$0xff]  ;;  %v10505_v28 = vld [vmem:[#allocation168_spill] sm:$0xff] }
 0x52e   : > { %v3374_v59 = vmul.f32 %v3333_v18, %v10471_v56  ;;  %v3375_v17 = vmul.f32 %v3333_v18, %v10472_v29  ;;  %4256 = vmatprep.mubr.bf16.mxu0 %v3393_v51  ;;  %4730 = vmatmul.mubr.bf16.vlgmr.msra.gmra.mxu1 %v10475_v3  ;;  %v10487_v51 = vld [vmem:[#allocation161_spill] sm:$0xff]  ;;  %v3381_v18 = vmul.f32 %v3348_v34, %v3269_v43  ;;  %v4407_v48 = vadd.f32 1.0, %v6771_v63  ;;  %v1750_v56 = vpop.f32.mrf.mxu1  ;;  %v10491_v29 = vld [vmem:[#allocation158_spill] sm:$0xff]  ;;  %v10494_v3 = vld [vmem:[#allocation164_spill] sm:$0xff] }
 0x52f   : > { %4737 = vmatprep.mubr.bf16.mxu1 %v10478_v32  ;;  %6782 = vrcp.f32 %v4383_v30  ;;  %v10495_v24 = vpack.c.bf16 %v10493_v12, %v10494_v3  ;;  %v3011_v38 = vmul.f32 %v9379_v39, %v1750_v56  ;;  %v10506_v42 = vpack.c.bf16 %v10504_v14, %v10505_v28  ;;  %v6890_v28 = vld [vmem:[%s7389_s21 + $0x10] sm:$0xff] }
 0x530   : > { %v3394_v21 = vpack.c.bf16 %v3376_v15, %v3374_v59  ;;  %v3395_v10 = vpack.c.bf16 %v3377_v33, %v3375_v17  ;;  %6784 = vrcp.f32 %v4405_v11  ;;  %v10490_v59 = vld [vmem:[#allocation159_spill] sm:$0xff]  ;;  %v1752_v20 = vpop.f32.mrf.mxu1  ;;  %v10496_v33 = vld [vmem:[#allocation144_spill] sm:$0xff] }
 0x531   : > { %v3343_v7 = vpop.permute.xlu1 %3342  ;;  %6786 = vrcp.f32 %v4407_v48  ;;  %v10492_v17 = vpack.c.bf16 %v10490_v59, %v10491_v29  ;;  %v3010_v59 = vmul.f32 %v9379_v39, %v1748_v62  ;;  %v10516_v39 = vld [vmem:[#allocation104_spill] sm:$0xff]  ;;  %v2904_v62 = vadd.f32 1e-08, %v9301_v57 }
 0x532   : > { %v3378_v2 = vmul.f32 %v3343_v7, %v10481_v37  ;;  %v3379_v55 = vmul.f32 %v3343_v7, %v10483_v54  ;;  %v1754_v44 = vpop.f32.mrf.mxu1 }
 0x533   : > { %4257 = vmatmul.mubr.bf16.gmra.mxu0 %v3392_v46  ;;  %v10489_v46 = vpack.c.bf16 %v10487_v51, %v10488_v58  ;;  %v10507_v51 = vld [vmem:[#allocation143_spill] sm:$0xff]  ;;  %v10508_v58 = vld [vmem:[#allocation142_spill] sm:$0xff] }
 0x534   : > { %v3396_v9 = vpack.c.bf16 %v3380_v22, %v3378_v2  ;;  %4264 = vmatprep.mubr.bf16.mxu0 %v3395_v10  ;;  %v3397_v15 = vpack.c.bf16 %v3381_v18, %v3379_v55  ;;  %v10500_v22 = vld [vmem:[#allocation163_spill] sm:$0xff]  ;;  %v10501_v10 = vld [vmem:[#allocation162_spill] sm:$0xff]  ;;  %v3013_v55 = vmul.f32 %v9392_v19, %v1754_v44 }
 0x535   : > { %v10502_v37 = vpack.c.bf16 %v10500_v22, %v10501_v10  ;;  %v6889_v10 = vld [vmem:[%s7389_s21 + $0x8] sm:$0xff] }
 0x536   : > { %4738 = vmatmul.mubr.bf16.gmra.mxu1 %v10486_v27  ;;  %v6773_v8 = vpop.eup %6772 }
 0x537   : > { %4745 = vmatprep.mubr.bf16.mxu1 %v10489_v46  ;;  %v6775_v34 = vpop.eup %6774  ;;  %v4478_v32 = vmul.f32 %v6773_v8, %v9386_v50  ;;  %v10503_v50 = vld [vmem:[#allocation139_spill] sm:$0xff]  ;;  %v10509_v46 = vpack.c.bf16 %v10507_v51, %v10508_v58  ;;  %v10513_v8 = vld [vmem:[#allocation166_spill] sm:$0xff]  ;;  %v10518_v58 = vld [vmem:[#allocation117_spill] sm:$0xff] }
 0x538   : > { %v6777_v13 = vpop.eup %6776  ;;  %v4480_v16 = vmul.f32 %v6775_v34, %v9390_v26  ;;  %v2989_v2 = vmul.f32 %v9376_v23, %v10503_v50 }
 0x539   : > { %v6779_v60 = vpop.eup %6778  ;;  %v4502_v7 = vmul.f32 %v6777_v13, %v9398_v49  ;;  %v4510_v25 = vmul.f32 %v4478_v32, %v2987_v47  ;;  %v2905_v32 = vadd.f32 1e-08, %v9317_v41  ;;  %v6888_v47 = vld [vmem:[%s7389_s21] sm:$0xff] }
 0x53a   : > { %v6781_v1 = vpop.eup %6780  ;;  %v4512_v49 = vmul.f32 %v4480_v16, %v2989_v2 }
 0x53b   : > { %4265 = vmatmul.mubr.bf16.gmra.mxu0 %v3394_v21  ;;  %v10497_v21 = vld [vmem:[#allocation146_spill] sm:$0xff]  ;;  %v4534_v54 = vmul.f32 %v4502_v7, %v3011_v38  ;;  %v4477_v4 = vmul.f32 %v6781_v1, %v9412_v52 }
 0x53c   : > { %4272 = vmatprep.mubr.bf16.mxu0 %v3397_v15  ;;  %v10498_v53 = vpack.c.bf16 %v10496_v33, %v10497_v21  ;;  %v6783_v26 = vpop.eup %6782  ;;  %v4540_v0 = vpack.c.bf16 %v4512_v49, %v4510_v25  ;;  %v10511_v15 = vld [vmem:[#allocation138_spill] sm:$0xff] }
 0x53d   : > { %v6785_v43 = vpop.eup %6784  ;;  %v4479_v11 = vmul.f32 %v6783_v26, %v9426_v45  ;;  %v2988_v56 = vmul.f32 %v9376_v23, %v10511_v15  ;;  %v3012_v45 = vmul.f32 %v9392_v19, %v1752_v20  ;;  %v10515_v23 = vld [vmem:[#allocation101_spill] sm:$0xff]  ;;  %v9519_v20 = vstv %s5357_s10 }
 0x53e   : > { %4746 = vmatmul.mubr.bf16.gmra.mxu1 %v10492_v17  ;;  %v6787_v27 = vpop.eup %6786  ;;  %v4501_v18 = vmul.f32 %v6785_v43, %v9430_v36  ;;  %v10512_v17 = vld [vmem:[#allocation167_spill] sm:$0xff]  ;;  %v2902_v13 = vadd.f32 1e-08, %v10515_v23  ;;  %v6892_v23 = vld [vmem:[%s7389_s21 + $0x20] sm:$0xff] }
 0x53f   : > { %4753 = vmatprep.mubr.bf16.mxu1 %v10495_v24  ;;  %v4503_v29 = vmul.f32 %v6787_v27, %v9435_v31  ;;  %v10514_v12 = vpack.c.bf16 %v10512_v17, %v10513_v8  ;;  %v2903_v31 = vadd.f32 1e-08, %v10516_v39 }
 0x540   : > { %v4533_v3 = vmul.f32 %v4501_v18, %v3010_v59  ;;  %6788 = vrcp.f32 %v2902_v13 }
 0x541   : > { %v4535_v24 = vmul.f32 %v4503_v29, %v3012_v45  ;;  %6790 = vrcp.f32 %v2903_v31 }
 0x542   : > { %6792 = vrcp.f32 %v2904_v62 }
 0x543   : > { %4273 = vmatmul.mubr.bf16.gmra.mxu0 %v3396_v9  ;;  %v4504_v9 = vmul.f32 %v6779_v60, %v9407_v40  ;;  %v10510_v40 = vld [vmem:[#allocation134_spill] sm:$0xff]  ;;  %v4551_v34 = vpack.c.bf16 %v4535_v24, %v4533_v3  ;;  %6794 = vrcp.f32 %v2905_v32  ;;  %v10522_v3 = vld [vmem:[#allocation133_spill] sm:$0xff] }
 0x544   : > { %4713 = vmatprep.mubr.bf16.mxu0 %v10498_v53  ;;  %v2986_v30 = vmul.f32 %v9374_v6, %v10510_v40  ;;  %v4511_v6 = vmul.f32 %v4479_v11, %v2988_v56  ;;  %v10519_v40 = vld [vmem:[#allocation122_spill] sm:$0xff]  ;;  %v10520_v11 = vld [vmem:[#allocation125_spill] sm:$0xff]  ;;  %v10521_v56 = vld [vmem:[#allocation131_spill] sm:$0xff]  ;;  %v2911_v45 = vadd.f32 1e-08, %v10522_v3 }
 0x545   : > { %v4536_v63 = vmul.f32 %v4504_v9, %v3013_v55  ;;  %v2909_v18 = vadd.f32 1e-08, %v10520_v11 }
 0x546   : > { %4754 = vmatmul.mubr.bf16.gmra.mxu1 %v10502_v37  ;;  %v4509_v52 = vmul.f32 %v4477_v4, %v2986_v30  ;;  %v6891_v4 = vld [vmem:[%s7389_s21 + $0x18] sm:$0xff]  ;;  %v2908_v30 = vadd.f32 1e-08, %v10519_v40 }
 0x547   : > { %4761 = vmatprep.mubr.bf16.mxu1 %v10506_v42  ;;  %v4552_v48 = vpack.c.bf16 %v4536_v63, %v4534_v54  ;;  %v10517_v63 = vld [vmem:[#allocation111_spill] sm:$0xff]  ;;  %v6895_v40 = vld [vmem:[%s7389_s21 + $0x38] sm:$0xff] }
 0x548   : > { %v4539_v36 = vpack.c.bf16 %v4511_v6, %v4509_v52  ;;  %v2906_v51 = vadd.f32 1e-08, %v10517_v63  ;;  %v2910_v52 = vadd.f32 1e-08, %v10521_v56 }
 0x54a   : > { %6796 = vrcp.f32 %v2906_v51 }
 0x54b   : > { %4714 = vmatmul.mubr.bf16.vlgmr.msra.gmra.mxu0 %v10509_v46  ;;  %v2907_v46 = vadd.f32 1e-08, %v10518_v58 }
 0x54c   : > { %4721 = vmatprep.mubr.bf16.mxu0 %v4540_v0 }
 0x54d   : > { %v6789_v19 = vpop.eup %6788  ;;  %6798 = vrcp.f32 %v2907_v46 }
 0x54e   : > { %4762 = vmatmul.mubr.bf16.gmra.mxu1 %v10514_v12  ;;  %v4040_v60 = vmul.f32 %v6789_v19, %v9519_v20  ;;  %v6791_v33 = vpop.eup %6790  ;;  %6800 = vrcp.f32 %v2908_v30 }
 0x54f   : > { %4769 = vmatprep.mubr.bf16.mxu1 %v4552_v48  ;;  %v4041_v57 = vmul.f32 %v6791_v33, %v9519_v20  ;;  %v6793_v7 = vpop.eup %6792  ;;  %6802 = vrcp.f32 %v2909_v18  ;;  %v10526_v18 = vld [vmem:[#allocation141_spill] sm:$0xff] }
 0x550   : > { %v4056_v16 = vmul.f32 %v6888_v47, %v4040_v60  ;;  %v4042_v50 = vmul.f32 %v6793_v7, %v9519_v20  ;;  %v6795_v2 = vpop.eup %6794  ;;  %6804 = vrcp.f32 %v2910_v52 }
 0x551   : > { %v4057_v37 = vmul.f32 %v6889_v10, %v4041_v57  ;;  %v4043_v26 = vmul.f32 %v6795_v2, %v9519_v20  ;;  %6806 = vrcp.f32 %v2911_v45  ;;  %v6893_v57 = vld [vmem:[%s7389_s21 + $0x28] sm:$0xff]  ;;  %v10524_v2 = vld [vmem:[#allocation137_spill] sm:$0xff]  ;;  %v2916_v45 = vadd.f32 1e-08, %v9331_v5 }
 0x552   : > { %v4058_v42 = vmul.f32 %v6890_v28, %v4042_v50  ;;  %v6894_v28 = vld [vmem:[%s7389_s21 + $0x30] sm:$0xff] }
 0x553   : > { %4722 = vmatmul.mubr.bf16.gmra.mxu0 %v4539_v36  ;;  %v4059_v0 = vmul.f32 %v6891_v4, %v4043_v26 }
 0x556   : > { %4770 = vmatmul.mubr.bf16.gmra.mxu1 %v4551_v34 }
 0x557   : > { %v6797_v48 = vpop.eup %6796 }
 0x558   : > { %v4044_v29 = vmul.f32 %v6797_v48, %v9519_v20  ;;  %v2915_v48 = vadd.f32 1e-08, %v10526_v18 }
 0x55a   : > { %v6799_v17 = vpop.eup %6798  ;;  %v4060_v13 = vmul.f32 %v6892_v23, %v4044_v29  ;;  %v6897_v23 = vld [vmem:[%s7389_s21 + $0x48] sm:$0xff] }
 0x55b   : > { %v4045_v31 = vmul.f32 %v6799_v17, %v9519_v20  ;;  %v6801_v62 = vpop.eup %6800 }
 0x55d   : > { %v4061_v7 = vmul.f32 %v6893_v57, %v4045_v31 }
 0x576   : > { %v5651_v21 = vpop.f32.mrf.mxu1 }
 0x578   : > { %v5652_v53 = vpop.f32.mrf.mxu1 }
 0x579   : > { %v5653_v61 = vadd.f32 %v5652_v53, %v5651_v21  ;;  %v10523_v21 = vld [vmem:[#allocation135_spill] sm:$0xff] }
 0x57a   : > { %v5654_v1 = vpop.f32.mrf.mxu1  ;;  %v2912_v53 = vadd.f32 1e-08, %v10523_v21 }
 0x57b   : > { %v4072_v41 = vmul.f32 %v5653_v61, %v4056_v16 }
 0x57c   : > { %v5655_v44 = vpop.f32.mrf.mxu1  ;;  %6808 = vrcp.f32 %v2912_v53 }
 0x57d   : > { %v5656_v22 = vadd.f32 %v5655_v44, %v5654_v1  ;;  %v6803_v44 = vpop.eup %6802 }
 0x57e   : > { %v5657_v25 = vpop.f32.mrf.mxu1  ;;  %v6805_v58 = vpop.eup %6804 }
 0x57f   : > { %v4073_v38 = vmul.f32 %v5656_v22, %v4057_v37  ;;  %v6807_v56 = vpop.eup %6806 }
 0x580   : > { %v5658_v9 = vpop.f32.mrf.mxu1 }
 0x581   : > { %v5659_v14 = vadd.f32 %v5658_v9, %v5657_v25  ;;  %v2913_v25 = vadd.f32 1e-08, %v10524_v2 }
 0x582   : > { %v5660_v49 = vpop.f32.mrf.mxu1 }
 0x583   : > { %v4074_v43 = vmul.f32 %v5659_v14, %v4058_v42  ;;  %6810 = vrcp.f32 %v2913_v25  ;;  %v6899_v25 = vld [vmem:[%s7389_s21 + $0x58] sm:$0xff] }
 0x584   : > { %v5661_v54 = vpop.f32.mrf.mxu1 }
 0x585   : > { %v5662_v55 = vadd.f32 %v5661_v54, %v5660_v49  ;;  %v4047_v49 = vmul.f32 %v6803_v44, %v9519_v20 }
 0x587   : > { %v4075_v27 = vmul.f32 %v5662_v55, %v4059_v0  ;;  %v10525_v0 = vld [vmem:[#allocation140_spill] sm:$0xff]  ;;  %v4063_v30 = vmul.f32 %v6895_v40, %v4047_v49 }
 0x588   : > { %v2914_v63 = vadd.f32 1e-08, %v10525_v0 }
 0x58a   : > { %6812 = vrcp.f32 %v2914_v63 }
 0x58b   : > { %6814 = vrcp.f32 %v2915_v48 }
 0x58c   : > { %6816 = vrcp.f32 %v2916_v45 }
 0x5b5   : > { %v5715_v15 = vpop.f32.mrf.mxu0 }
 0x5b7   : > { %v5716_v59 = vpop.f32.mrf.mxu0 }
 0x5b8   : > { %v5717_v8 = vadd.f32 %v5716_v59, %v5715_v15  ;;  %v5663_v12 = vpop.f32.mrf.mxu1  ;;  %v4048_v15 = vmul.f32 %v6805_v58, %v9519_v20 }
 0x5b9   : > { %v5718_v6 = vpop.f32.mrf.mxu0 }
 0x5ba   : > { %v9536_v36 = vadd.f32 %v5717_v8, %v4072_v41  ;;  %v5664_v24 = vpop.f32.mrf.mxu1  ;;  %v4046_v41 = vmul.f32 %v6801_v62, %v9519_v20  ;;  %v4049_v8 = vmul.f32 %v6807_v56, %v9519_v20 }
 0x5bb   : > { %v5665_v34 = vadd.f32 %v5664_v24, %v5663_v12  ;;  %v5719_v39 = vpop.f32.mrf.mxu0  ;;  %v6809_v12 = vpop.eup %6808 }
 0x5bc   : > { %v5720_v32 = vadd.f32 %v5719_v39, %v5718_v6  ;;  %v5666_v19 = vpop.f32.mrf.mxu1  ;;  %v4062_v42 = vmul.f32 %v6894_v28, %v4046_v41  ;;  %v4050_v39 = vmul.f32 %v6809_v12, %v9519_v20  ;;  %v6811_v31 = vpop.eup %6810 }
 0x5bd   : > { %v9540_v60 = vmul.f32 %v5665_v34, %v4060_v13  ;;  %v5721_v33 = vpop.f32.mrf.mxu0  ;;  %v4065_v13 = vmul.f32 %v6897_v23, %v4049_v8  ;;  %v6902_v23 = vld [vmem:[%s7389_s21 + $0x70] sm:$0xff] }
 0x5be   : > { %v9543_v61 = vadd.f32 %v5720_v32, %v4073_v38  ;;  %v5667_v47 = vpop.f32.mrf.mxu1 }
 0x5bf   : > { %v5668_v16 = vadd.f32 %v5667_v47, %v5666_v19  ;;  %v5722_v1 = vpop.f32.mrf.mxu0 }
 0x5c0   : > { %v5723_v22 = vadd.f32 %v5722_v1, %v5721_v33  ;;  %v5669_v10 = vpop.f32.mrf.mxu1  ;;  %v2917_v33 = vadd.f32 1e-08, %v9342_v35  ;;  %v6813_v1 = vpop.eup %6812 }
 0x5c1   : > { %v9547_v37 = vmul.f32 %v5668_v16, %v4061_v7  ;;  %v5724_v50 = vpop.f32.mrf.mxu0  ;;  %v6898_v16 = vld [vmem:[%s7389_s21 + $0x50] sm:$0xff]  ;;  %v4051_v7 = vmul.f32 %v6811_v31, %v9519_v20  ;;  %v4052_v28 = vmul.f32 %v6813_v1, %v9519_v20 }
 0x5c2   : > { %v9550_v9 = vadd.f32 %v5723_v22, %v4074_v43  ;;  %v5670_v38 = vpop.f32.mrf.mxu1  ;;  %v4066_v5 = vmul.f32 %v6898_v16, %v4050_v39  ;;  %6818 = vrcp.f32 %v2917_v33 }
 0x5c3   : > { %v5671_v14 = vadd.f32 %v5670_v38, %v5669_v10  ;;  %v5725_v26 = vpop.f32.mrf.mxu0  ;;  %v4067_v38 = vmul.f32 %v6899_v25, %v4051_v7 }
 0x5c4   : > { %v5726_v54 = vadd.f32 %v5725_v26, %v5724_v50  ;;  %v5672_v55 = vpop.f32.mrf.mxu1 }
 0x5c5   : > { %v9554_v4 = vmul.f32 %v5671_v14, %v4062_v42  ;;  %v6815_v42 = vpop.eup %6814 }
 0x5c6   : > { %v9557_v51 = vadd.f32 %v5726_v54, %v4075_v27  ;;  %v5673_v43 = vpop.f32.mrf.mxu1  ;;  %v6896_v27 = vld [vmem:[%s7389_s21 + $0x40] sm:$0xff]  ;;  %v6817_v18 = vpop.eup %6816 }
 0x5c7   : > { %v5674_v46 = vadd.f32 %v5673_v43, %v5672_v55  ;;  %v4064_v17 = vmul.f32 %v6896_v27, %v4048_v15  ;;  %v4053_v43 = vmul.f32 %v6815_v42, %v9519_v20  ;;  %v6901_v15 = vld [vmem:[%s7389_s21 + $0x68] sm:$0xff]  ;;  %v4054_v27 = vmul.f32 %v6817_v18, %v9519_v20 }
 0x5c9   : > { %v9560_v11 = vmul.f32 %v5674_v46, %v4063_v30  ;;  %v4069_v56 = vmul.f32 %v6901_v15, %v4053_v43 }
 0x5ca   : > { %v5675_v52 = vpop.f32.mrf.mxu1 }
 0x5cc   : > { %v5676_v59 = vpop.f32.mrf.mxu1 }
 0x5cd   : > { %v5677_v29 = vadd.f32 %v5676_v59, %v5675_v52 }
 0x5ce   : > { %v5678_v6 = vpop.f32.mrf.mxu1 }
 0x5cf   : > { %v9566_v3 = vmul.f32 %v5677_v29, %v4064_v17  ;;  %v6819_v17 = vpop.eup %6818 }
 0x5d0   : > { %v5679_v24 = vpop.f32.mrf.mxu1  ;;  %v4055_v39 = vmul.f32 %v6819_v17, %v9519_v20 }
 0x5d1   : > { %v5680_v34 = vadd.f32 %v5679_v24, %v5678_v6 }
 0x5d2   : > { %v5681_v62 = vpop.f32.mrf.mxu1 }
 0x5d3   : > { %v5727_v32 = vpop.f32.mrf.mxu0  ;;  %v9571_v19 = vmul.f32 %v5680_v34, %v4065_v13  ;;  %v4070_v13 = vmul.f32 %v6902_v23, %v4054_v27 }
 0x5d4   : > { %v5682_v21 = vpop.f32.mrf.mxu1 }
 0x5d5   : > { %v5728_v53 = vpop.f32.mrf.mxu0  ;;  %v5683_v47 = vadd.f32 %v5682_v21, %v5681_v62 }
 0x5d6   : > { %v5729_v57 = vadd.f32 %v5728_v53, %v5727_v32  ;;  %v5684_v41 = vpop.f32.mrf.mxu1 }
 0x5d7   : > { %v5730_v44 = vpop.f32.mrf.mxu0  ;;  %v9576_v22 = vmul.f32 %v5683_v47, %v4066_v5  ;;  %v6903_v47 = vld [vmem:[%s7389_s21 + $0x78] sm:$0xff] }
 0x5d8   : > { %v9579_v10 = vadd.f32 %v5729_v57, %v9540_v60  ;;  %v5685_v35 = vpop.f32.mrf.mxu1  ;;  %v6900_v60 = vld [vmem:[%s7389_s21 + $0x60] sm:$0xff] }
 0x5d9   : > { %v5731_v50 = vpop.f32.mrf.mxu0  ;;  %v5686_v2 = vadd.f32 %v5685_v35, %v5684_v41  ;;  %v4068_v63 = vmul.f32 %v6900_v60, %v4052_v28 }
 0x5da   : > { %v5732_v14 = vadd.f32 %v5731_v50, %v5730_v44  ;;  %v5687_v26 = vpop.f32.mrf.mxu1 }
 0x5db   : > { %v4083_v49 = vmul.f32 %v5686_v2, %v4067_v38 }
 0x5dc   : > { %v9584_v54 = vadd.f32 %v5732_v14, %v9547_v37  ;;  %v5688_v55 = vpop.f32.mrf.mxu1 }
 0x5dd   : > { %v5689_v0 = vadd.f32 %v5688_v55, %v5687_v26 }
 0x5de   : > { %v5690_v58 = vpop.f32.mrf.mxu1 }
 0x5df   : > { %v4084_v46 = vmul.f32 %v5689_v0, %v4068_v63 }
 0x5e0   : > { %v5691_v40 = vpop.f32.mrf.mxu1 }
 0x5e1   : > { %v5733_v30 = vpop.f32.mrf.mxu0  ;;  %v5692_v48 = vadd.f32 %v5691_v40, %v5690_v58 }
 0x5e3   : > { %v5734_v52 = vpop.f32.mrf.mxu0  ;;  %v4085_v59 = vmul.f32 %v5692_v48, %v4069_v56 }
 0x5e4   : > { %v5735_v29 = vadd.f32 %v5734_v52, %v5733_v30 }
 0x5e5   : > { %v5736_v37 = vpop.f32.mrf.mxu0 }
 0x5e6   : > { %v9591_v8 = vadd.f32 %v5735_v29, %v9554_v4  ;;  %v5693_v12 = vpop.f32.mrf.mxu1  ;;  %v4071_v4 = vmul.f32 %v6903_v47, %v4055_v39 }
 0x5e7   : > { %v5737_v6 = vpop.f32.mrf.mxu0 }
 0x5e8   : > { %v5738_v45 = vadd.f32 %v5737_v6, %v5736_v37  ;;  %v5694_v24 = vpop.f32.mrf.mxu1 }
 0x5e9   : > { %v5695_v34 = vadd.f32 %v5694_v24, %v5693_v12 }
 0x5ea   : > { %v9596_v31 = vadd.f32 %v5738_v45, %v9560_v11  ;;  %v5696_v62 = vpop.f32.mrf.mxu1 }
 0x5eb   : > { %v4086_v32 = vmul.f32 %v5695_v34, %v4070_v13  ;;  %v5739_v33 = vpop.f32.mrf.mxu0 }
 0x5ec   : > { %v5697_v21 = vpop.f32.mrf.mxu1 }
 0x5ed   : > { %v5698_v53 = vadd.f32 %v5697_v21, %v5696_v62  ;;  %v5740_v16 = vpop.f32.mrf.mxu0 }
 0x5ee   : > { %v5741_v5 = vadd.f32 %v5740_v16, %v5739_v33  ;;  %v5791_v57 = vpop.f32.mrf.mxu1 }
 0x5ef   : > { %v4087_v7 = vmul.f32 %v5698_v53, %v4071_v4  ;;  %v5742_v1 = vpop.f32.mrf.mxu0 }
 0x5f0   : > { %v9600_v41 = vadd.f32 %v5741_v5, %v9566_v3  ;;  %v5792_v44 = vpop.f32.mrf.mxu1 }
 0x5f1   : > { %v5743_v20 = vpop.f32.mrf.mxu0 }
 0x5f2   : > { %v5744_v35 = vadd.f32 %v5743_v20, %v5742_v1  ;;  %v5794_v11 = vpop.f32.mrf.mxu1 }
 0x5f3   : > { %v5745_v50 = vpop.f32.mrf.mxu0 }
 0x5f4   : > { %v9603_v2 = vadd.f32 %v5744_v35, %v9571_v19  ;;  %v5795_v25 = vpop.f32.mrf.mxu1 }
 0x5f5   : > { %v5746_v38 = vpop.f32.mrf.mxu0 }
 0x5f6   : > { %v5747_v14 = vadd.f32 %v5746_v38, %v5745_v50  ;;  %v5797_v28 = vpop.f32.mrf.mxu1  ;;  %v9628_v50 = vadd.f32 %v5792_v44, %v5791_v57 }
 0x5f7   : > { %v5748_v42 = vpop.f32.mrf.mxu0 }
 0x5f8   : > { %v9606_v26 = vadd.f32 %v5747_v14, %v9576_v22  ;;  %v5798_v55 = vpop.f32.mrf.mxu1 }
 0x5f9   : > { %v5749_v0 = vpop.f32.mrf.mxu0 }
 0x5fa   : > { %v5750_v3 = vadd.f32 %v5749_v0, %v5748_v42  ;;  %v5800_v60 = vpop.f32.mrf.mxu1 }
 0x5fb   : > { %v5751_v63 = vpop.f32.mrf.mxu0 }
 0x5fc   : > { %v9608_v43 = vadd.f32 %v5750_v3, %v4083_v49  ;;  %v5801_v58 = vpop.f32.mrf.mxu1  ;;  %v4782_v3 = vmul.f32 %v9628_v50, %v9628_v50 }
 0x5fd   : > { %v5752_v40 = vpop.f32.mrf.mxu0 }
 0x5fe   : > { %v5753_v30 = vadd.f32 %v5752_v40, %v5751_v63  ;;  %v5803_v19 = vpop.f32.mrf.mxu1  ;;  %v9636_v63 = vadd.f32 %v5795_v25, %v5794_v11  ;;  %v9638_v40 = vadd.f32 %v5798_v55, %v5797_v28 }
 0x5ff   : > { %v5754_v18 = vpop.f32.mrf.mxu0 }
 0x600   : > { %v9610_v48 = vadd.f32 %v5753_v30, %v4084_v46  ;;  %v5804_v15 = vpop.f32.mrf.mxu1  ;;  %v4783_v44 = vmul.f32 %v9636_v63, %v9636_v63 }
 0x601   : > { %v5755_v56 = vpop.f32.mrf.mxu0 }
 0x602   : > { %v5756_v52 = vadd.f32 %v5755_v56, %v5754_v18  ;;  %v5806_v29 = vpop.f32.mrf.mxu1  ;;  %v4784_v18 = vmul.f32 %v9638_v40, %v9638_v40  ;;  %v9646_v56 = vadd.f32 %v5801_v58, %v5800_v60 }
 0x603   : > { %v5757_v22 = vpop.f32.mrf.mxu0 }
 0x604   : > { %v9612_v37 = vadd.f32 %v5756_v52, %v4085_v59  ;;  %v5807_v27 = vpop.f32.mrf.mxu1  ;;  %v9648_v52 = vadd.f32 %v5804_v15, %v5803_v19  ;;  %v4785_v25 = vmul.f32 %v9646_v56, %v9646_v56 }
 0x605   : > { %v5758_v17 = vpop.f32.mrf.mxu0  ;;  %v9654_v55 = vadd.f32 %v5807_v27, %v5806_v29 }
 0x606   : > { %v5759_v12 = vadd.f32 %v5758_v17, %v5757_v22  ;;  %v5809_v6 = vpop.f32.mrf.mxu1  ;;  %v4786_v28 = vmul.f32 %v9648_v52, %v9648_v52 }
 0x607   : > { %v5760_v49 = vpop.f32.mrf.mxu0  ;;  %v4787_v60 = vmul.f32 %v9654_v55, %v9654_v55 }
 0x608   : > { %v9614_v45 = vadd.f32 %v5759_v12, %v4086_v32  ;;  %v5810_v24 = vpop.f32.mrf.mxu1 }
 0x609   : > { %v5761_v34 = vpop.f32.mrf.mxu0  ;;  %v9656_v22 = vadd.f32 %v5810_v24, %v5809_v6 }
 0x60a   : > { %10527 = vst [vmem:[#allocation58_spill] sm:$0xff] %v9614_v45  ;;  %v5762_v23 = vadd.f32 %v5761_v34, %v5760_v49  ;;  %v5812_v13 = vpop.f32.mrf.mxu1 }
 0x60b   : > { %v5779_v46 = vpop.f32.mrf.mxu0  ;;  %v4788_v58 = vmul.f32 %v9656_v22, %v9656_v22 }
 0x60c   : > { %v9616_v39 = vadd.f32 %v5762_v23, %v4087_v7  ;;  %v5813_v62 = vpop.f32.mrf.mxu1 }
 0x60d   : > { %v5780_v33 = vpop.f32.mrf.mxu0  ;;  %v9662_v19 = vadd.f32 %v5813_v62, %v5812_v13  ;;  %v10530_v62 = vld [vmem:[#allocation188_spill] sm:$0xff] }
 0x60e   : > { %10528 = vst [vmem:[#allocation61_spill] sm:$0xff] %v9616_v39  ;;  %v9618_v21 = vadd.f32 %v5780_v33, %v5779_v46  ;;  %v5815_v47 = vpop.f32.mrf.mxu1  ;;  %v10531_v33 = vld [vmem:[#allocation190_spill] sm:$0xff] }
 0x60f   : > { %v5782_v59 = vpop.f32.mrf.mxu0  ;;  %v4789_v29 = vmul.f32 %v9662_v19, %v9662_v19 }
 0x610   : > { %v4778_v53 = vmul.f32 %v9618_v21, %v9618_v21  ;;  %v5816_v1 = vpop.f32.mrf.mxu1 }
 0x611   : > { %v5783_v4 = vpop.f32.mrf.mxu0  ;;  %v9664_v15 = vadd.f32 %v5816_v1, %v5815_v47  ;;  %v10534_v47 = vld [vmem:[#allocation191_spill] sm:$0xff]  ;;  %v2633_v1 = vpop.permute.xlu1 %2632 }
 0x612   : > { %v9622_v16 = vadd.f32 %v5783_v4, %v5782_v59  ;;  %4794 = vadd.xlane.f32.xlu1 %v4778_v53  ;;  %v5818_v14 = vpop.f32.mrf.mxu1  ;;  %v10532_v59 = vld [vmem:[#allocation193_spill] sm:$0xff]  ;;  %v7173_v4 = vmov 2  }
 0x613   : > { %v5785_v32 = vpop.f32.mrf.mxu0  ;;  %v4790_v27 = vmul.f32 %v9664_v15, %v9664_v15  ;;  %v10533_v53 = vld [vmem:[#allocation189_spill] sm:$0xff]  ;;  %6009 = vset.pattern.permute.xlu0 %v7173_v4  ;;  %6008 = vset.pattern.permute.xlu1 %v7173_v4 }
 0x614   : > { %v4779_v5 = vmul.f32 %v9622_v16, %v9622_v16  ;;  %v5819_v57 = vpop.f32.mrf.mxu1 }
 0x615   : > { %v5786_v7 = vpop.f32.mrf.mxu0  ;;  %v9670_v6 = vadd.f32 %v5819_v57, %v5818_v14 }
 0x616   : > { %v9626_v20 = vadd.f32 %v5786_v7, %v5785_v32  ;;  %4796 = vadd.xlane.f32.xlu0 %v4779_v5  ;;  %v5821_v11 = vpop.f32.mrf.mxu1  ;;  %v10535_v32 = vld [vmem:[#allocation194_spill] sm:$0xff]  ;;  %v10536_v5 = vld [vmem:[#allocation192_spill] sm:$0xff]  ;;  %v2635_v7 = vpop.permute.xlu1 %2634 }
 0x617   : > { %v5788_v35 = vpop.f32.mrf.mxu0  ;;  %v4791_v34 = vmul.f32 %v9670_v6, %v9670_v6 }
 0x618   : > { %v4780_v38 = vmul.f32 %v9626_v20, %v9626_v20  ;;  %v5822_v17 = vpop.f32.mrf.mxu1 }
 0x619   : > { %v5789_v42 = vpop.f32.mrf.mxu0  ;;  %v9672_v49 = vadd.f32 %v5822_v17, %v5821_v11 }
 0x61a   : > { %v9632_v0 = vadd.f32 %v5789_v42, %v5788_v35  ;;  %4798 = vadd.xlane.f32.xlu0 %v4780_v38  ;;  %v5824_v12 = vpop.f32.mrf.mxu1  ;;  %v2631_v35 = vpop.permute.xlu0 %2630 }
 0x61b   : > { %v4792_v23 = vmul.f32 %v9672_v49, %v9672_v49  ;;  %v2639_v38 = vpop.permute.xlu1 %2638 }
 0x61c   : > { %v4781_v30 = vmul.f32 %v9632_v0, %v9632_v0  ;;  %v5825_v24 = vpop.f32.mrf.mxu1 }
 0x61d   : > { %v9678_v13 = vadd.f32 %v5825_v24, %v5824_v12 }
 0x61e   : > { %4802 = vadd.xlane.f32.xlu0 %v4782_v3  ;;  %4800 = vadd.xlane.f32.xlu1 %v4781_v30  ;;  %v2637_v14 = vpop.permute.xlu0 %2636 }
 0x61f   : > { %10529 = vst [vmem:[#allocation63_spill] sm:$0xff] %v9678_v13  ;;  %v4793_v46 = vmul.f32 %v9678_v13, %v9678_v13  ;;  %v2643_v42 = vpop.permute.xlu1 %2642 }
 0x622   : > { %4806 = vadd.xlane.f32.xlu0 %v4784_v18  ;;  %4804 = vadd.xlane.f32.xlu1 %v4783_v44  ;;  %v2641_v3 = vpop.permute.xlu0 %2640 }
 0x623   : > { %v2647_v30 = vpop.permute.xlu1 %2646 }
 0x626   : > { %4810 = vadd.xlane.f32.xlu0 %v4786_v28  ;;  %4808 = vadd.xlane.f32.xlu1 %v4785_v25  ;;  %v2645_v57 = vpop.permute.xlu0 %2644 }
 0x62a   : > { %4814 = vadd.xlane.f32.xlu0 %v4788_v58  ;;  %4812 = vadd.xlane.f32.xlu1 %v4787_v60  ;;  %v9702_v60 = vstv %s5358_s15  ;;  %v10537_v58 = vld [vmem:[#allocation172_spill] sm:$0xff] }
 0x62b   : > { %v2678_v12 = vmul.f32 %v10537_v58, %v2631_v35  ;;  %v10542_v35 = vld [vmem:[#allocation170_spill] sm:$0xff]  ;;  %v10543_v58 = vld [vmem:[#allocation176_spill] sm:$0xff] }
 0x62e   : > { %4818 = vadd.xlane.f32.xlu0 %v4790_v27  ;;  %4816 = vadd.xlane.f32.xlu1 %v4789_v29  ;;  %v10538_v27 = vld [vmem:[#allocation171_spill] sm:$0xff] }
 0x62f   : > { %v2681_v24 = vmul.f32 %v10538_v27, %v2637_v14  ;;  %v2682_v27 = vmul.f32 %v10543_v58, %v2639_v38 }
 0x632   : > { %4822 = vadd.xlane.f32.xlu0 %v4792_v23  ;;  %4820 = vadd.xlane.f32.xlu1 %v4791_v34  ;;  %v10539_v34 = vld [vmem:[#allocation177_spill] sm:$0xff] }
 0x633   : > { %v2683_v23 = vmul.f32 %v10539_v34, %v2641_v3  ;;  %v9717_v3 = vmul.f32 %v9702_v60, %v2678_v12  ;;  %v10544_v34 = vld [vmem:[#allocation174_spill] sm:$0xff] }
 0x634   : > { %v2684_v39 = vmul.f32 %v10544_v34, %v2643_v42 }
 0x636   : > { %4824 = vadd.xlane.f32.xlu1 %v4793_v46 }
 0x647   : > { %2650 = vrot.lane.b32.xlu1 %v10530_v62, %s7171_s23 }
 0x648   : > { %2648 = vrot.lane.b32.xlu0 %v10531_v33, %s7171_s23 }
 0x64b   : > { %2654 = vrot.lane.b32.xlu1 %v10532_v59, %s7171_s23  ;;  %v10540_v59 = vld [vmem:[#allocation175_spill] sm:$0xff] }
 0x64c   : > { %2652 = vrot.lane.b32.xlu0 %v10533_v53, %s7171_s23  ;;  %v2685_v53 = vmul.f32 %v10540_v59, %v2645_v57 }
 0x64e   : > { %v9732_v12 = vmul.f32 %v9702_v60, %v2685_v53 }
 0x64f   : > { %2658 = vrot.lane.b32.xlu1 %v10534_v47, %s7171_s23 }
 0x650   : > { %2656 = vrot.lane.b32.xlu0 %v10535_v32, %s7171_s23  ;;  %v10541_v32 = vld [vmem:[#allocation173_spill] sm:$0xff] }
 0x654   : > { %2660 = vrot.lane.b32.xlu0 %v10536_v5, %s7171_s23  ;;  %v2679_v5 = vmul.f32 %v10541_v32, %v2633_v1  ;;  %v9745_v32 = vmul.f32 %v9702_v60, %v2684_v39  ;;  %s7051_s23 = sshll.u32 %s7174_s24, 4  ;;  %s7052_s23 = int_to_ptr.vmem [resolvable:$false] %s7051_s23 }
 0x655   : > { %s7053_s19 = scalar_lea.vmem %s7052_s23, 4096  ;;  %p7054_p7 = scmp.lt.s32.totalorder %s9890_s25, %s7052_s23 }
 0x656   : > { %p7055_p5 = scmp.lt.s32.totalorder %s7053_s19, %s7047_s20 }
 0x658   : > { %p7056_p1 = por %p7055_p5, %p7054_p7 }
 0x65a   : > { %p7057_p13 = pnand %p7056_p1, %p7050_p12 }
 0x69b   : > { %v4795_v44 = vpop.xlane.xlu1 %4794 }
 0x69c   : > { %6820 = vrsqrt.f32 %v4795_v44  ;;  %vm4828_vm0 = vcmp.eq.f32.partialorder %v4795_v44, inf  ;;  %v4831_v46 = vand.u32 2147483648, %v4795_v44  ;;  %vm4830_vm1 = vcmp.eq.f32.partialorder %v4795_v44, 0.0 }
 0x69f   : > { %v4797_v18 = vpop.xlane.xlu0 %4796 }
 0x6a0   : > { %6822 = vrsqrt.f32 %v4797_v18  ;;  %vm4835_vm2 = vcmp.eq.f32.partialorder %v4797_v18, inf  ;;  %v4838_v1 = vand.u32 2147483648, %v4797_v18  ;;  %vm4837_vm3 = vcmp.eq.f32.partialorder %v4797_v18, 0.0 }
 0x6a3   : > { %v4799_v11 = vpop.xlane.xlu0 %4798 }
 0x6a4   : > { %6824 = vrsqrt.f32 %v4799_v11  ;;  %vm4842_vm4 = vcmp.eq.f32.partialorder %v4799_v11, inf  ;;  %vm4844_vm5 = vcmp.eq.f32.partialorder %v4799_v11, 0.0 }
 0x6a7   : > { %v9696_v25 = vpop.xlane.xlu1 %4800  ;;  %v9698_v28 = vpop.xlane.xlu0 %4802 }
 0x6a8   : > { %6826 = vrsqrt.f32 %v9696_v25  ;;  %vm4849_vm6 = vcmp.eq.f32.partialorder %v9696_v25, inf  ;;  %vm4851_vm7 = vcmp.eq.f32.partialorder %v9696_v25, 0.0  ;;  %vm4856_vm8 = vcmp.eq.f32.partialorder %v9698_v28, inf }
 0x6a9   : > { %v6821_v17 = vpop.eup %6820  ;;  %6828 = vrsqrt.f32 %v9698_v28  ;;  %vm4858_vm9 = vcmp.eq.f32.partialorder %v9698_v28, 0.0 }
 0x6aa   : > { %v4827_v29 = vmul.f32 %v6821_v17, %v4795_v44  ;;  %v2680_v17 = vmul.f32 %v10542_v35, %v2635_v7 }
 0x6ab   : > { %v9707_v62 = vpop.xlane.xlu1 %4804  ;;  %v9709_v33 = vpop.xlane.xlu0 %4806 }
 0x6ac   : > { %v4829_v47 = vsel %vm4828_vm0, %v4795_v44, %v4827_v29  ;;  %6830 = vrsqrt.f32 %v9707_v62  ;;  %v9722_v44 = vmul.f32 %v9702_v60, %v2681_v24  ;;  %v9725_v29 = vmul.f32 %v9702_v60, %v2683_v23 }
 0x6ad   : > { %v6823_v4 = vpop.eup %6822  ;;  %v4832_v14 = vsel %vm4830_vm1, %v4831_v46, %v4829_v47  ;;  %6832 = vrsqrt.f32 %v9709_v33  ;;  %v9735_v47 = vmul.f32 %v9702_v60, %v2679_v5  ;;  %v9738_v24 = vmul.f32 %v9702_v60, %v2680_v17 }
 0x6ae   : > { %v4834_v57 = vmul.f32 %v6823_v4, %v4797_v18  ;;  %v4938_v59 = vmax.f32 %v4832_v14, 1e-12  ;;  %v9742_v4 = vmul.f32 %v9702_v60, %v2682_v27  ;;  %v4845_v14 = vand.u32 2147483648, %v4799_v11 }
 0x6af   : > { %v9727_v7 = vpop.xlane.xlu1 %4808  ;;  %v9729_v46 = vpop.xlane.xlu0 %4810  ;;  %vm4863_vm10 = vcmp.eq.f32.partialorder %v9707_v62, inf  ;;  %vm4865_vm11 = vcmp.eq.f32.partialorder %v9707_v62, 0.0  ;;  %vm4870_vm12 = vcmp.eq.f32.partialorder %v9709_v33, inf  ;;  %vm4872_vm13 = vcmp.eq.f32.partialorder %v9709_v33, 0.0 }
 0x6b0   : > { %v4836_v38 = vsel %vm4835_vm2, %v4797_v18, %v4834_v57  ;;  %6834 = vrsqrt.f32 %v9727_v7  ;;  %v10545_v18 = vld [vmem:[#allocation180_spill] sm:$0xff]  ;;  %v4852_v57 = vand.u32 2147483648, %v9696_v25  ;;  %vm4877_vm14 = vcmp.eq.f32.partialorder %v9727_v7, inf }
 0x6b1   : > { %v6825_v42 = vpop.eup %6824  ;;  %v4839_v23 = vsel %vm4837_vm3, %v4838_v1, %v4836_v38  ;;  %6836 = vrsqrt.f32 %v9729_v46  ;;  %v9749_v35 = vmul.f32 %v10545_v18, %v2647_v30  ;;  %vm4879_vm15 = vcmp.eq.f32.partialorder %v9727_v7, 0.0 }
 0x6b2   : > { %v4841_v53 = vmul.f32 %v6825_v42, %v4799_v11  ;;  %v4939_v5 = vmax.f32 %v4839_v23, 1e-12  ;;  %6838 = vrcp.f32 %v4938_v59  ;;  %v4859_v59 = vand.u32 2147483648, %v9698_v28 }
 0x6b3   : > { %v9751_v17 = vpop.xlane.xlu1 %4812  ;;  %v9753_v58 = vpop.xlane.xlu0 %4814  ;;  %vm4884_vm0 = vcmp.eq.f32.partialorder %v9729_v46, inf  ;;  %vm4886_vm1 = vcmp.eq.f32.partialorder %v9729_v46, 0.0 }
 0x6b4   : > { %v4843_v34 = vsel %vm4842_vm4, %v4799_v11, %v4841_v53  ;;  %6840 = vrsqrt.f32 %v9751_v17  ;;  %vm4891_vm2 = vcmp.eq.f32.partialorder %v9751_v17, inf  ;;  %vm4893_vm3 = vcmp.eq.f32.partialorder %v9751_v17, 0.0 }
 0x6b5   : > { %v6827_v39 = vpop.eup %6826  ;;  %v4846_v27 = vsel %vm4844_vm5, %v4845_v14, %v4843_v34  ;;  %6842 = vrsqrt.f32 %v9753_v58  ;;  %v4866_v34 = vand.u32 2147483648, %v9707_v62  ;;  %vm4898_vm4 = vcmp.eq.f32.partialorder %v9753_v58, inf }
 0x6b6   : > { %v6829_v30 = vpop.eup %6828  ;;  %v4940_v1 = vmax.f32 %v4846_v27, 1e-12  ;;  %v4848_v38 = vmul.f32 %v6827_v39, %v9696_v25  ;;  %6844 = vrcp.f32 %v4939_v5  ;;  %vm4900_vm5 = vcmp.eq.f32.partialorder %v9753_v58, 0.0 }
 0x6b7   : > { %v4855_v11 = vmul.f32 %v6829_v30, %v9698_v28  ;;  %v9765_v42 = vpop.xlane.xlu1 %4816  ;;  %v9767_v23 = vpop.xlane.xlu0 %4818 }
 0x6b8   : > { %6846 = vrcp.f32 %v4940_v1  ;;  %v4850_v53 = vsel %vm4849_vm6, %v9696_v25, %v4848_v38  ;;  %vm4905_vm6 = vcmp.eq.f32.partialorder %v9765_v42, inf }
 0x6b9   : > { %v6831_v18 = vpop.eup %6830  ;;  %v4853_v5 = vsel %vm4851_vm7, %v4852_v57, %v4850_v53  ;;  %v4857_v14 = vsel %vm4856_vm8, %v9698_v28, %v4855_v11  ;;  %6848 = vrsqrt.f32 %v9765_v42  ;;  %v4873_v57 = vand.u32 2147483648, %v9709_v33 }
 0x6ba   : > { %v6833_v39 = vpop.eup %6832  ;;  %v4941_v27 = vmax.f32 %v4853_v5, 1e-12  ;;  %v4860_v30 = vsel %vm4858_vm9, %v4859_v59, %v4857_v14  ;;  %v4862_v1 = vmul.f32 %v6831_v18, %v9707_v62  ;;  %6850 = vrsqrt.f32 %v9767_v23 }
 0x6bb   : > { %v4942_v38 = vmax.f32 %v4860_v30, 1e-12  ;;  %v4869_v13 = vmul.f32 %v6833_v39, %v9709_v33  ;;  %v9784_v25 = vpop.xlane.xlu1 %4820  ;;  %v9791_v11 = vpop.xlane.xlu0 %4822  ;;  %v4880_v39 = vand.u32 2147483648, %v9727_v7  ;;  %vm4907_vm7 = vcmp.eq.f32.partialorder %v9765_v42, 0.0 }
 0x6bc   : > { %6852 = vrcp.f32 %v4941_v27  ;;  %v4864_v28 = vsel %vm4863_vm10, %v9707_v62, %v4862_v1  ;;  %vm4912_vm8 = vcmp.eq.f32.partialorder %v9767_v23, inf  ;;  %vm4914_vm9 = vcmp.eq.f32.partialorder %v9767_v23, 0.0 }
 0x6bd   : > { %6854 = vrcp.f32 %v4942_v38  ;;  %v4867_v59 = vsel %vm4865_vm11, %v4866_v34, %v4864_v28  ;;  %v4871_v53 = vsel %vm4870_vm12, %v9709_v33, %v4869_v13  ;;  %v6835_v18 = vpop.eup %6834  ;;  %v4887_v33 = vand.u32 2147483648, %v9729_v46 }
 0x6be   : > { %v4943_v5 = vmax.f32 %v4867_v59, 1e-12  ;;  %v4874_v14 = vsel %vm4872_vm13, %v4873_v57, %v4871_v53  ;;  %6856 = vrsqrt.f32 %v9784_v25  ;;  %v6837_v27 = vpop.eup %6836  ;;  %v4876_v1 = vmul.f32 %v6835_v18, %v9727_v7 }
 0x6bf   : > { %v4944_v30 = vmax.f32 %v4874_v14, 1e-12  ;;  %6858 = vrsqrt.f32 %v9791_v11  ;;  %v9802_v62 = vpop.xlane.xlu1 %4824  ;;  %v4883_v13 = vmul.f32 %v6837_v27, %v9729_v46  ;;  %v6839_v34 = vpop.eup %6838  ;;  %v4894_v53 = vand.u32 2147483648, %v9751_v17 }
 0x6c0   : > { %6860 = vrcp.f32 %v4943_v5  ;;  %v4878_v38 = vsel %vm4877_vm14, %v9727_v7, %v4876_v1  ;;  %v5003_v7 = vmul.f32 %v6839_v34, %v9717_v3  ;;  %vm4919_vm10 = vcmp.eq.f32.partialorder %v9784_v25, inf }
 0x6c1   : > { %6862 = vrcp.f32 %v4944_v30  ;;  %v6841_v28 = vpop.eup %6840  ;;  %v4881_v57 = vsel %vm4879_vm15, %v4880_v39, %v4878_v38  ;;  %v4885_v59 = vsel %vm4884_vm0, %v9729_v46, %v4883_v13  ;;  %v4901_v13 = vand.u32 2147483648, %v9753_v58 }
 0x6c2   : > { %6864 = vrsqrt.f32 %v9802_v62  ;;  %v6843_v18 = vpop.eup %6842  ;;  %v4945_v5 = vmax.f32 %v4881_v57, 1e-12  ;;  %v4888_v14 = vsel %vm4886_vm1, %v4887_v33, %v4885_v59  ;;  %v4890_v27 = vmul.f32 %v6841_v28, %v9751_v17  ;;  %5021 = vperm.xlu1 %6008, %v5003_v7  }
 0x6c3   : > { %v6845_v30 = vpop.eup %6844  ;;  %v4946_v1 = vmax.f32 %v4888_v14, 1e-12  ;;  %v4897_v45 = vmul.f32 %v6843_v18, %v9753_v58  ;;  %v4908_v18 = vand.u32 2147483648, %v9765_v42  ;;  %vm4921_vm11 = vcmp.eq.f32.partialorder %v9784_v25, 0.0 }
 0x6c4   : > { %6866 = vrcp.f32 %v4945_v5  ;;  %v4892_v39 = vsel %vm4891_vm2, %v9751_v17, %v4890_v27  ;;  %v5004_v17 = vmul.f32 %v6845_v30, %v9735_v47  ;;  %v2649_v27 = vpop.permute.xlu0 %2648  ;;  %v4995_v30 = vmul.f32 %v9702_v60, %v9749_v35 }
 0x6c5   : > { %v6847_v46 = vpop.eup %6846  ;;  %6868 = vrcp.f32 %v4946_v1  ;;  %v4895_v38 = vsel %vm4893_vm3, %v4894_v53, %v4892_v39  ;;  %v4899_v28 = vsel %vm4898_vm4, %v9753_v58, %v4897_v45  ;;  %v4915_v58 = vand.u32 2147483648, %v9767_v23 }
 0x6c6   : > { %v6849_v33 = vpop.eup %6848  ;;  %v4947_v34 = vmax.f32 %v4895_v38, 1e-12  ;;  %v4902_v57 = vsel %vm4900_vm5, %v4901_v13, %v4899_v28  ;;  %v5005_v1 = vmul.f32 %v6847_v46, %v9738_v24  ;;  %5026 = vperm.xlu0 %6009, %v5004_v17   ;;  %vm4926_vm12 = vcmp.eq.f32.partialorder %v9791_v11, inf }
 0x6c7   : > { %v6851_v3 = vpop.eup %6850  ;;  %v4904_v59 = vmul.f32 %v6849_v33, %v9765_v42  ;;  %v4948_v5 = vmax.f32 %v4902_v57, 1e-12  ;;  %vm4928_vm13 = vcmp.eq.f32.partialorder %v9791_v11, 0.0  ;;  %vm4933_vm14 = vcmp.eq.f32.partialorder %v9802_v62, inf }
 0x6c8   : > { %v4911_v14 = vmul.f32 %v6851_v3, %v9767_v23  ;;  %6870 = vrcp.f32 %v4947_v34  ;;  %5031 = vperm.xlu1 %6008, %v5005_v1   ;;  %v4922_v34 = vand.u32 2147483648, %v9784_v25  ;;  %vm4935_vm15 = vcmp.eq.f32.partialorder %v9802_v62, 0.0 }
 0x6c9   : > { %v6853_v53 = vpop.eup %6852  ;;  %v4906_v45 = vsel %vm4905_vm6, %v9765_v42, %v4904_v59  ;;  %6872 = vrcp.f32 %v4948_v5  ;;  %v2651_v42 = vpop.permute.xlu1 %2650 }
 0x6ca   : > { %v6855_v7 = vpop.eup %6854  ;;  %v4909_v39 = vsel %vm4907_vm7, %v4908_v18, %v4906_v45  ;;  %v4913_v13 = vsel %vm4912_vm8, %v9767_v23, %v4911_v14  ;;  %v5006_v28 = vmul.f32 %v6853_v53, %v9722_v44  ;;  %v4929_v18 = vand.u32 2147483648, %v9791_v11  ;;  %v2653_v53 = vpop.permute.xlu0 %2652 }
 0x6cb   : > { %v6857_v47 = vpop.eup %6856  ;;  %v4949_v33 = vmax.f32 %v4909_v39, 1e-12  ;;  %v4916_v38 = vsel %vm4914_vm9, %v4915_v58, %v4913_v13  ;;  %v5007_v57 = vmul.f32 %v6855_v7, %v9742_v4  ;;  %v4936_v39 = vand.u32 2147483648, %v9802_v62  ;;  %v10546_v13 = vld [vmem:[#allocation181_spill] sm:$0xff] }
 0x6cc   : > { %v6859_v24 = vpop.eup %6858  ;;  %v4950_v46 = vmax.f32 %v4916_v38, 1e-12  ;;  %v4918_v3 = vmul.f32 %v6857_v47, %v9784_v25  ;;  %5036 = vperm.xlu1 %6008, %v5006_v28   ;;  %v2687_v47 = vmul.f32 %v10546_v13, %v2649_v27 }
 0x6cd   : > { %v6861_v23 = vpop.eup %6860  ;;  %6874 = vrcp.f32 %v4949_v33  ;;  %v4925_v35 = vmul.f32 %v6859_v24, %v9791_v11  ;;  %5041 = vperm.xlu0 %6009, %v5007_v57   ;;  %v2655_v28 = vpop.permute.xlu1 %2654 }
 0x6ce   : > { %v6863_v59 = vpop.eup %6862  ;;  %6876 = vrcp.f32 %v4950_v46  ;;  %v4920_v44 = vsel %vm4919_vm10, %v9784_v25, %v4918_v3  ;;  %v5008_v45 = vmul.f32 %v6861_v23, %v9725_v29  ;;  %v10547_v29 = vld [vmem:[#allocation178_spill] sm:$0xff]  ;;  %v4996_v27 = vmul.f32 %v9702_v60, %v2687_v47  ;;  %v2657_v57 = vpop.permute.xlu0 %2656 }
 0x6cf   : > { %v6865_v5 = vpop.eup %6864  ;;  %v4923_v14 = vsel %vm4921_vm11, %v4922_v34, %v4920_v44  ;;  %v4927_v17 = vsel %vm4926_vm12, %v9791_v11, %v4925_v35  ;;  %v5009_v25 = vmul.f32 %v6863_v59, %v9745_v32  ;;  %v2688_v38 = vmul.f32 %v10547_v29, %v2651_v42  ;;  %v10548_v34 = vld [vmem:[#allocation179_spill] sm:$0xff]  ;;  %v10549_v42 = vld [vmem:[#allocation184_spill] sm:$0xff] }
 0x6d0   : > { %v4951_v4 = vmax.f32 %v4923_v14, 1e-12  ;;  %v4930_v58 = vsel %vm4928_vm13, %v4929_v18, %v4927_v17  ;;  %v4932_v1 = vmul.f32 %v6865_v5, %v9802_v62  ;;  %5046 = vperm.xlu1 %6008, %v5008_v45   ;;  %v2689_v35 = vmul.f32 %v10548_v34, %v2653_v53 }
 0x6d1   : > { %v4952_v7 = vmax.f32 %v4930_v58, 1e-12  ;;  %v6867_v33 = vpop.eup %6866  ;;  %5051 = vperm.xlu0 %6009, %v5009_v25   ;;  %v2690_v44 = vmul.f32 %v10549_v42, %v2655_v28  ;;  %v2659_v17 = vpop.permute.xlu1 %2658  ;;  %v10551_v25 = vld [vmem:[#allocation182_spill] sm:$0xff] }
 0x6d2   : > { %6878 = vrcp.f32 %v4951_v4  ;;  %v4934_v11 = vsel %vm4933_vm14, %v9802_v62, %v4932_v1  ;;  %v6869_v24 = vpop.eup %6868  ;;  %v5010_v32 = vmul.f32 %v6867_v33, %v9732_v12  ;;  %v4997_v62 = vmul.f32 %v9702_v60, %v2688_v38  ;;  %v10550_v4 = vld [vmem:[#allocation185_spill] sm:$0xff]  ;;  %v10552_v33 = vld [vmem:[#allocation183_spill] sm:$0xff] }
 0x6d3   : > { %6880 = vrcp.f32 %v4952_v7  ;;  %v4937_v46 = vsel %vm4935_vm15, %v4936_v39, %v4934_v11  ;;  %v5011_v23 = vmul.f32 %v6869_v24, %v4995_v30  ;;  %v4998_v12 = vmul.f32 %v9702_v60, %v2689_v35  ;;  %v2661_v39 = vpop.permute.xlu0 %2660 }
 0x6d4   : > { %v4953_v3 = vmax.f32 %v4937_v46, 1e-12  ;;  %5056 = vperm.xlu1 %6008, %v5010_v32   ;;  %v4999_v45 = vmul.f32 %v9702_v60, %v2690_v44  ;;  %v2691_v53 = vmul.f32 %v10550_v4, %v2657_v57  ;;  %v2692_v7 = vmul.f32 %v10551_v25, %v2659_v17 }
 0x6d5   : > { %v6871_v59 = vpop.eup %6870  ;;  %5061 = vperm.xlu0 %6009, %v5011_v23   ;;  %v2693_v11 = vmul.f32 %v10552_v33, %v2661_v39 }
 0x6d6   : > { %6882 = vrcp.f32 %v4953_v3  ;;  %v6873_v18 = vpop.eup %6872  ;;  %v5012_v5 = vmul.f32 %v6871_v59, %v4996_v27  ;;  %v5000_v47 = vmul.f32 %v9702_v60, %v2691_v53  ;;  %v5001_v38 = vmul.f32 %v9702_v60, %v2692_v7 }
 0x6d7   : > { %v5013_v14 = vmul.f32 %v6873_v18, %v4997_v62  ;;  %v5002_v32 = vmul.f32 %v9702_v60, %v2693_v11 }
 0x6d8   : > { %5066 = vperm.xlu1 %6008, %v5012_v5  }
 0x6d9   : > { %5071 = vperm.xlu0 %6009, %v5013_v14  }
 0x6da   : > { %v6875_v30 = vpop.eup %6874 }
 0x6db   : > { %v6877_v58 = vpop.eup %6876  ;;  %v5014_v1 = vmul.f32 %v6875_v30, %v4998_v12 }
 0x6dc   : > { %v5015_v13 = vmul.f32 %v6877_v58, %v4999_v45 }
 0x6dd   : > { %5076 = vperm.xlu1 %6008, %v5014_v1  }
 0x6de   : > { %5081 = vperm.xlu0 %6009, %v5015_v13  }
 0x6df   : > { %v6879_v29 = vpop.eup %6878 }
 0x6e0   : > { %v6881_v28 = vpop.eup %6880  ;;  %v5016_v24 = vmul.f32 %v6879_v29, %v5000_v47 }
 0x6e1   : > { %v5017_v46 = vmul.f32 %v6881_v28, %v5001_v38 }
 0x6e2   : > { %5086 = vperm.xlu1 %6008, %v5016_v24  }
 0x6e3   : > { %v6883_v3 = vpop.eup %6882  ;;  %5091 = vperm.xlu0 %6009, %v5017_v46  }
 0x6e4   : > { %v5018_v23 = vmul.f32 %v6883_v3, %v5002_v32 }
 0x6e6   : > { %5096 = vperm.xlu1 %6008, %v5018_v23  }
 0x6e7   : > { %7060 = shalt.err (!%p7057_p13)
}
 0x6e8   : > { %s7061_s9 = scalar_lea.hbm %s9887_s16, 2048  ;;  %s7065_s21 = scalar_lea.hbm %s10029_s8, 4096 }
 0x6e9   : > { %p7062_p2 = scmp.ne.s32.totalorder %s9887_s16, %s7061_s9  ;;  %p7066_p6 = scmp.lt.s32.totalorder %s9887_s16, %s10029_s8 }
 0x6ea   : > { %p7067_p0 = scmp.lt.s32.totalorder %s7065_s21, %s7061_s9 }
 0x6eb   : > { %p7063_p3 = pnand %p7062_p2, %p10553_p11 }
 0x6ec   : > { %p7068_p8 = por %p7067_p0, %p7066_p6 }
 0x6ed   : > { %p7064_p10 = pneg %p7063_p3 }
 0x6ef   : > { %p7069_p9 = pnand %p7068_p8, %p7064_p10 }
 0x6f1   : > { %7072 = shalt.err (!%p7069_p9)
}
 0x6f2   : > { %s7175_s20 = smov 128   ;;  %s7176_s23 = smov 8   ;;  %v10554_v7 = vld [vmem:[#allocation58_spill] sm:$0xff]  ;;  %v10556_v13 = vld [vmem:[#allocation61_spill] sm:$0xff] }
 0x6f3   : > { %5900 = dma.vmem_to_hbm [thread:$0]  (%p10553_p11), %s9890_s25, 2048, %s9887_s16, %s5153_s18, %s7175_s20, %s7175_s20, %s7176_s23  }
 0x6f4   : > { %s9921_s19 = scalar_lea.vmem [#allocation13], %s7385_s2  ;;  %s9974_s18 = scalar_lea.hbm %s10028_s7, %s5617_s13 }
 0x6f5   : > { %s5166_s2 = sshll.u32 %s9921_s19, 4  ;;  %s5148_s9 = scalar_lea.sflag [#allocation4], %s7382_s0  ;;  %s9976_s2 = int_to_ptr.vmem [resolvable:$true] %s5166_s2 }
 0x6f6   : > { %s7073_s10 = scalar_lea.vmem %s9976_s2, 2048  ;;  %s7177_s15 = smov [#allocation13]  }
 0x6f7   : > { %p7074_p4 = scmp.ne.s32.totalorder %s9976_s2, %s7073_s10  ;;  %s7077_s21 = sshll.u32 %s7177_s15, 4  ;;  %s7078_s21 = int_to_ptr.vmem [resolvable:$false] %s7077_s21 }
 0x6f8   : > { %s7079_s11 = scalar_lea.vmem %s7078_s21, 4096  ;;  %p7080_p5 = scmp.lt.s32.totalorder %s9976_s2, %s7078_s21 }
 0x6f9   : > { %p7075_p12 = pnand %p7074_p4, %p10553_p11  ;;  %p7081_p1 = scmp.lt.s32.totalorder %s7079_s11, %s7073_s10 }
 0x6fb   : > { %p7076_p7 = pneg %p7075_p12  ;;  %p7082_p13 = por %p7081_p1, %p7080_p5 }
 0x6fd   : > { %p7083_p2 = pnand %p7082_p13, %p7076_p7 }
 0x73d   : > { %v5022_v60 = vpop.permute.xlu1 %5021 }
 0x73e   : > { %v5099_v27 = vmul.f32 %v9618_v21, %v5022_v60 }
 0x740   : > { %v5115_v34 = vadd.f32 %v5099_v27, %v9536_v36 }
 0x741   : > { %v5027_v35 = vpop.permute.xlu0 %5026 }
 0x742   : > { %5131 = vst [vmem:[%s9921_s19] sm:$0xff] %v5115_v34  ;;  %v5100_v57 = vmul.f32 %v9622_v16, %v5027_v35 }
 0x743   : > { %v5032_v59 = vpop.permute.xlu1 %5031 }
 0x744   : > { %v5101_v62 = vmul.f32 %v9626_v20, %v5032_v59  ;;  %v5116_v42 = vadd.f32 %v5100_v57, %v9543_v61 }
 0x746   : > { %v5117_v21 = vadd.f32 %v5101_v62, %v9550_v9  ;;  %5132 = vst [vmem:[%s9921_s19 + $0x8] sm:$0xff] %v5116_v42 }
 0x747   : > { %v5037_v36 = vpop.permute.xlu1 %5036 }
 0x748   : > { %v5042_v44 = vpop.permute.xlu0 %5041  ;;  %5133 = vst [vmem:[%s9921_s19 + $0x10] sm:$0xff] %v5117_v21  ;;  %v5102_v18 = vmul.f32 %v9632_v0, %v5037_v36 }
 0x749   : > { %v5103_v5 = vmul.f32 %v9628_v50, %v5042_v44 }
 0x74a   : > { %v5118_v16 = vadd.f32 %v5102_v18, %v9557_v51 }
 0x74b   : > { %v5119_v14 = vadd.f32 %v5103_v5, %v9579_v10  ;;  %v5047_v17 = vpop.permute.xlu1 %5046 }
 0x74c   : > { %v5052_v20 = vpop.permute.xlu0 %5051  ;;  %5134 = vst [vmem:[%s9921_s19 + $0x18] sm:$0xff] %v5118_v16  ;;  %v5104_v61 = vmul.f32 %v9636_v63, %v5047_v17 }
 0x74d   : > { %5135 = vst [vmem:[%s9921_s19 + $0x20] sm:$0xff] %v5119_v14  ;;  %v5105_v9 = vmul.f32 %v9638_v40, %v5052_v20 }
 0x74e   : > { %v5120_v12 = vadd.f32 %v5104_v61, %v9584_v54 }
 0x74f   : > { %v5121_v0 = vadd.f32 %v5105_v9, %v9591_v8  ;;  %v5057_v30 = vpop.permute.xlu1 %5056 }
 0x750   : > { %v5062_v50 = vpop.permute.xlu0 %5061  ;;  %5136 = vst [vmem:[%s9921_s19 + $0x28] sm:$0xff] %v5120_v12  ;;  %v5106_v51 = vmul.f32 %v9646_v56, %v5057_v30 }
 0x751   : > { %5137 = vst [vmem:[%s9921_s19 + $0x30] sm:$0xff] %v5121_v0  ;;  %v5107_v10 = vmul.f32 %v9648_v52, %v5062_v50 }
 0x752   : > { %v5122_v45 = vadd.f32 %v5106_v51, %v9596_v31 }
 0x753   : > { %v5123_v63 = vadd.f32 %v5107_v10, %v9600_v41  ;;  %v5067_v4 = vpop.permute.xlu1 %5066 }
 0x754   : > { %v5072_v40 = vpop.permute.xlu0 %5071  ;;  %5138 = vst [vmem:[%s9921_s19 + $0x38] sm:$0xff] %v5122_v45  ;;  %v5108_v54 = vmul.f32 %v9654_v55, %v5067_v4 }
 0x755   : > { %5139 = vst [vmem:[%s9921_s19 + $0x40] sm:$0xff] %v5123_v63  ;;  %v5109_v8 = vmul.f32 %v9656_v22, %v5072_v40 }
 0x756   : > { %v5124_v53 = vadd.f32 %v5108_v54, %v9603_v2 }
 0x757   : > { %v5125_v56 = vadd.f32 %v5109_v8, %v9606_v26 }
 0x758   : > { %v5077_v58 = vpop.permute.xlu1 %5076  ;;  %5140 = vst [vmem:[%s9921_s19 + $0x48] sm:$0xff] %v5124_v53 }
 0x759   : > { %v5082_v52 = vpop.permute.xlu0 %5081  ;;  %5141 = vst [vmem:[%s9921_s19 + $0x50] sm:$0xff] %v5125_v56  ;;  %v5110_v31 = vmul.f32 %v9662_v19, %v5077_v58 }
 0x75a   : > { %v5111_v41 = vmul.f32 %v9664_v15, %v5082_v52 }
 0x75b   : > { %v5126_v1 = vadd.f32 %v5110_v31, %v9608_v43  ;;  %v10555_v43 = vld [vmem:[#allocation63_spill] sm:$0xff] }
 0x75c   : > { %v5127_v55 = vadd.f32 %v5111_v41, %v9610_v48 }
 0x75d   : > { %v5087_v22 = vpop.permute.xlu1 %5086  ;;  %5142 = vst [vmem:[%s9921_s19 + $0x58] sm:$0xff] %v5126_v1 }
 0x75e   : > { %v5092_v2 = vpop.permute.xlu0 %5091  ;;  %5143 = vst [vmem:[%s9921_s19 + $0x60] sm:$0xff] %v5127_v55  ;;  %v5112_v26 = vmul.f32 %v9670_v6, %v5087_v22 }
 0x75f   : > { %v5113_v25 = vmul.f32 %v9672_v49, %v5092_v2 }
 0x760   : > { %v5128_v19 = vadd.f32 %v5112_v26, %v9612_v37 }
 0x761   : > { %v5129_v15 = vadd.f32 %v5113_v25, %v10554_v7  ;;  %v5097_v39 = vpop.permute.xlu1 %5096 }
 0x762   : > { %5144 = vst [vmem:[%s9921_s19 + $0x68] sm:$0xff] %v5128_v19  ;;  %v5114_v48 = vmul.f32 %v10555_v43, %v5097_v39 }
 0x763   : > { %5145 = vst [vmem:[%s9921_s19 + $0x70] sm:$0xff] %v5129_v15 }
 0x764   : > { %v5130_v47 = vadd.f32 %v5114_v48, %v10556_v13 }
 0x766   : > { %5146 = vst [vmem:[%s9921_s19 + $0x78] sm:$0xff] %v5130_v47 }
 0x767   : > { %7086 = shalt.err (!%p7083_p2)
}
 0x768   : > { %s7087_s13 = scalar_lea.hbm %s9974_s18, 2048  ;;  %s7091_s24 = scalar_lea.hbm %s10028_s7, 4096 }
 0x769   : > { %p7088_p3 = scmp.ne.s32.totalorder %s9974_s18, %s7087_s13  ;;  %p7092_p0 = scmp.lt.s32.totalorder %s9974_s18, %s10028_s7 }
 0x76a   : > { %p7093_p8 = scmp.lt.s32.totalorder %s7091_s24, %s7087_s13 }
 0x76b   : > { %p7089_p10 = pnand %p7088_p3, %p10553_p11 }
 0x76c   : > { %p7094_p9 = por %p7093_p8, %p7092_p0 }
 0x76d   : > { %p7090_p6 = pneg %p7089_p10 }
 0x76f   : > { %p7095_p4 = pnand %p7094_p9, %p7090_p6 }
 0x771   : > { %7098 = shalt.err (!%p7095_p4)
}
 0x772   : > { %5899 = dma.vmem_to_hbm [thread:$0]  (%p10553_p11), %s9976_s2, 2048, %s9974_s18, %s5148_s9, %s7175_s20, %s7175_s20, %s7176_s23  }
 0x773 PF: > { %s5197_s25 = sand.u32 1, %s7141_s27   ;;  %p10557_p12 = scmp.ne.s32.totalorder %s10150_s17, 0 }
 0x774   : > { %p10558_p7 = scmp.ge.s32.totalorder %s7153_s30, 2  ;;  %s5198_s10 = scalar_lea.sflag [#allocation4], %s5197_s25 }
 0x776   : > { %p5924_p5 = pnand %p10558_p7, %p10557_p12 }
 0x778   : > { %p5925_p1 = pneg %p5924_p5 }
 0x77a   : > { %7132 = dma.done.wait (%p5925_p1), %s5198_s10, 2048  }
 0x77b   : > { %7134 = vsyncadd (%p5925_p1), %s5198_s10, 4294965248  ;;  %s5207_s15 = scalar_lea.sflag [#allocation15], %s5197_s25 }
 0x77c   : > { %7136 = dma.done.wait (%p5925_p1), %s5207_s15, 2048  }
 0x77d   : > { %7138 = vsyncadd (%p5925_p1), %s5207_s15, 4294965248  ;;  %p28_p11 = scmp.ge.s32.totalorder %s7312_s26, 4   ;;  %s10559_s27 = smov %s7145_s28 }
 0x77e   : > { %s10560_s28 = smov %s7149_s29  ;;  %s10561_s29 = smov %s7324_s14 }
 0x77f   : > { %s10562_s30 = smov %s7312_s26  ;;  %30 = sbr.rel (!%p28_p11) target bundleno = 13 (0xd), region = 131 }
 0x784   :  { %5212 = vsyncpa [#allocation3], 1 }
 0x785   :  { %5214 = vsyncpa [#allocation3 + $0x1], 1 }
 0x786   :  { %5215 = vsyncpa [#allocation8], 1 }
 0x787   :  { %5216 = vsyncpa [#allocation11], 1 }
 0x788   :  { %5217 = vsyncpa [#allocation4], 1 }
 0x789   :  { %5219 = vsyncpa [#allocation4 + $0x1], 1 }
 0x78a   :  { %5220 = vsyncpa [#allocation15], 1 }
 0x78b   :  { %5222 = vsyncpa [#allocation15 + $0x1], 1 }
 0x78c   :  { %5223 = vsyncpa [#allocation5], 1 }
 0x78d   :  { %5225 = vsyncpa [#allocation5 + $0x1], 1 }

</bundles_post_ra>
